<compile_context>
chip_gen: v7x
topology: tpu7x:2x2x1
jax: 0.10.0
libtpu: 0.0.40
codegen_flags: <defaults>
</compile_context>

<pallas_src>
import functools

import jax
import jax.numpy as jnp
from jax.experimental import pallas as pl
from jax.experimental.pallas import tpu as pltpu

# Model hyper-parameters (small, consistent with the module's forward signature).
NUM_LAYERS = 2
D_MODEL = 128
NHEAD = 4
HEAD_DIM = D_MODEL // NHEAD
DIM_FF = 256
LN_EPS = 1e-5
SCALE = 1.0 / float(HEAD_DIM) ** 0.5


def _decoder_kernel(tgt_ref, mem_ref, pos_ref, qpos_ref,
                    w_qk_s_ref, b_qk_s_ref, w_misc_ref, b_misc_ref,
                    w1_ref, b1_ref, w2_ref, b2_ref,
                    ln_g_ref, ln_b_ref,
                    out_ref, ctx_ref, *, batch, t_len):
    """Whole decoder stack, batch folded: activations are (B*T, D) / (B*S, D) slabs."""
    x = tgt_ref[...]                      # (B*T, D) f32
    mem = mem_ref[...]                    # (B*S, D) f32
    qpos = qpos_ref[...]                  # (B*T, D) f32
    mem_k = mem + pos_ref[...]            # cross-attn key input, hoisted once

    def layer_norm(v, g, b):
        mu = jnp.mean(v, axis=-1, keepdims=True)
        c = v - mu
        var = jnp.mean(c * c, axis=-1, keepdims=True)
        return c * jax.lax.rsqrt(var + LN_EPS) * g + b

    def bf16_dot(a, w_bf16):
        # bf16 x bf16 MXU matmul with f32 accumulation.
        return jnp.dot(a.astype(jnp.bfloat16), w_bf16,
                       preferred_element_type=jnp.float32)

    def attend(q, k, v):
        # q: (B*T, D); k, v: (B*Tk, D).  Scale already folded into Wq.
        # Scores/softmax must not mix batch elements -> small per-(batch, head) blocks.
        tk = k.shape[0] // batch
        kT = k.T                                          # one transpose per attention
        for b in range(batch):                            # static unroll (tiny blocks)
            r0, r1 = b * t_len, (b + 1) * t_len
            c0, c1 = b * tk, (b + 1) * tk
            for h in range(NHEAD):
                lo, hi = h * HEAD_DIM, (h + 1) * HEAD_DIM
                qh = q[r0:r1, lo:hi]                       # (T, hd)
                kTh = kT[lo:hi, c0:c1]                     # (hd, Tk)
                s = jnp.dot(qh, kTh, preferred_element_type=jnp.float32)
                s = s - jnp.max(s, axis=-1, keepdims=True)
                p = jnp.exp(s)
                p = p * pl.reciprocal(jnp.sum(p, axis=-1, keepdims=True),
                                      approx=True)
                oh = jnp.dot(p, v[c0:c1, lo:hi],
                             preferred_element_type=jnp.float32)      # (T, hd)
                ctx_ref[r0:r1, lo:hi] = oh                 # static lane-offset store
        return ctx_ref[...]                                # (B*T, D)

    for l in range(NUM_LAYERS):            # whole layer stack fused in-kernel
        # --- self attention (fused Q|K projection, scale folded into Wq) ---
        q_in = x + qpos
        qk = bf16_dot(q_in, w_qk_s_ref[l]) + b_qk_s_ref[l]      # (B*T, 2D)
        q = qk[:, :D_MODEL]
        k = qk[:, D_MODEL:]
        v = bf16_dot(x, w_misc_ref[l, 0]) + b_misc_ref[l, 0]
        ctx = attend(q, k, v)
        sa = bf16_dot(ctx, w_misc_ref[l, 1]) + b_misc_ref[l, 1]  # single Wo matmul
        x = layer_norm(x + sa, ln_g_ref[l, 0], ln_b_ref[l, 0])

        # --- cross attention ---
        qc = bf16_dot(x + qpos, w_misc_ref[l, 2]) + b_misc_ref[l, 2]   # Wq_c pre-scaled
        kc = bf16_dot(mem_k, w_misc_ref[l, 3]) + b_misc_ref[l, 3]
        vc = bf16_dot(mem, w_misc_ref[l, 4]) + b_misc_ref[l, 4]
        ctx = attend(qc, kc, vc)
        ca = bf16_dot(ctx, w_misc_ref[l, 5]) + b_misc_ref[l, 5]
        x = layer_norm(x + ca, ln_g_ref[l, 1], ln_b_ref[l, 1])

        # --- feed forward (dropout = identity in eval mode) ---
        h1 = jnp.maximum(bf16_dot(x, w1_ref[l]) + b1_ref[l], 0.0)
        ff = bf16_dot(h1, w2_ref[l]) + b2_ref[l]
        x = layer_norm(x + ff, ln_g_ref[l, 2], ln_b_ref[l, 2])

    out_ref[...] = x


@jax.jit
def transformer_decoder_forward(tgt, memory, pos, query_pos, packed):
    """tgt/query_pos: (B, T, D); memory/pos: (B, S, D). Returns (B, T, D) float32."""
    (w_qk_s, b_qk_s, w_misc, b_misc, w1, b1, w2, b2, ln_g, ln_b) = packed
    B, T, D = tgt.shape
    S = memory.shape[1]
    L, F = NUM_LAYERS, DIM_FF

    # Fold batch into the row (sublane) axis: pure layout plumbing, no compute.
    tgt2 = tgt.reshape(B * T, D)
    mem2 = memory.reshape(B * S, D)
    pos2 = pos.reshape(B * S, D)
    qpos2 = query_pos.reshape(B * T, D)

    def full(shape):
        return pl.BlockSpec(shape, lambda i, _s=shape: (0,) * len(_s))

    kernel = functools.partial(_decoder_kernel, batch=B, t_len=T)

    out = pl.pallas_call(
        kernel,
        out_shape=jax.ShapeDtypeStruct((B * T, D), jnp.float32),
        grid=(1,),
        in_specs=[
            full((B * T, D)),        # tgt
            full((B * S, D)),        # memory
            full((B * S, D)),        # pos
            full((B * T, D)),        # query_pos
            full((L, D, 2 * D)),     # self-attn fused Wq|Wk (bf16, Wq pre-scaled)
            full((L, 1, 2 * D)),     # fused bq|bk (f32, bq pre-scaled)
            full((L, 6, D, D)),      # [Wv_s, Wo_s, Wq_c*scale, Wk_c, Wv_c, Wo_c] (bf16)
            full((L, 6, 1, D)),      # matching biases (f32)
            full((L, D, F)),         # ffn linear1 W (bf16)
            full((L, 1, F)),         # ffn linear1 b
            full((L, F, D)),         # ffn linear2 W (bf16)
            full((L, 1, D)),         # ffn linear2 b
            full((L, 3, 1, D)),      # layer-norm gamma (norm1..3)
            full((L, 3, 1, D)),      # layer-norm beta
        ],
        out_specs=full((B * T, D)),
        scratch_shapes=[pltpu.VMEM((B * T, D), jnp.float32)],   # per-head ctx assembly
        compiler_params=pltpu.CompilerParams(
            dimension_semantics=("arbitrary",)),
    )(tgt2, mem2, pos2, qpos2, w_qk_s, b_qk_s, w_misc, b_misc,
      w1, b1, w2, b2, ln_g, ln_b)
    return out.reshape(B, T, D)


def init_params(key):
    """Deterministic synthetic parameters for all decoder layers (stacked, f32)."""
    L, D, F = NUM_LAYERS, D_MODEL, DIM_FF
    ks = jax.random.split(key, 8)
    std = 0.05
    # attn order per layer: [Wq_s, Wk_s, Wv_s, Wo_s, Wq_c, Wk_c, Wv_c, Wo_c]
    attn_w = std * jax.random.normal(ks[0], (L, 8, D, D), jnp.float32)
    attn_b = std * jax.random.normal(ks[1], (L, 8, 1, D), jnp.float32)
    w1 = std * jax.random.normal(ks[2], (L, D, F), jnp.float32)
    b1 = std * jax.random.normal(ks[3], (L, 1, F), jnp.float32)
    w2 = std * jax.random.normal(ks[4], (L, F, D), jnp.float32)
    b2 = std * jax.random.normal(ks[5], (L, 1, D), jnp.float32)
    ln_g = 1.0 + 0.1 * jax.random.normal(ks[6], (L, 3, 1, D), jnp.float32)
    ln_b = 0.1 * jax.random.normal(ks[7], (L, 3, 1, D), jnp.float32)
    return (attn_w, attn_b, w1, b1, w2, b2, ln_g, ln_b)


def pack_params(params):
    """One-time host-side packing: fuse self-attn Wq|Wk, fold the 1/sqrt(hd) scale into the
    query projections, and cast weight matrices to bf16 (biases / LN params stay f32)."""
    attn_w, attn_b, w1, b1, w2, b2, ln_g, ln_b = params
    wq_s = attn_w[:, 0] * SCALE
    bq_s = attn_b[:, 0] * SCALE
    w_qk_s = jnp.concatenate([wq_s, attn_w[:, 1]], axis=-1)       # (L, D, 2D)
    b_qk_s = jnp.concatenate([bq_s, attn_b[:, 1]], axis=-1)       # (L, 1, 2D)
    w_misc = jnp.stack([attn_w[:, 2], attn_w[:, 3],
                        attn_w[:, 4] * SCALE, attn_w[:, 5],
                        attn_w[:, 6], attn_w[:, 7]], axis=1)      # (L, 6, D, D)
    b_misc = jnp.stack([attn_b[:, 2], attn_b[:, 3],
                        attn_b[:, 4] * SCALE, attn_b[:, 5],
                        attn_b[:, 6], attn_b[:, 7]], axis=1)      # (L, 6, 1, D)
    return (w_qk_s.astype(jnp.bfloat16), b_qk_s,
            w_misc.astype(jnp.bfloat16), b_misc,
            w1.astype(jnp.bfloat16), b1,
            w2.astype(jnp.bfloat16), b2,
            ln_g, ln_b)


def decoder_reference(tgt, memory, pos, query_pos, params):
    """Pure-jnp float32 reference of the same decoder stack (PyTorch eval-mode semantics)."""
    attn_w, attn_b, w1, b1, w2, b2, ln_g, ln_b = params
    x = tgt
    mem_k = memory + pos

    def layer_norm(v, g, b):
        mu = jnp.mean(v, axis=-1, keepdims=True)
        c = v - mu
        var = jnp.mean(c * c, axis=-1, keepdims=True)
        return c * jax.lax.rsqrt(var + LN_EPS) * g + b

    def mha(q_in, k_in, v_in, l, base):
        q = q_in @ attn_w[l, base + 0] + attn_b[l, base + 0]
        k = k_in @ attn_w[l, base + 1] + attn_b[l, base + 1]
        v = v_in @ attn_w[l, base + 2] + attn_b[l, base + 2]
        B_, Tq, _ = q.shape
        Tk = k.shape[1]
        qh = q.reshape(B_, Tq, NHEAD, HEAD_DIM).transpose(0, 2, 1, 3)
        kh = k.reshape(B_, Tk, NHEAD, HEAD_DIM).transpose(0, 2, 1, 3)
        vh = v.reshape(B_, Tk, NHEAD, HEAD_DIM).transpose(0, 2, 1, 3)
        s = jnp.einsum('bhqd,bhkd->bhqk', qh, kh) * SCALE
        p = jax.nn.softmax(s, axis=-1)
        oh = jnp.einsum('bhqk,bhkd->bhqd', p, vh)
        o = oh.transpose(0, 2, 1, 3).reshape(B_, Tq, D_MODEL)
        return o @ attn_w[l, base + 3] + attn_b[l, base + 3]

    for l in range(NUM_LAYERS):
        qk = x + query_pos
        x = layer_norm(x + mha(qk, qk, x, l, 0), ln_g[l, 0], ln_b[l, 0])
        x = layer_norm(x + mha(x + query_pos, mem_k, memory, l, 4),
                       ln_g[l, 1], ln_b[l, 1])
        h1 = jnp.maximum(x @ w1[l] + b1[l], 0.0)
        x = layer_norm(x + h1 @ w2[l] + b2[l], ln_g[l, 2], ln_b[l, 2])
    return x


if __name__ == "__main__":
    key = jax.random.PRNGKey(0)
    k_t, k_m, k_p, k_q, k_w = jax.random.split(key, 5)
    B, T, S = 2, 8, 16   # batch, num queries (tgt len), memory len
    tgt = jax.random.normal(k_t, (B, T, D_MODEL), jnp.float32)
    memory = jax.random.normal(k_m, (B, S, D_MODEL), jnp.float32)
    pos = jax.random.normal(k_p, (B, S, D_MODEL), jnp.float32)
    query_pos = jax.random.normal(k_q, (B, T, D_MODEL), jnp.float32)

    params = init_params(k_w)
    packed = pack_params(params)   # one-time weight prep (fusion, scale fold, bf16 cast)

    out = transformer_decoder_forward(tgt, memory, pos, query_pos, packed)
    out = jax.block_until_ready(out)

    assert out.shape == (B, T, D_MODEL), out.shape
    assert bool(jnp.all(jnp.isfinite(out)))
    ref = decoder_reference(tgt, memory, pos, query_pos, params)
    max_err = float(jnp.max(jnp.abs(out - ref)))
    # bf16 weights/activations in the matmuls -> looser tolerance than pure f32.
    assert bool(jnp.allclose(out, ref, rtol=5e-2, atol=5e-2)), max_err
    print("KERNEL_OK")
</pallas_src>

<mosaic_0001>
module attributes {stable_mosaic.version = 11 : i64} {
  func.func @_decoder_kernel(%arg0: i32, %arg1: memref<16x128xf32, #tpu.memory_space<vmem>>, %arg2: memref<32x128xf32, #tpu.memory_space<vmem>>, %arg3: memref<32x128xf32, #tpu.memory_space<vmem>>, %arg4: memref<16x128xf32, #tpu.memory_space<vmem>>, %arg5: memref<2x128x256xbf16, #tpu.memory_space<vmem>>, %arg6: memref<2x1x256xf32, #tpu.memory_space<vmem>>, %arg7: memref<2x6x128x128xbf16, #tpu.memory_space<vmem>>, %arg8: memref<2x6x1x128xf32, #tpu.memory_space<vmem>>, %arg9: memref<2x128x256xbf16, #tpu.memory_space<vmem>>, %arg10: memref<2x1x256xf32, #tpu.memory_space<vmem>>, %arg11: memref<2x256x128xbf16, #tpu.memory_space<vmem>>, %arg12: memref<2x1x128xf32, #tpu.memory_space<vmem>>, %arg13: memref<2x3x1x128xf32, #tpu.memory_space<vmem>>, %arg14: memref<2x3x1x128xf32, #tpu.memory_space<vmem>>, %arg15: memref<16x128xf32, #tpu.memory_space<vmem>>, %arg16: memref<16x128xf32, #tpu.memory_space<vmem>>) attributes {dimension_semantics = [#tpu.dimension_semantics<arbitrary>], iteration_bounds = array<i64: 1>, scalar_prefetch = 0 : i64, scratch_operands = 1 : i64, tpu.core_type = #tpu.core_type<tc>, window_params = [{pipeline_mode = #tpu.pipeline_mode<synchronous>, transform_indices = @transform_0, window_bounds = array<i64: 16, 128>}, {pipeline_mode = #tpu.pipeline_mode<synchronous>, transform_indices = @transform_1, window_bounds = array<i64: 32, 128>}, {pipeline_mode = #tpu.pipeline_mode<synchronous>, transform_indices = @transform_2, window_bounds = array<i64: 32, 128>}, {pipeline_mode = #tpu.pipeline_mode<synchronous>, transform_indices = @transform_3, window_bounds = array<i64: 16, 128>}, {pipeline_mode = #tpu.pipeline_mode<synchronous>, transform_indices = @transform_4, window_bounds = array<i64: 2, 128, 256>}, {pipeline_mode = #tpu.pipeline_mode<synchronous>, transform_indices = @transform_5, window_bounds = array<i64: 2, 1, 256>}, {pipeline_mode = #tpu.pipeline_mode<synchronous>, transform_indices = @transform_6, window_bounds = array<i64: 2, 6, 128, 128>}, {pipeline_mode = #tpu.pipeline_mode<synchronous>, transform_indices = @transform_7, window_bounds = array<i64: 2, 6, 1, 128>}, {pipeline_mode = #tpu.pipeline_mode<synchronous>, transform_indices = @transform_8, window_bounds = array<i64: 2, 128, 256>}, {pipeline_mode = #tpu.pipeline_mode<synchronous>, transform_indices = @transform_9, window_bounds = array<i64: 2, 1, 256>}, {pipeline_mode = #tpu.pipeline_mode<synchronous>, transform_indices = @transform_10, window_bounds = array<i64: 2, 256, 128>}, {pipeline_mode = #tpu.pipeline_mode<synchronous>, transform_indices = @transform_11, window_bounds = array<i64: 2, 1, 128>}, {pipeline_mode = #tpu.pipeline_mode<synchronous>, transform_indices = @transform_12, window_bounds = array<i64: 2, 3, 1, 128>}, {pipeline_mode = #tpu.pipeline_mode<synchronous>, transform_indices = @transform_13, window_bounds = array<i64: 2, 3, 1, 128>}, {pipeline_mode = #tpu.pipeline_mode<synchronous>, transform_indices = @transform_14, window_bounds = array<i64: 16, 128>}]} {
    %c0 = arith.constant 0 : index
    %c0_0 = arith.constant 0 : index
    %0 = vector.load %arg1[%c0, %c0_0] : memref<16x128xf32, #tpu.memory_space<vmem>>, vector<16x128xf32>
    %c0_1 = arith.constant 0 : index
    %c0_2 = arith.constant 0 : index
    %1 = vector.load %arg2[%c0_1, %c0_2] : memref<32x128xf32, #tpu.memory_space<vmem>>, vector<32x128xf32>
    %c0_3 = arith.constant 0 : index
    %c0_4 = arith.constant 0 : index
    %2 = vector.load %arg4[%c0_3, %c0_4] : memref<16x128xf32, #tpu.memory_space<vmem>>, vector<16x128xf32>
    %c0_5 = arith.constant 0 : index
    %c0_6 = arith.constant 0 : index
    %3 = vector.load %arg3[%c0_5, %c0_6] : memref<32x128xf32, #tpu.memory_space<vmem>>, vector<32x128xf32>
    %4 = arith.addf %1, %3 : vector<32x128xf32>
    %5 = arith.addf %0, %2 : vector<16x128xf32>
    %c0_7 = arith.constant 0 : index
    %c0_8 = arith.constant 0 : index
    %c0_9 = arith.constant 0 : index
    %6 = vector.load %arg5[%c0_7, %c0_8, %c0_9] : memref<2x128x256xbf16, #tpu.memory_space<vmem>>, vector<1x128x256xbf16>
    %7 = vector.shape_cast %6 : vector<1x128x256xbf16> to vector<128x256xbf16>
    %8 = arith.truncf %5 : vector<16x128xf32> to vector<16x128xbf16>
    %cst = arith.constant dense<0.000000e+00> : vector<16x256xf32>
    %9 = tpu.matmul %8, %7, %cst {dimension_numbers = #tpu.dot_dimension_numbers<[1], [0], [0], [1], [0, 0, 1, 1], [], []>} : vector<16x128xbf16>, vector<128x256xbf16>, vector<16x256xf32> -> vector<16x256xf32>
    %c0_10 = arith.constant 0 : index
    %c0_11 = arith.constant 0 : index
    %c0_12 = arith.constant 0 : index
    %10 = vector.load %arg6[%c0_10, %c0_11, %c0_12] : memref<2x1x256xf32, #tpu.memory_space<vmem>>, vector<1x1x256xf32>
    %11 = vector.shape_cast %10 : vector<1x1x256xf32> to vector<1x256xf32>
    %12 = vector.broadcast %11 : vector<1x256xf32> to vector<16x256xf32>
    %13 = arith.addf %9, %12 : vector<16x256xf32>
    %14 = vector.extract_strided_slice %13 {offsets = [0, 0], sizes = [16, 128], strides = [1, 1]} : vector<16x256xf32> to vector<16x128xf32>
    %15 = vector.extract_strided_slice %13 {offsets = [0, 128], sizes = [16, 128], strides = [1, 1]} : vector<16x256xf32> to vector<16x128xf32>
    %c0_13 = arith.constant 0 : index
    %c0_14 = arith.constant 0 : index
    %c0_15 = arith.constant 0 : index
    %c0_16 = arith.constant 0 : index
    %16 = vector.load %arg7[%c0_13, %c0_14, %c0_15, %c0_16] : memref<2x6x128x128xbf16, #tpu.memory_space<vmem>>, vector<1x1x128x128xbf16>
    %17 = vector.shape_cast %16 : vector<1x1x128x128xbf16> to vector<128x128xbf16>
    %18 = arith.truncf %0 : vector<16x128xf32> to vector<16x128xbf16>
    %cst_17 = arith.constant dense<0.000000e+00> : vector<16x128xf32>
    %19 = tpu.matmul %18, %17, %cst_17 {dimension_numbers = #tpu.dot_dimension_numbers<[1], [0], [0], [1], [0, 0, 1, 1], [], []>} : vector<16x128xbf16>, vector<128x128xbf16>, vector<16x128xf32> -> vector<16x128xf32>
    %c0_18 = arith.constant 0 : index
    %c0_19 = arith.constant 0 : index
    %c0_20 = arith.constant 0 : index
    %c0_21 = arith.constant 0 : index
    %20 = vector.load %arg8[%c0_18, %c0_19, %c0_20, %c0_21] : memref<2x6x1x128xf32, #tpu.memory_space<vmem>>, vector<1x1x1x128xf32>
    %21 = vector.shape_cast %20 : vector<1x1x1x128xf32> to vector<1x128xf32>
    %22 = vector.broadcast %21 : vector<1x128xf32> to vector<16x128xf32>
    %23 = arith.addf %19, %22 : vector<16x128xf32>
    %24 = tpu.transpose %15, [1, 0] : vector<16x128xf32> -> vector<128x16xf32>
    %25 = vector.extract_strided_slice %14 {offsets = [0, 0], sizes = [8, 32], strides = [1, 1]} : vector<16x128xf32> to vector<8x32xf32>
    %26 = vector.extract_strided_slice %24 {offsets = [0, 0], sizes = [32, 8], strides = [1, 1]} : vector<128x16xf32> to vector<32x8xf32>
    %cst_22 = arith.constant dense<0.000000e+00> : vector<8x8xf32>
    %27 = tpu.matmul %25, %26, %cst_22 {dimension_numbers = #tpu.dot_dimension_numbers<[1], [0], [0], [1], [0, 0, 1, 1], [], []>} : vector<8x32xf32>, vector<32x8xf32>, vector<8x8xf32> -> vector<8x8xf32>
    %cst_23 = arith.constant dense<0xFF800000> : vector<8xf32>
    %28 = vector.multi_reduction <maximumf>, %27, %cst_23 [1] : vector<8x8xf32> to vector<8xf32>
    %29 = vector.shape_cast %28 : vector<8xf32> to vector<8x1xf32>
    %30 = vector.broadcast %29 : vector<8x1xf32> to vector<8x8xf32>
    %31 = arith.subf %27, %30 : vector<8x8xf32>
    %32 = math.exp %31 : vector<8x8xf32>
    %cst_24 = arith.constant dense<0.000000e+00> : vector<8xf32>
    %33 = vector.multi_reduction <add>, %32, %cst_24 [1] : vector<8x8xf32> to vector<8xf32>
    %34 = vector.shape_cast %33 : vector<8xf32> to vector<8x1xf32>
    %35 = tpu.reciprocal %34 {approx = true} : vector<8x1xf32> -> vector<8x1xf32>
    %36 = vector.broadcast %35 : vector<8x1xf32> to vector<8x8xf32>
    %37 = arith.mulf %32, %36 : vector<8x8xf32>
    %38 = vector.extract_strided_slice %23 {offsets = [0, 0], sizes = [8, 32], strides = [1, 1]} : vector<16x128xf32> to vector<8x32xf32>
    %cst_25 = arith.constant dense<0.000000e+00> : vector<8x32xf32>
    %39 = tpu.matmul %37, %38, %cst_25 {dimension_numbers = #tpu.dot_dimension_numbers<[1], [0], [0], [1], [0, 0, 1, 1], [], []>} : vector<8x8xf32>, vector<8x32xf32>, vector<8x32xf32> -> vector<8x32xf32>
    %c0_26 = arith.constant 0 : index
    %c0_27 = arith.constant 0 : index
    %40 = vector.load %arg16[%c0_26, %c0_27] : memref<16x128xf32, #tpu.memory_space<vmem>>, vector<8x32xf32>
    tpu.vector_store %arg16[%c0_26, %c0_27], %39 {strides = array<i32>} : memref<16x128xf32, #tpu.memory_space<vmem>>, vector<8x32xf32>,
    %41 = vector.extract_strided_slice %14 {offsets = [0, 32], sizes = [8, 32], strides = [1, 1]} : vector<16x128xf32> to vector<8x32xf32>
    %42 = vector.extract_strided_slice %24 {offsets = [32, 0], sizes = [32, 8], strides = [1, 1]} : vector<128x16xf32> to vector<32x8xf32>
    %cst_28 = arith.constant dense<0.000000e+00> : vector<8x8xf32>
    %43 = tpu.matmul %41, %42, %cst_28 {dimension_numbers = #tpu.dot_dimension_numbers<[1], [0], [0], [1], [0, 0, 1, 1], [], []>} : vector<8x32xf32>, vector<32x8xf32>, vector<8x8xf32> -> vector<8x8xf32>
    %cst_29 = arith.constant dense<0xFF800000> : vector<8xf32>
    %44 = vector.multi_reduction <maximumf>, %43, %cst_29 [1] : vector<8x8xf32> to vector<8xf32>
    %45 = vector.shape_cast %44 : vector<8xf32> to vector<8x1xf32>
    %46 = vector.broadcast %45 : vector<8x1xf32> to vector<8x8xf32>
    %47 = arith.subf %43, %46 : vector<8x8xf32>
    %48 = math.exp %47 : vector<8x8xf32>
    %cst_30 = arith.constant dense<0.000000e+00> : vector<8xf32>
    %49 = vector.multi_reduction <add>, %48, %cst_30 [1] : vector<8x8xf32> to vector<8xf32>
    %50 = vector.shape_cast %49 : vector<8xf32> to vector<8x1xf32>
    %51 = tpu.reciprocal %50 {approx = true} : vector<8x1xf32> -> vector<8x1xf32>
    %52 = vector.broadcast %51 : vector<8x1xf32> to vector<8x8xf32>
    %53 = arith.mulf %48, %52 : vector<8x8xf32>
    %54 = vector.extract_strided_slice %23 {offsets = [0, 32], sizes = [8, 32], strides = [1, 1]} : vector<16x128xf32> to vector<8x32xf32>
    %cst_31 = arith.constant dense<0.000000e+00> : vector<8x32xf32>
    %55 = tpu.matmul %53, %54, %cst_31 {dimension_numbers = #tpu.dot_dimension_numbers<[1], [0], [0], [1], [0, 0, 1, 1], [], []>} : vector<8x8xf32>, vector<8x32xf32>, vector<8x32xf32> -> vector<8x32xf32>
    %c0_32 = arith.constant 0 : index
    %c32 = arith.constant 32 : index
    %56 = vector.load %arg16[%c0_32, %c32] : memref<16x128xf32, #tpu.memory_space<vmem>>, vector<8x32xf32>
    tpu.vector_store %arg16[%c0_32, %c32], %55 {strides = array<i32>} : memref<16x128xf32, #tpu.memory_space<vmem>>, vector<8x32xf32>,
    %57 = vector.extract_strided_slice %14 {offsets = [0, 64], sizes = [8, 32], strides = [1, 1]} : vector<16x128xf32> to vector<8x32xf32>
    %58 = vector.extract_strided_slice %24 {offsets = [64, 0], sizes = [32, 8], strides = [1, 1]} : vector<128x16xf32> to vector<32x8xf32>
    %cst_33 = arith.constant dense<0.000000e+00> : vector<8x8xf32>
    %59 = tpu.matmul %57, %58, %cst_33 {dimension_numbers = #tpu.dot_dimension_numbers<[1], [0], [0], [1], [0, 0, 1, 1], [], []>} : vector<8x32xf32>, vector<32x8xf32>, vector<8x8xf32> -> vector<8x8xf32>
    %cst_34 = arith.constant dense<0xFF800000> : vector<8xf32>
    %60 = vector.multi_reduction <maximumf>, %59, %cst_34 [1] : vector<8x8xf32> to vector<8xf32>
    %61 = vector.shape_cast %60 : vector<8xf32> to vector<8x1xf32>
    %62 = vector.broadcast %61 : vector<8x1xf32> to vector<8x8xf32>
    %63 = arith.subf %59, %62 : vector<8x8xf32>
    %64 = math.exp %63 : vector<8x8xf32>
    %cst_35 = arith.constant dense<0.000000e+00> : vector<8xf32>
    %65 = vector.multi_reduction <add>, %64, %cst_35 [1] : vector<8x8xf32> to vector<8xf32>
    %66 = vector.shape_cast %65 : vector<8xf32> to vector<8x1xf32>
    %67 = tpu.reciprocal %66 {approx = true} : vector<8x1xf32> -> vector<8x1xf32>
    %68 = vector.broadcast %67 : vector<8x1xf32> to vector<8x8xf32>
    %69 = arith.mulf %64, %68 : vector<8x8xf32>
    %70 = vector.extract_strided_slice %23 {offsets = [0, 64], sizes = [8, 32], strides = [1, 1]} : vector<16x128xf32> to vector<8x32xf32>
    %cst_36 = arith.constant dense<0.000000e+00> : vector<8x32xf32>
    %71 = tpu.matmul %69, %70, %cst_36 {dimension_numbers = #tpu.dot_dimension_numbers<[1], [0], [0], [1], [0, 0, 1, 1], [], []>} : vector<8x8xf32>, vector<8x32xf32>, vector<8x32xf32> -> vector<8x32xf32>
    %c0_37 = arith.constant 0 : index
    %c64 = arith.constant 64 : index
    %72 = vector.load %arg16[%c0_37, %c64] : memref<16x128xf32, #tpu.memory_space<vmem>>, vector<8x32xf32>
    tpu.vector_store %arg16[%c0_37, %c64], %71 {strides = array<i32>} : memref<16x128xf32, #tpu.memory_space<vmem>>, vector<8x32xf32>,
    %73 = vector.extract_strided_slice %14 {offsets = [0, 96], sizes = [8, 32], strides = [1, 1]} : vector<16x128xf32> to vector<8x32xf32>
    %74 = vector.extract_strided_slice %24 {offsets = [96, 0], sizes = [32, 8], strides = [1, 1]} : vector<128x16xf32> to vector<32x8xf32>
    %cst_38 = arith.constant dense<0.000000e+00> : vector<8x8xf32>
    %75 = tpu.matmul %73, %74, %cst_38 {dimension_numbers = #tpu.dot_dimension_numbers<[1], [0], [0], [1], [0, 0, 1, 1], [], []>} : vector<8x32xf32>, vector<32x8xf32>, vector<8x8xf32> -> vector<8x8xf32>
    %cst_39 = arith.constant dense<0xFF800000> : vector<8xf32>
    %76 = vector.multi_reduction <maximumf>, %75, %cst_39 [1] : vector<8x8xf32> to vector<8xf32>
    %77 = vector.shape_cast %76 : vector<8xf32> to vector<8x1xf32>
    %78 = vector.broadcast %77 : vector<8x1xf32> to vector<8x8xf32>
    %79 = arith.subf %75, %78 : vector<8x8xf32>
    %80 = math.exp %79 : vector<8x8xf32>
    %cst_40 = arith.constant dense<0.000000e+00> : vector<8xf32>
    %81 = vector.multi_reduction <add>, %80, %cst_40 [1] : vector<8x8xf32> to vector<8xf32>
    %82 = vector.shape_cast %81 : vector<8xf32> to vector<8x1xf32>
    %83 = tpu.reciprocal %82 {approx = true} : vector<8x1xf32> -> vector<8x1xf32>
    %84 = vector.broadcast %83 : vector<8x1xf32> to vector<8x8xf32>
    %85 = arith.mulf %80, %84 : vector<8x8xf32>
    %86 = vector.extract_strided_slice %23 {offsets = [0, 96], sizes = [8, 32], strides = [1, 1]} : vector<16x128xf32> to vector<8x32xf32>
    %cst_41 = arith.constant dense<0.000000e+00> : vector<8x32xf32>
    %87 = tpu.matmul %85, %86, %cst_41 {dimension_numbers = #tpu.dot_dimension_numbers<[1], [0], [0], [1], [0, 0, 1, 1], [], []>} : vector<8x8xf32>, vector<8x32xf32>, vector<8x32xf32> -> vector<8x32xf32>
    %c0_42 = arith.constant 0 : index
    %c96 = arith.constant 96 : index
    %88 = vector.load %arg16[%c0_42, %c96] : memref<16x128xf32, #tpu.memory_space<vmem>>, vector<8x32xf32>
    tpu.vector_store %arg16[%c0_42, %c96], %87 {strides = array<i32>} : memref<16x128xf32, #tpu.memory_space<vmem>>, vector<8x32xf32>,
    %89 = vector.extract_strided_slice %14 {offsets = [8, 0], sizes = [8, 32], strides = [1, 1]} : vector<16x128xf32> to vector<8x32xf32>
    %90 = vector.extract_strided_slice %24 {offsets = [0, 8], sizes = [32, 8], strides = [1, 1]} : vector<128x16xf32> to vector<32x8xf32>
    %cst_43 = arith.constant dense<0.000000e+00> : vector<8x8xf32>
    %91 = tpu.matmul %89, %90, %cst_43 {dimension_numbers = #tpu.dot_dimension_numbers<[1], [0], [0], [1], [0, 0, 1, 1], [], []>} : vector<8x32xf32>, vector<32x8xf32>, vector<8x8xf32> -> vector<8x8xf32>
    %cst_44 = arith.constant dense<0xFF800000> : vector<8xf32>
    %92 = vector.multi_reduction <maximumf>, %91, %cst_44 [1] : vector<8x8xf32> to vector<8xf32>
    %93 = vector.shape_cast %92 : vector<8xf32> to vector<8x1xf32>
    %94 = vector.broadcast %93 : vector<8x1xf32> to vector<8x8xf32>
    %95 = arith.subf %91, %94 : vector<8x8xf32>
    %96 = math.exp %95 : vector<8x8xf32>
    %cst_45 = arith.constant dense<0.000000e+00> : vector<8xf32>
    %97 = vector.multi_reduction <add>, %96, %cst_45 [1] : vector<8x8xf32> to vector<8xf32>
    %98 = vector.shape_cast %97 : vector<8xf32> to vector<8x1xf32>
    %99 = tpu.reciprocal %98 {approx = true} : vector<8x1xf32> -> vector<8x1xf32>
    %100 = vector.broadcast %99 : vector<8x1xf32> to vector<8x8xf32>
    %101 = arith.mulf %96, %100 : vector<8x8xf32>
    %102 = vector.extract_strided_slice %23 {offsets = [8, 0], sizes = [8, 32], strides = [1, 1]} : vector<16x128xf32> to vector<8x32xf32>
    %cst_46 = arith.constant dense<0.000000e+00> : vector<8x32xf32>
    %103 = tpu.matmul %101, %102, %cst_46 {dimension_numbers = #tpu.dot_dimension_numbers<[1], [0], [0], [1], [0, 0, 1, 1], [], []>} : vector<8x8xf32>, vector<8x32xf32>, vector<8x32xf32> -> vector<8x32xf32>
    %c8 = arith.constant 8 : index
    %c0_47 = arith.constant 0 : index
    %104 = vector.load %arg16[%c8, %c0_47] : memref<16x128xf32, #tpu.memory_space<vmem>>, vector<8x32xf32>
    tpu.vector_store %arg16[%c8, %c0_47], %103 {strides = array<i32>} : memref<16x128xf32, #tpu.memory_space<vmem>>, vector<8x32xf32>,
    %105 = vector.extract_strided_slice %14 {offsets = [8, 32], sizes = [8, 32], strides = [1, 1]} : vector<16x128xf32> to vector<8x32xf32>
    %106 = vector.extract_strided_slice %24 {offsets = [32, 8], sizes = [32, 8], strides = [1, 1]} : vector<128x16xf32> to vector<32x8xf32>
    %cst_48 = arith.constant dense<0.000000e+00> : vector<8x8xf32>
    %107 = tpu.matmul %105, %106, %cst_48 {dimension_numbers = #tpu.dot_dimension_numbers<[1], [0], [0], [1], [0, 0, 1, 1], [], []>} : vector<8x32xf32>, vector<32x8xf32>, vector<8x8xf32> -> vector<8x8xf32>
    %cst_49 = arith.constant dense<0xFF800000> : vector<8xf32>
    %108 = vector.multi_reduction <maximumf>, %107, %cst_49 [1] : vector<8x8xf32> to vector<8xf32>
    %109 = vector.shape_cast %108 : vector<8xf32> to vector<8x1xf32>
    %110 = vector.broadcast %109 : vector<8x1xf32> to vector<8x8xf32>
    %111 = arith.subf %107, %110 : vector<8x8xf32>
    %112 = math.exp %111 : vector<8x8xf32>
    %cst_50 = arith.constant dense<0.000000e+00> : vector<8xf32>
    %113 = vector.multi_reduction <add>, %112, %cst_50 [1] : vector<8x8xf32> to vector<8xf32>
    %114 = vector.shape_cast %113 : vector<8xf32> to vector<8x1xf32>
    %115 = tpu.reciprocal %114 {approx = true} : vector<8x1xf32> -> vector<8x1xf32>
    %116 = vector.broadcast %115 : vector<8x1xf32> to vector<8x8xf32>
    %117 = arith.mulf %112, %116 : vector<8x8xf32>
    %118 = vector.extract_strided_slice %23 {offsets = [8, 32], sizes = [8, 32], strides = [1, 1]} : vector<16x128xf32> to vector<8x32xf32>
    %cst_51 = arith.constant dense<0.000000e+00> : vector<8x32xf32>
    %119 = tpu.matmul %117, %118, %cst_51 {dimension_numbers = #tpu.dot_dimension_numbers<[1], [0], [0], [1], [0, 0, 1, 1], [], []>} : vector<8x8xf32>, vector<8x32xf32>, vector<8x32xf32> -> vector<8x32xf32>
    %c8_52 = arith.constant 8 : index
    %c32_53 = arith.constant 32 : index
    %120 = vector.load %arg16[%c8_52, %c32_53] : memref<16x128xf32, #tpu.memory_space<vmem>>, vector<8x32xf32>
    tpu.vector_store %arg16[%c8_52, %c32_53], %119 {strides = array<i32>} : memref<16x128xf32, #tpu.memory_space<vmem>>, vector<8x32xf32>,
    %121 = vector.extract_strided_slice %14 {offsets = [8, 64], sizes = [8, 32], strides = [1, 1]} : vector<16x128xf32> to vector<8x32xf32>
    %122 = vector.extract_strided_slice %24 {offsets = [64, 8], sizes = [32, 8], strides = [1, 1]} : vector<128x16xf32> to vector<32x8xf32>
    %cst_54 = arith.constant dense<0.000000e+00> : vector<8x8xf32>
    %123 = tpu.matmul %121, %122, %cst_54 {dimension_numbers = #tpu.dot_dimension_numbers<[1], [0], [0], [1], [0, 0, 1, 1], [], []>} : vector<8x32xf32>, vector<32x8xf32>, vector<8x8xf32> -> vector<8x8xf32>
    %cst_55 = arith.constant dense<0xFF800000> : vector<8xf32>
    %124 = vector.multi_reduction <maximumf>, %123, %cst_55 [1] : vector<8x8xf32> to vector<8xf32>
    %125 = vector.shape_cast %124 : vector<8xf32> to vector<8x1xf32>
    %126 = vector.broadcast %125 : vector<8x1xf32> to vector<8x8xf32>
    %127 = arith.subf %123, %126 : vector<8x8xf32>
    %128 = math.exp %127 : vector<8x8xf32>
    %cst_56 = arith.constant dense<0.000000e+00> : vector<8xf32>
    %129 = vector.multi_reduction <add>, %128, %cst_56 [1] : vector<8x8xf32> to vector<8xf32>
    %130 = vector.shape_cast %129 : vector<8xf32> to vector<8x1xf32>
    %131 = tpu.reciprocal %130 {approx = true} : vector<8x1xf32> -> vector<8x1xf32>
    %132 = vector.broadcast %131 : vector<8x1xf32> to vector<8x8xf32>
    %133 = arith.mulf %128, %132 : vector<8x8xf32>
    %134 = vector.extract_strided_slice %23 {offsets = [8, 64], sizes = [8, 32], strides = [1, 1]} : vector<16x128xf32> to vector<8x32xf32>
    %cst_57 = arith.constant dense<0.000000e+00> : vector<8x32xf32>
    %135 = tpu.matmul %133, %134, %cst_57 {dimension_numbers = #tpu.dot_dimension_numbers<[1], [0], [0], [1], [0, 0, 1, 1], [], []>} : vector<8x8xf32>, vector<8x32xf32>, vector<8x32xf32> -> vector<8x32xf32>
    %c8_58 = arith.constant 8 : index
    %c64_59 = arith.constant 64 : index
    %136 = vector.load %arg16[%c8_58, %c64_59] : memref<16x128xf32, #tpu.memory_space<vmem>>, vector<8x32xf32>
    tpu.vector_store %arg16[%c8_58, %c64_59], %135 {strides = array<i32>} : memref<16x128xf32, #tpu.memory_space<vmem>>, vector<8x32xf32>,
    %137 = vector.extract_strided_slice %14 {offsets = [8, 96], sizes = [8, 32], strides = [1, 1]} : vector<16x128xf32> to vector<8x32xf32>
    %138 = vector.extract_strided_slice %24 {offsets = [96, 8], sizes = [32, 8], strides = [1, 1]} : vector<128x16xf32> to vector<32x8xf32>
    %cst_60 = arith.constant dense<0.000000e+00> : vector<8x8xf32>
    %139 = tpu.matmul %137, %138, %cst_60 {dimension_numbers = #tpu.dot_dimension_numbers<[1], [0], [0], [1], [0, 0, 1, 1], [], []>} : vector<8x32xf32>, vector<32x8xf32>, vector<8x8xf32> -> vector<8x8xf32>
    %cst_61 = arith.constant dense<0xFF800000> : vector<8xf32>
    %140 = vector.multi_reduction <maximumf>, %139, %cst_61 [1] : vector<8x8xf32> to vector<8xf32>
    %141 = vector.shape_cast %140 : vector<8xf32> to vector<8x1xf32>
    %142 = vector.broadcast %141 : vector<8x1xf32> to vector<8x8xf32>
    %143 = arith.subf %139, %142 : vector<8x8xf32>
    %144 = math.exp %143 : vector<8x8xf32>
    %cst_62 = arith.constant dense<0.000000e+00> : vector<8xf32>
    %145 = vector.multi_reduction <add>, %144, %cst_62 [1] : vector<8x8xf32> to vector<8xf32>
    %146 = vector.shape_cast %145 : vector<8xf32> to vector<8x1xf32>
    %147 = tpu.reciprocal %146 {approx = true} : vector<8x1xf32> -> vector<8x1xf32>
    %148 = vector.broadcast %147 : vector<8x1xf32> to vector<8x8xf32>
    %149 = arith.mulf %144, %148 : vector<8x8xf32>
    %150 = vector.extract_strided_slice %23 {offsets = [8, 96], sizes = [8, 32], strides = [1, 1]} : vector<16x128xf32> to vector<8x32xf32>
    %cst_63 = arith.constant dense<0.000000e+00> : vector<8x32xf32>
    %151 = tpu.matmul %149, %150, %cst_63 {dimension_numbers = #tpu.dot_dimension_numbers<[1], [0], [0], [1], [0, 0, 1, 1], [], []>} : vector<8x8xf32>, vector<8x32xf32>, vector<8x32xf32> -> vector<8x32xf32>
    %c8_64 = arith.constant 8 : index
    %c96_65 = arith.constant 96 : index
    %152 = vector.load %arg16[%c8_64, %c96_65] : memref<16x128xf32, #tpu.memory_space<vmem>>, vector<8x32xf32>
    tpu.vector_store %arg16[%c8_64, %c96_65], %151 {strides = array<i32>} : memref<16x128xf32, #tpu.memory_space<vmem>>, vector<8x32xf32>,
    %c0_66 = arith.constant 0 : index
    %c0_67 = arith.constant 0 : index
    %153 = vector.load %arg16[%c0_66, %c0_67] : memref<16x128xf32, #tpu.memory_space<vmem>>, vector<16x128xf32>
    %c0_68 = arith.constant 0 : index
    %c1 = arith.constant 1 : index
    %c0_69 = arith.constant 0 : index
    %c0_70 = arith.constant 0 : index
    %154 = vector.load %arg7[%c0_68, %c1, %c0_69, %c0_70] : memref<2x6x128x128xbf16, #tpu.memory_space<vmem>>, vector<1x1x128x128xbf16>
    %155 = vector.shape_cast %154 : vector<1x1x128x128xbf16> to vector<128x128xbf16>
    %156 = arith.truncf %153 : vector<16x128xf32> to vector<16x128xbf16>
    %cst_71 = arith.constant dense<0.000000e+00> : vector<16x128xf32>
    %157 = tpu.matmul %156, %155, %cst_71 {dimension_numbers = #tpu.dot_dimension_numbers<[1], [0], [0], [1], [0, 0, 1, 1], [], []>} : vector<16x128xbf16>, vector<128x128xbf16>, vector<16x128xf32> -> vector<16x128xf32>
    %c0_72 = arith.constant 0 : index
    %c1_73 = arith.constant 1 : index
    %c0_74 = arith.constant 0 : index
    %c0_75 = arith.constant 0 : index
    %158 = vector.load %arg8[%c0_72, %c1_73, %c0_74, %c0_75] : memref<2x6x1x128xf32, #tpu.memory_space<vmem>>, vector<1x1x1x128xf32>
    %159 = vector.shape_cast %158 : vector<1x1x1x128xf32> to vector<1x128xf32>
    %160 = vector.broadcast %159 : vector<1x128xf32> to vector<16x128xf32>
    %161 = arith.addf %157, %160 : vector<16x128xf32>
    %162 = arith.addf %0, %161 : vector<16x128xf32>
    %c0_76 = arith.constant 0 : index
    %c0_77 = arith.constant 0 : index
    %c0_78 = arith.constant 0 : index
    %c0_79 = arith.constant 0 : index
    %163 = vector.load %arg13[%c0_76, %c0_77, %c0_78, %c0_79] : memref<2x3x1x128xf32, #tpu.memory_space<vmem>>, vector<1x1x1x128xf32>
    %164 = vector.shape_cast %163 : vector<1x1x1x128xf32> to vector<1x128xf32>
    %c0_80 = arith.constant 0 : index
    %c0_81 = arith.constant 0 : index
    %c0_82 = arith.constant 0 : index
    %c0_83 = arith.constant 0 : index
    %165 = vector.load %arg14[%c0_80, %c0_81, %c0_82, %c0_83] : memref<2x3x1x128xf32, #tpu.memory_space<vmem>>, vector<1x1x1x128xf32>
    %166 = vector.shape_cast %165 : vector<1x1x1x128xf32> to vector<1x128xf32>
    %cst_84 = arith.constant dense<0.000000e+00> : vector<16xf32>
    %167 = vector.multi_reduction <add>, %162, %cst_84 [1] : vector<16x128xf32> to vector<16xf32>
    %168 = vector.shape_cast %167 : vector<16xf32> to vector<16x1xf32>
    %cst_85 = arith.constant 1.280000e+02 : f32
    %169 = vector.broadcast %cst_85 : f32 to vector<16x1xf32>
    %170 = arith.divf %168, %169 : vector<16x1xf32>
    %171 = vector.broadcast %170 : vector<16x1xf32> to vector<16x128xf32>
    %172 = arith.subf %162, %171 : vector<16x128xf32>
    %173 = arith.mulf %172, %172 : vector<16x128xf32>
    %cst_86 = arith.constant dense<0.000000e+00> : vector<16xf32>
    %174 = vector.multi_reduction <add>, %173, %cst_86 [1] : vector<16x128xf32> to vector<16xf32>
    %175 = vector.shape_cast %174 : vector<16xf32> to vector<16x1xf32>
    %cst_87 = arith.constant 1.280000e+02 : f32
    %176 = vector.broadcast %cst_87 : f32 to vector<16x1xf32>
    %177 = arith.divf %175, %176 : vector<16x1xf32>
    %cst_88 = arith.constant 9.99999974E-6 : f32
    %178 = vector.broadcast %cst_88 : f32 to vector<16x1xf32>
    %179 = arith.addf %177, %178 : vector<16x1xf32>
    %180 = math.rsqrt %179 : vector<16x1xf32>
    %181 = vector.broadcast %180 : vector<16x1xf32> to vector<16x128xf32>
    %182 = arith.mulf %172, %181 : vector<16x128xf32>
    %183 = vector.broadcast %164 : vector<1x128xf32> to vector<16x128xf32>
    %184 = arith.mulf %182, %183 : vector<16x128xf32>
    %185 = vector.broadcast %166 : vector<1x128xf32> to vector<16x128xf32>
    %186 = arith.addf %184, %185 : vector<16x128xf32>
    %187 = arith.addf %186, %2 : vector<16x128xf32>
    %c0_89 = arith.constant 0 : index
    %c2 = arith.constant 2 : index
    %c0_90 = arith.constant 0 : index
    %c0_91 = arith.constant 0 : index
    %188 = vector.load %arg7[%c0_89, %c2, %c0_90, %c0_91] : memref<2x6x128x128xbf16, #tpu.memory_space<vmem>>, vector<1x1x128x128xbf16>
    %189 = vector.shape_cast %188 : vector<1x1x128x128xbf16> to vector<128x128xbf16>
    %190 = arith.truncf %187 : vector<16x128xf32> to vector<16x128xbf16>
    %cst_92 = arith.constant dense<0.000000e+00> : vector<16x128xf32>
    %191 = tpu.matmul %190, %189, %cst_92 {dimension_numbers = #tpu.dot_dimension_numbers<[1], [0], [0], [1], [0, 0, 1, 1], [], []>} : vector<16x128xbf16>, vector<128x128xbf16>, vector<16x128xf32> -> vector<16x128xf32>
    %c0_93 = arith.constant 0 : index
    %c2_94 = arith.constant 2 : index
    %c0_95 = arith.constant 0 : index
    %c0_96 = arith.constant 0 : index
    %192 = vector.load %arg8[%c0_93, %c2_94, %c0_95, %c0_96] : memref<2x6x1x128xf32, #tpu.memory_space<vmem>>, vector<1x1x1x128xf32>
    %193 = vector.shape_cast %192 : vector<1x1x1x128xf32> to vector<1x128xf32>
    %194 = vector.broadcast %193 : vector<1x128xf32> to vector<16x128xf32>
    %195 = arith.addf %191, %194 : vector<16x128xf32>
    %c0_97 = arith.constant 0 : index
    %c3 = arith.constant 3 : index
    %c0_98 = arith.constant 0 : index
    %c0_99 = arith.constant 0 : index
    %196 = vector.load %arg7[%c0_97, %c3, %c0_98, %c0_99] : memref<2x6x128x128xbf16, #tpu.memory_space<vmem>>, vector<1x1x128x128xbf16>
    %197 = vector.shape_cast %196 : vector<1x1x128x128xbf16> to vector<128x128xbf16>
    %198 = arith.truncf %4 : vector<32x128xf32> to vector<32x128xbf16>
    %cst_100 = arith.constant dense<0.000000e+00> : vector<32x128xf32>
    %199 = tpu.matmul %198, %197, %cst_100 {dimension_numbers = #tpu.dot_dimension_numbers<[1], [0], [0], [1], [0, 0, 1, 1], [], []>} : vector<32x128xbf16>, vector<128x128xbf16>, vector<32x128xf32> -> vector<32x128xf32>
    %c0_101 = arith.constant 0 : index
    %c3_102 = arith.constant 3 : index
    %c0_103 = arith.constant 0 : index
    %c0_104 = arith.constant 0 : index
    %200 = vector.load %arg8[%c0_101, %c3_102, %c0_103, %c0_104] : memref<2x6x1x128xf32, #tpu.memory_space<vmem>>, vector<1x1x1x128xf32>
    %201 = vector.shape_cast %200 : vector<1x1x1x128xf32> to vector<1x128xf32>
    %202 = vector.broadcast %201 : vector<1x128xf32> to vector<32x128xf32>
    %203 = arith.addf %199, %202 : vector<32x128xf32>
    %c0_105 = arith.constant 0 : index
    %c4 = arith.constant 4 : index
    %c0_106 = arith.constant 0 : index
    %c0_107 = arith.constant 0 : index
    %204 = vector.load %arg7[%c0_105, %c4, %c0_106, %c0_107] : memref<2x6x128x128xbf16, #tpu.memory_space<vmem>>, vector<1x1x128x128xbf16>
    %205 = vector.shape_cast %204 : vector<1x1x128x128xbf16> to vector<128x128xbf16>
    %206 = arith.truncf %1 : vector<32x128xf32> to vector<32x128xbf16>
    %cst_108 = arith.constant dense<0.000000e+00> : vector<32x128xf32>
    %207 = tpu.matmul %206, %205, %cst_108 {dimension_numbers = #tpu.dot_dimension_numbers<[1], [0], [0], [1], [0, 0, 1, 1], [], []>} : vector<32x128xbf16>, vector<128x128xbf16>, vector<32x128xf32> -> vector<32x128xf32>
    %c0_109 = arith.constant 0 : index
    %c4_110 = arith.constant 4 : index
    %c0_111 = arith.constant 0 : index
    %c0_112 = arith.constant 0 : index
    %208 = vector.load %arg8[%c0_109, %c4_110, %c0_111, %c0_112] : memref<2x6x1x128xf32, #tpu.memory_space<vmem>>, vector<1x1x1x128xf32>
    %209 = vector.shape_cast %208 : vector<1x1x1x128xf32> to vector<1x128xf32>
    %210 = vector.broadcast %209 : vector<1x128xf32> to vector<32x128xf32>
    %211 = arith.addf %207, %210 : vector<32x128xf32>
    %212 = tpu.transpose %203, [1, 0] : vector<32x128xf32> -> vector<128x32xf32>
    %213 = vector.extract_strided_slice %195 {offsets = [0, 0], sizes = [8, 32], strides = [1, 1]} : vector<16x128xf32> to vector<8x32xf32>
    %214 = vector.extract_strided_slice %212 {offsets = [0, 0], sizes = [32, 16], strides = [1, 1]} : vector<128x32xf32> to vector<32x16xf32>
    %cst_113 = arith.constant dense<0.000000e+00> : vector<8x16xf32>
    %215 = tpu.matmul %213, %214, %cst_113 {dimension_numbers = #tpu.dot_dimension_numbers<[1], [0], [0], [1], [0, 0, 1, 1], [], []>} : vector<8x32xf32>, vector<32x16xf32>, vector<8x16xf32> -> vector<8x16xf32>
    %cst_114 = arith.constant dense<0xFF800000> : vector<8xf32>
    %216 = vector.multi_reduction <maximumf>, %215, %cst_114 [1] : vector<8x16xf32> to vector<8xf32>
    %217 = vector.shape_cast %216 : vector<8xf32> to vector<8x1xf32>
    %218 = vector.broadcast %217 : vector<8x1xf32> to vector<8x16xf32>
    %219 = arith.subf %215, %218 : vector<8x16xf32>
    %220 = math.exp %219 : vector<8x16xf32>
    %cst_115 = arith.constant dense<0.000000e+00> : vector<8xf32>
    %221 = vector.multi_reduction <add>, %220, %cst_115 [1] : vector<8x16xf32> to vector<8xf32>
    %222 = vector.shape_cast %221 : vector<8xf32> to vector<8x1xf32>
    %223 = tpu.reciprocal %222 {approx = true} : vector<8x1xf32> -> vector<8x1xf32>
    %224 = vector.broadcast %223 : vector<8x1xf32> to vector<8x16xf32>
    %225 = arith.mulf %220, %224 : vector<8x16xf32>
    %226 = vector.extract_strided_slice %211 {offsets = [0, 0], sizes = [16, 32], strides = [1, 1]} : vector<32x128xf32> to vector<16x32xf32>
    %cst_116 = arith.constant dense<0.000000e+00> : vector<8x32xf32>
    %227 = tpu.matmul %225, %226, %cst_116 {dimension_numbers = #tpu.dot_dimension_numbers<[1], [0], [0], [1], [0, 0, 1, 1], [], []>} : vector<8x16xf32>, vector<16x32xf32>, vector<8x32xf32> -> vector<8x32xf32>
    %c0_117 = arith.constant 0 : index
    %c0_118 = arith.constant 0 : index
    %228 = vector.load %arg16[%c0_117, %c0_118] : memref<16x128xf32, #tpu.memory_space<vmem>>, vector<8x32xf32>
    tpu.vector_store %arg16[%c0_117, %c0_118], %227 {strides = array<i32>} : memref<16x128xf32, #tpu.memory_space<vmem>>, vector<8x32xf32>,
    %229 = vector.extract_strided_slice %195 {offsets = [0, 32], sizes = [8, 32], strides = [1, 1]} : vector<16x128xf32> to vector<8x32xf32>
    %230 = vector.extract_strided_slice %212 {offsets = [32, 0], sizes = [32, 16], strides = [1, 1]} : vector<128x32xf32> to vector<32x16xf32>
    %cst_119 = arith.constant dense<0.000000e+00> : vector<8x16xf32>
    %231 = tpu.matmul %229, %230, %cst_119 {dimension_numbers = #tpu.dot_dimension_numbers<[1], [0], [0], [1], [0, 0, 1, 1], [], []>} : vector<8x32xf32>, vector<32x16xf32>, vector<8x16xf32> -> vector<8x16xf32>
    %cst_120 = arith.constant dense<0xFF800000> : vector<8xf32>
    %232 = vector.multi_reduction <maximumf>, %231, %cst_120 [1] : vector<8x16xf32> to vector<8xf32>
    %233 = vector.shape_cast %232 : vector<8xf32> to vector<8x1xf32>
    %234 = vector.broadcast %233 : vector<8x1xf32> to vector<8x16xf32>
    %235 = arith.subf %231, %234 : vector<8x16xf32>
    %236 = math.exp %235 : vector<8x16xf32>
    %cst_121 = arith.constant dense<0.000000e+00> : vector<8xf32>
    %237 = vector.multi_reduction <add>, %236, %cst_121 [1] : vector<8x16xf32> to vector<8xf32>
    %238 = vector.shape_cast %237 : vector<8xf32> to vector<8x1xf32>
    %239 = tpu.reciprocal %238 {approx = true} : vector<8x1xf32> -> vector<8x1xf32>
    %240 = vector.broadcast %239 : vector<8x1xf32> to vector<8x16xf32>
    %241 = arith.mulf %236, %240 : vector<8x16xf32>
    %242 = vector.extract_strided_slice %211 {offsets = [0, 32], sizes = [16, 32], strides = [1, 1]} : vector<32x128xf32> to vector<16x32xf32>
    %cst_122 = arith.constant dense<0.000000e+00> : vector<8x32xf32>
    %243 = tpu.matmul %241, %242, %cst_122 {dimension_numbers = #tpu.dot_dimension_numbers<[1], [0], [0], [1], [0, 0, 1, 1], [], []>} : vector<8x16xf32>, vector<16x32xf32>, vector<8x32xf32> -> vector<8x32xf32>
    %c0_123 = arith.constant 0 : index
    %c32_124 = arith.constant 32 : index
    %244 = vector.load %arg16[%c0_123, %c32_124] : memref<16x128xf32, #tpu.memory_space<vmem>>, vector<8x32xf32>
    tpu.vector_store %arg16[%c0_123, %c32_124], %243 {strides = array<i32>} : memref<16x128xf32, #tpu.memory_space<vmem>>, vector<8x32xf32>,
    %245 = vector.extract_strided_slice %195 {offsets = [0, 64], sizes = [8, 32], strides = [1, 1]} : vector<16x128xf32> to vector<8x32xf32>
    %246 = vector.extract_strided_slice %212 {offsets = [64, 0], sizes = [32, 16], strides = [1, 1]} : vector<128x32xf32> to vector<32x16xf32>
    %cst_125 = arith.constant dense<0.000000e+00> : vector<8x16xf32>
    %247 = tpu.matmul %245, %246, %cst_125 {dimension_numbers = #tpu.dot_dimension_numbers<[1], [0], [0], [1], [0, 0, 1, 1], [], []>} : vector<8x32xf32>, vector<32x16xf32>, vector<8x16xf32> -> vector<8x16xf32>
    %cst_126 = arith.constant dense<0xFF800000> : vector<8xf32>
    %248 = vector.multi_reduction <maximumf>, %247, %cst_126 [1] : vector<8x16xf32> to vector<8xf32>
    %249 = vector.shape_cast %248 : vector<8xf32> to vector<8x1xf32>
    %250 = vector.broadcast %249 : vector<8x1xf32> to vector<8x16xf32>
    %251 = arith.subf %247, %250 : vector<8x16xf32>
    %252 = math.exp %251 : vector<8x16xf32>
    %cst_127 = arith.constant dense<0.000000e+00> : vector<8xf32>
    %253 = vector.multi_reduction <add>, %252, %cst_127 [1] : vector<8x16xf32> to vector<8xf32>
    %254 = vector.shape_cast %253 : vector<8xf32> to vector<8x1xf32>
    %255 = tpu.reciprocal %254 {approx = true} : vector<8x1xf32> -> vector<8x1xf32>
    %256 = vector.broadcast %255 : vector<8x1xf32> to vector<8x16xf32>
    %257 = arith.mulf %252, %256 : vector<8x16xf32>
    %258 = vector.extract_strided_slice %211 {offsets = [0, 64], sizes = [16, 32], strides = [1, 1]} : vector<32x128xf32> to vector<16x32xf32>
    %cst_128 = arith.constant dense<0.000000e+00> : vector<8x32xf32>
    %259 = tpu.matmul %257, %258, %cst_128 {dimension_numbers = #tpu.dot_dimension_numbers<[1], [0], [0], [1], [0, 0, 1, 1], [], []>} : vector<8x16xf32>, vector<16x32xf32>, vector<8x32xf32> -> vector<8x32xf32>
    %c0_129 = arith.constant 0 : index
    %c64_130 = arith.constant 64 : index
    %260 = vector.load %arg16[%c0_129, %c64_130] : memref<16x128xf32, #tpu.memory_space<vmem>>, vector<8x32xf32>
    tpu.vector_store %arg16[%c0_129, %c64_130], %259 {strides = array<i32>} : memref<16x128xf32, #tpu.memory_space<vmem>>, vector<8x32xf32>,
    %261 = vector.extract_strided_slice %195 {offsets = [0, 96], sizes = [8, 32], strides = [1, 1]} : vector<16x128xf32> to vector<8x32xf32>
    %262 = vector.extract_strided_slice %212 {offsets = [96, 0], sizes = [32, 16], strides = [1, 1]} : vector<128x32xf32> to vector<32x16xf32>
    %cst_131 = arith.constant dense<0.000000e+00> : vector<8x16xf32>
    %263 = tpu.matmul %261, %262, %cst_131 {dimension_numbers = #tpu.dot_dimension_numbers<[1], [0], [0], [1], [0, 0, 1, 1], [], []>} : vector<8x32xf32>, vector<32x16xf32>, vector<8x16xf32> -> vector<8x16xf32>
    %cst_132 = arith.constant dense<0xFF800000> : vector<8xf32>
    %264 = vector.multi_reduction <maximumf>, %263, %cst_132 [1] : vector<8x16xf32> to vector<8xf32>
    %265 = vector.shape_cast %264 : vector<8xf32> to vector<8x1xf32>
    %266 = vector.broadcast %265 : vector<8x1xf32> to vector<8x16xf32>
    %267 = arith.subf %263, %266 : vector<8x16xf32>
    %268 = math.exp %267 : vector<8x16xf32>
    %cst_133 = arith.constant dense<0.000000e+00> : vector<8xf32>
    %269 = vector.multi_reduction <add>, %268, %cst_133 [1] : vector<8x16xf32> to vector<8xf32>
    %270 = vector.shape_cast %269 : vector<8xf32> to vector<8x1xf32>
    %271 = tpu.reciprocal %270 {approx = true} : vector<8x1xf32> -> vector<8x1xf32>
    %272 = vector.broadcast %271 : vector<8x1xf32> to vector<8x16xf32>
    %273 = arith.mulf %268, %272 : vector<8x16xf32>
    %274 = vector.extract_strided_slice %211 {offsets = [0, 96], sizes = [16, 32], strides = [1, 1]} : vector<32x128xf32> to vector<16x32xf32>
    %cst_134 = arith.constant dense<0.000000e+00> : vector<8x32xf32>
    %275 = tpu.matmul %273, %274, %cst_134 {dimension_numbers = #tpu.dot_dimension_numbers<[1], [0], [0], [1], [0, 0, 1, 1], [], []>} : vector<8x16xf32>, vector<16x32xf32>, vector<8x32xf32> -> vector<8x32xf32>
    %c0_135 = arith.constant 0 : index
    %c96_136 = arith.constant 96 : index
    %276 = vector.load %arg16[%c0_135, %c96_136] : memref<16x128xf32, #tpu.memory_space<vmem>>, vector<8x32xf32>
    tpu.vector_store %arg16[%c0_135, %c96_136], %275 {strides = array<i32>} : memref<16x128xf32, #tpu.memory_space<vmem>>, vector<8x32xf32>,
    %277 = vector.extract_strided_slice %195 {offsets = [8, 0], sizes = [8, 32], strides = [1, 1]} : vector<16x128xf32> to vector<8x32xf32>
    %278 = vector.extract_strided_slice %212 {offsets = [0, 16], sizes = [32, 16], strides = [1, 1]} : vector<128x32xf32> to vector<32x16xf32>
    %cst_137 = arith.constant dense<0.000000e+00> : vector<8x16xf32>
    %279 = tpu.matmul %277, %278, %cst_137 {dimension_numbers = #tpu.dot_dimension_numbers<[1], [0], [0], [1], [0, 0, 1, 1], [], []>} : vector<8x32xf32>, vector<32x16xf32>, vector<8x16xf32> -> vector<8x16xf32>
    %cst_138 = arith.constant dense<0xFF800000> : vector<8xf32>
    %280 = vector.multi_reduction <maximumf>, %279, %cst_138 [1] : vector<8x16xf32> to vector<8xf32>
    %281 = vector.shape_cast %280 : vector<8xf32> to vector<8x1xf32>
    %282 = vector.broadcast %281 : vector<8x1xf32> to vector<8x16xf32>
    %283 = arith.subf %279, %282 : vector<8x16xf32>
    %284 = math.exp %283 : vector<8x16xf32>
    %cst_139 = arith.constant dense<0.000000e+00> : vector<8xf32>
    %285 = vector.multi_reduction <add>, %284, %cst_139 [1] : vector<8x16xf32> to vector<8xf32>
    %286 = vector.shape_cast %285 : vector<8xf32> to vector<8x1xf32>
    %287 = tpu.reciprocal %286 {approx = true} : vector<8x1xf32> -> vector<8x1xf32>
    %288 = vector.broadcast %287 : vector<8x1xf32> to vector<8x16xf32>
    %289 = arith.mulf %284, %288 : vector<8x16xf32>
    %290 = vector.extract_strided_slice %211 {offsets = [16, 0], sizes = [16, 32], strides = [1, 1]} : vector<32x128xf32> to vector<16x32xf32>
    %cst_140 = arith.constant dense<0.000000e+00> : vector<8x32xf32>
    %291 = tpu.matmul %289, %290, %cst_140 {dimension_numbers = #tpu.dot_dimension_numbers<[1], [0], [0], [1], [0, 0, 1, 1], [], []>} : vector<8x16xf32>, vector<16x32xf32>, vector<8x32xf32> -> vector<8x32xf32>
    %c8_141 = arith.constant 8 : index
    %c0_142 = arith.constant 0 : index
    %292 = vector.load %arg16[%c8_141, %c0_142] : memref<16x128xf32, #tpu.memory_space<vmem>>, vector<8x32xf32>
    tpu.vector_store %arg16[%c8_141, %c0_142], %291 {strides = array<i32>} : memref<16x128xf32, #tpu.memory_space<vmem>>, vector<8x32xf32>,
    %293 = vector.extract_strided_slice %195 {offsets = [8, 32], sizes = [8, 32], strides = [1, 1]} : vector<16x128xf32> to vector<8x32xf32>
    %294 = vector.extract_strided_slice %212 {offsets = [32, 16], sizes = [32, 16], strides = [1, 1]} : vector<128x32xf32> to vector<32x16xf32>
    %cst_143 = arith.constant dense<0.000000e+00> : vector<8x16xf32>
    %295 = tpu.matmul %293, %294, %cst_143 {dimension_numbers = #tpu.dot_dimension_numbers<[1], [0], [0], [1], [0, 0, 1, 1], [], []>} : vector<8x32xf32>, vector<32x16xf32>, vector<8x16xf32> -> vector<8x16xf32>
    %cst_144 = arith.constant dense<0xFF800000> : vector<8xf32>
    %296 = vector.multi_reduction <maximumf>, %295, %cst_144 [1] : vector<8x16xf32> to vector<8xf32>
    %297 = vector.shape_cast %296 : vector<8xf32> to vector<8x1xf32>
    %298 = vector.broadcast %297 : vector<8x1xf32> to vector<8x16xf32>
    %299 = arith.subf %295, %298 : vector<8x16xf32>
    %300 = math.exp %299 : vector<8x16xf32>
    %cst_145 = arith.constant dense<0.000000e+00> : vector<8xf32>
    %301 = vector.multi_reduction <add>, %300, %cst_145 [1] : vector<8x16xf32> to vector<8xf32>
    %302 = vector.shape_cast %301 : vector<8xf32> to vector<8x1xf32>
    %303 = tpu.reciprocal %302 {approx = true} : vector<8x1xf32> -> vector<8x1xf32>
    %304 = vector.broadcast %303 : vector<8x1xf32> to vector<8x16xf32>
    %305 = arith.mulf %300, %304 : vector<8x16xf32>
    %306 = vector.extract_strided_slice %211 {offsets = [16, 32], sizes = [16, 32], strides = [1, 1]} : vector<32x128xf32> to vector<16x32xf32>
    %cst_146 = arith.constant dense<0.000000e+00> : vector<8x32xf32>
    %307 = tpu.matmul %305, %306, %cst_146 {dimension_numbers = #tpu.dot_dimension_numbers<[1], [0], [0], [1], [0, 0, 1, 1], [], []>} : vector<8x16xf32>, vector<16x32xf32>, vector<8x32xf32> -> vector<8x32xf32>
    %c8_147 = arith.constant 8 : index
    %c32_148 = arith.constant 32 : index
    %308 = vector.load %arg16[%c8_147, %c32_148] : memref<16x128xf32, #tpu.memory_space<vmem>>, vector<8x32xf32>
    tpu.vector_store %arg16[%c8_147, %c32_148], %307 {strides = array<i32>} : memref<16x128xf32, #tpu.memory_space<vmem>>, vector<8x32xf32>,
    %309 = vector.extract_strided_slice %195 {offsets = [8, 64], sizes = [8, 32], strides = [1, 1]} : vector<16x128xf32> to vector<8x32xf32>
    %310 = vector.extract_strided_slice %212 {offsets = [64, 16], sizes = [32, 16], strides = [1, 1]} : vector<128x32xf32> to vector<32x16xf32>
    %cst_149 = arith.constant dense<0.000000e+00> : vector<8x16xf32>
    %311 = tpu.matmul %309, %310, %cst_149 {dimension_numbers = #tpu.dot_dimension_numbers<[1], [0], [0], [1], [0, 0, 1, 1], [], []>} : vector<8x32xf32>, vector<32x16xf32>, vector<8x16xf32> -> vector<8x16xf32>
    %cst_150 = arith.constant dense<0xFF800000> : vector<8xf32>
    %312 = vector.multi_reduction <maximumf>, %311, %cst_150 [1] : vector<8x16xf32> to vector<8xf32>
    %313 = vector.shape_cast %312 : vector<8xf32> to vector<8x1xf32>
    %314 = vector.broadcast %313 : vector<8x1xf32> to vector<8x16xf32>
    %315 = arith.subf %311, %314 : vector<8x16xf32>
    %316 = math.exp %315 : vector<8x16xf32>
    %cst_151 = arith.constant dense<0.000000e+00> : vector<8xf32>
    %317 = vector.multi_reduction <add>, %316, %cst_151 [1] : vector<8x16xf32> to vector<8xf32>
    %318 = vector.shape_cast %317 : vector<8xf32> to vector<8x1xf32>
    %319 = tpu.reciprocal %318 {approx = true} : vector<8x1xf32> -> vector<8x1xf32>
    %320 = vector.broadcast %319 : vector<8x1xf32> to vector<8x16xf32>
    %321 = arith.mulf %316, %320 : vector<8x16xf32>
    %322 = vector.extract_strided_slice %211 {offsets = [16, 64], sizes = [16, 32], strides = [1, 1]} : vector<32x128xf32> to vector<16x32xf32>
    %cst_152 = arith.constant dense<0.000000e+00> : vector<8x32xf32>
    %323 = tpu.matmul %321, %322, %cst_152 {dimension_numbers = #tpu.dot_dimension_numbers<[1], [0], [0], [1], [0, 0, 1, 1], [], []>} : vector<8x16xf32>, vector<16x32xf32>, vector<8x32xf32> -> vector<8x32xf32>
    %c8_153 = arith.constant 8 : index
    %c64_154 = arith.constant 64 : index
    %324 = vector.load %arg16[%c8_153, %c64_154] : memref<16x128xf32, #tpu.memory_space<vmem>>, vector<8x32xf32>
    tpu.vector_store %arg16[%c8_153, %c64_154], %323 {strides = array<i32>} : memref<16x128xf32, #tpu.memory_space<vmem>>, vector<8x32xf32>,
    %325 = vector.extract_strided_slice %195 {offsets = [8, 96], sizes = [8, 32], strides = [1, 1]} : vector<16x128xf32> to vector<8x32xf32>
    %326 = vector.extract_strided_slice %212 {offsets = [96, 16], sizes = [32, 16], strides = [1, 1]} : vector<128x32xf32> to vector<32x16xf32>
    %cst_155 = arith.constant dense<0.000000e+00> : vector<8x16xf32>
    %327 = tpu.matmul %325, %326, %cst_155 {dimension_numbers = #tpu.dot_dimension_numbers<[1], [0], [0], [1], [0, 0, 1, 1], [], []>} : vector<8x32xf32>, vector<32x16xf32>, vector<8x16xf32> -> vector<8x16xf32>
    %cst_156 = arith.constant dense<0xFF800000> : vector<8xf32>
    %328 = vector.multi_reduction <maximumf>, %327, %cst_156 [1] : vector<8x16xf32> to vector<8xf32>
    %329 = vector.shape_cast %328 : vector<8xf32> to vector<8x1xf32>
    %330 = vector.broadcast %329 : vector<8x1xf32> to vector<8x16xf32>
    %331 = arith.subf %327, %330 : vector<8x16xf32>
    %332 = math.exp %331 : vector<8x16xf32>
    %cst_157 = arith.constant dense<0.000000e+00> : vector<8xf32>
    %333 = vector.multi_reduction <add>, %332, %cst_157 [1] : vector<8x16xf32> to vector<8xf32>
    %334 = vector.shape_cast %333 : vector<8xf32> to vector<8x1xf32>
    %335 = tpu.reciprocal %334 {approx = true} : vector<8x1xf32> -> vector<8x1xf32>
    %336 = vector.broadcast %335 : vector<8x1xf32> to vector<8x16xf32>
    %337 = arith.mulf %332, %336 : vector<8x16xf32>
    %338 = vector.extract_strided_slice %211 {offsets = [16, 96], sizes = [16, 32], strides = [1, 1]} : vector<32x128xf32> to vector<16x32xf32>
    %cst_158 = arith.constant dense<0.000000e+00> : vector<8x32xf32>
    %339 = tpu.matmul %337, %338, %cst_158 {dimension_numbers = #tpu.dot_dimension_numbers<[1], [0], [0], [1], [0, 0, 1, 1], [], []>} : vector<8x16xf32>, vector<16x32xf32>, vector<8x32xf32> -> vector<8x32xf32>
    %c8_159 = arith.constant 8 : index
    %c96_160 = arith.constant 96 : index
    %340 = vector.load %arg16[%c8_159, %c96_160] : memref<16x128xf32, #tpu.memory_space<vmem>>, vector<8x32xf32>
    tpu.vector_store %arg16[%c8_159, %c96_160], %339 {strides = array<i32>} : memref<16x128xf32, #tpu.memory_space<vmem>>, vector<8x32xf32>,
    %c0_161 = arith.constant 0 : index
    %c0_162 = arith.constant 0 : index
    %341 = vector.load %arg16[%c0_161, %c0_162] : memref<16x128xf32, #tpu.memory_space<vmem>>, vector<16x128xf32>
    %c0_163 = arith.constant 0 : index
    %c5 = arith.constant 5 : index
    %c0_164 = arith.constant 0 : index
    %c0_165 = arith.constant 0 : index
    %342 = vector.load %arg7[%c0_163, %c5, %c0_164, %c0_165] : memref<2x6x128x128xbf16, #tpu.memory_space<vmem>>, vector<1x1x128x128xbf16>
    %343 = vector.shape_cast %342 : vector<1x1x128x128xbf16> to vector<128x128xbf16>
    %344 = arith.truncf %341 : vector<16x128xf32> to vector<16x128xbf16>
    %cst_166 = arith.constant dense<0.000000e+00> : vector<16x128xf32>
    %345 = tpu.matmul %344, %343, %cst_166 {dimension_numbers = #tpu.dot_dimension_numbers<[1], [0], [0], [1], [0, 0, 1, 1], [], []>} : vector<16x128xbf16>, vector<128x128xbf16>, vector<16x128xf32> -> vector<16x128xf32>
    %c0_167 = arith.constant 0 : index
    %c5_168 = arith.constant 5 : index
    %c0_169 = arith.constant 0 : index
    %c0_170 = arith.constant 0 : index
    %346 = vector.load %arg8[%c0_167, %c5_168, %c0_169, %c0_170] : memref<2x6x1x128xf32, #tpu.memory_space<vmem>>, vector<1x1x1x128xf32>
    %347 = vector.shape_cast %346 : vector<1x1x1x128xf32> to vector<1x128xf32>
    %348 = vector.broadcast %347 : vector<1x128xf32> to vector<16x128xf32>
    %349 = arith.addf %345, %348 : vector<16x128xf32>
    %350 = arith.addf %186, %349 : vector<16x128xf32>
    %c0_171 = arith.constant 0 : index
    %c1_172 = arith.constant 1 : index
    %c0_173 = arith.constant 0 : index
    %c0_174 = arith.constant 0 : index
    %351 = vector.load %arg13[%c0_171, %c1_172, %c0_173, %c0_174] : memref<2x3x1x128xf32, #tpu.memory_space<vmem>>, vector<1x1x1x128xf32>
    %352 = vector.shape_cast %351 : vector<1x1x1x128xf32> to vector<1x128xf32>
    %c0_175 = arith.constant 0 : index
    %c1_176 = arith.constant 1 : index
    %c0_177 = arith.constant 0 : index
    %c0_178 = arith.constant 0 : index
    %353 = vector.load %arg14[%c0_175, %c1_176, %c0_177, %c0_178] : memref<2x3x1x128xf32, #tpu.memory_space<vmem>>, vector<1x1x1x128xf32>
    %354 = vector.shape_cast %353 : vector<1x1x1x128xf32> to vector<1x128xf32>
    %cst_179 = arith.constant dense<0.000000e+00> : vector<16xf32>
    %355 = vector.multi_reduction <add>, %350, %cst_179 [1] : vector<16x128xf32> to vector<16xf32>
    %356 = vector.shape_cast %355 : vector<16xf32> to vector<16x1xf32>
    %cst_180 = arith.constant 1.280000e+02 : f32
    %357 = vector.broadcast %cst_180 : f32 to vector<16x1xf32>
    %358 = arith.divf %356, %357 : vector<16x1xf32>
    %359 = vector.broadcast %358 : vector<16x1xf32> to vector<16x128xf32>
    %360 = arith.subf %350, %359 : vector<16x128xf32>
    %361 = arith.mulf %360, %360 : vector<16x128xf32>
    %cst_181 = arith.constant dense<0.000000e+00> : vector<16xf32>
    %362 = vector.multi_reduction <add>, %361, %cst_181 [1] : vector<16x128xf32> to vector<16xf32>
    %363 = vector.shape_cast %362 : vector<16xf32> to vector<16x1xf32>
    %cst_182 = arith.constant 1.280000e+02 : f32
    %364 = vector.broadcast %cst_182 : f32 to vector<16x1xf32>
    %365 = arith.divf %363, %364 : vector<16x1xf32>
    %cst_183 = arith.constant 9.99999974E-6 : f32
    %366 = vector.broadcast %cst_183 : f32 to vector<16x1xf32>
    %367 = arith.addf %365, %366 : vector<16x1xf32>
    %368 = math.rsqrt %367 : vector<16x1xf32>
    %369 = vector.broadcast %368 : vector<16x1xf32> to vector<16x128xf32>
    %370 = arith.mulf %360, %369 : vector<16x128xf32>
    %371 = vector.broadcast %352 : vector<1x128xf32> to vector<16x128xf32>
    %372 = arith.mulf %370, %371 : vector<16x128xf32>
    %373 = vector.broadcast %354 : vector<1x128xf32> to vector<16x128xf32>
    %374 = arith.addf %372, %373 : vector<16x128xf32>
    %c0_184 = arith.constant 0 : index
    %c0_185 = arith.constant 0 : index
    %c0_186 = arith.constant 0 : index
    %375 = vector.load %arg9[%c0_184, %c0_185, %c0_186] : memref<2x128x256xbf16, #tpu.memory_space<vmem>>, vector<1x128x256xbf16>
    %376 = vector.shape_cast %375 : vector<1x128x256xbf16> to vector<128x256xbf16>
    %377 = arith.truncf %374 : vector<16x128xf32> to vector<16x128xbf16>
    %cst_187 = arith.constant dense<0.000000e+00> : vector<16x256xf32>
    %378 = tpu.matmul %377, %376, %cst_187 {dimension_numbers = #tpu.dot_dimension_numbers<[1], [0], [0], [1], [0, 0, 1, 1], [], []>} : vector<16x128xbf16>, vector<128x256xbf16>, vector<16x256xf32> -> vector<16x256xf32>
    %c0_188 = arith.constant 0 : index
    %c0_189 = arith.constant 0 : index
    %c0_190 = arith.constant 0 : index
    %379 = vector.load %arg10[%c0_188, %c0_189, %c0_190] : memref<2x1x256xf32, #tpu.memory_space<vmem>>, vector<1x1x256xf32>
    %380 = vector.shape_cast %379 : vector<1x1x256xf32> to vector<1x256xf32>
    %381 = vector.broadcast %380 : vector<1x256xf32> to vector<16x256xf32>
    %382 = arith.addf %378, %381 : vector<16x256xf32>
    %cst_191 = arith.constant 0.000000e+00 : f32
    %383 = vector.broadcast %cst_191 : f32 to vector<16x256xf32>
    %384 = arith.maximumf %382, %383 : vector<16x256xf32>
    %c0_192 = arith.constant 0 : index
    %c0_193 = arith.constant 0 : index
    %c0_194 = arith.constant 0 : index
    %385 = vector.load %arg11[%c0_192, %c0_193, %c0_194] : memref<2x256x128xbf16, #tpu.memory_space<vmem>>, vector<1x256x128xbf16>
    %386 = vector.shape_cast %385 : vector<1x256x128xbf16> to vector<256x128xbf16>
    %387 = arith.truncf %384 : vector<16x256xf32> to vector<16x256xbf16>
    %cst_195 = arith.constant dense<0.000000e+00> : vector<16x128xf32>
    %388 = tpu.matmul %387, %386, %cst_195 {dimension_numbers = #tpu.dot_dimension_numbers<[1], [0], [0], [1], [0, 0, 1, 1], [], []>} : vector<16x256xbf16>, vector<256x128xbf16>, vector<16x128xf32> -> vector<16x128xf32>
    %c0_196 = arith.constant 0 : index
    %c0_197 = arith.constant 0 : index
    %c0_198 = arith.constant 0 : index
    %389 = vector.load %arg12[%c0_196, %c0_197, %c0_198] : memref<2x1x128xf32, #tpu.memory_space<vmem>>, vector<1x1x128xf32>
    %390 = vector.shape_cast %389 : vector<1x1x128xf32> to vector<1x128xf32>
    %391 = vector.broadcast %390 : vector<1x128xf32> to vector<16x128xf32>
    %392 = arith.addf %388, %391 : vector<16x128xf32>
    %393 = arith.addf %374, %392 : vector<16x128xf32>
    %c0_199 = arith.constant 0 : index
    %c2_200 = arith.constant 2 : index
    %c0_201 = arith.constant 0 : index
    %c0_202 = arith.constant 0 : index
    %394 = vector.load %arg13[%c0_199, %c2_200, %c0_201, %c0_202] : memref<2x3x1x128xf32, #tpu.memory_space<vmem>>, vector<1x1x1x128xf32>
    %395 = vector.shape_cast %394 : vector<1x1x1x128xf32> to vector<1x128xf32>
    %c0_203 = arith.constant 0 : index
    %c2_204 = arith.constant 2 : index
    %c0_205 = arith.constant 0 : index
    %c0_206 = arith.constant 0 : index
    %396 = vector.load %arg14[%c0_203, %c2_204, %c0_205, %c0_206] : memref<2x3x1x128xf32, #tpu.memory_space<vmem>>, vector<1x1x1x128xf32>
    %397 = vector.shape_cast %396 : vector<1x1x1x128xf32> to vector<1x128xf32>
    %cst_207 = arith.constant dense<0.000000e+00> : vector<16xf32>
    %398 = vector.multi_reduction <add>, %393, %cst_207 [1] : vector<16x128xf32> to vector<16xf32>
    %399 = vector.shape_cast %398 : vector<16xf32> to vector<16x1xf32>
    %cst_208 = arith.constant 1.280000e+02 : f32
    %400 = vector.broadcast %cst_208 : f32 to vector<16x1xf32>
    %401 = arith.divf %399, %400 : vector<16x1xf32>
    %402 = vector.broadcast %401 : vector<16x1xf32> to vector<16x128xf32>
    %403 = arith.subf %393, %402 : vector<16x128xf32>
    %404 = arith.mulf %403, %403 : vector<16x128xf32>
    %cst_209 = arith.constant dense<0.000000e+00> : vector<16xf32>
    %405 = vector.multi_reduction <add>, %404, %cst_209 [1] : vector<16x128xf32> to vector<16xf32>
    %406 = vector.shape_cast %405 : vector<16xf32> to vector<16x1xf32>
    %cst_210 = arith.constant 1.280000e+02 : f32
    %407 = vector.broadcast %cst_210 : f32 to vector<16x1xf32>
    %408 = arith.divf %406, %407 : vector<16x1xf32>
    %cst_211 = arith.constant 9.99999974E-6 : f32
    %409 = vector.broadcast %cst_211 : f32 to vector<16x1xf32>
    %410 = arith.addf %408, %409 : vector<16x1xf32>
    %411 = math.rsqrt %410 : vector<16x1xf32>
    %412 = vector.broadcast %411 : vector<16x1xf32> to vector<16x128xf32>
    %413 = arith.mulf %403, %412 : vector<16x128xf32>
    %414 = vector.broadcast %395 : vector<1x128xf32> to vector<16x128xf32>
    %415 = arith.mulf %413, %414 : vector<16x128xf32>
    %416 = vector.broadcast %397 : vector<1x128xf32> to vector<16x128xf32>
    %417 = arith.addf %415, %416 : vector<16x128xf32>
    %418 = arith.addf %417, %2 : vector<16x128xf32>
    %c1_212 = arith.constant 1 : index
    %c0_213 = arith.constant 0 : index
    %c0_214 = arith.constant 0 : index
    %419 = vector.load %arg5[%c1_212, %c0_213, %c0_214] : memref<2x128x256xbf16, #tpu.memory_space<vmem>>, vector<1x128x256xbf16>
    %420 = vector.shape_cast %419 : vector<1x128x256xbf16> to vector<128x256xbf16>
    %421 = arith.truncf %418 : vector<16x128xf32> to vector<16x128xbf16>
    %cst_215 = arith.constant dense<0.000000e+00> : vector<16x256xf32>
    %422 = tpu.matmul %421, %420, %cst_215 {dimension_numbers = #tpu.dot_dimension_numbers<[1], [0], [0], [1], [0, 0, 1, 1], [], []>} : vector<16x128xbf16>, vector<128x256xbf16>, vector<16x256xf32> -> vector<16x256xf32>
    %c1_216 = arith.constant 1 : index
    %c0_217 = arith.constant 0 : index
    %c0_218 = arith.constant 0 : index
    %423 = vector.load %arg6[%c1_216, %c0_217, %c0_218] : memref<2x1x256xf32, #tpu.memory_space<vmem>>, vector<1x1x256xf32>
    %424 = vector.shape_cast %423 : vector<1x1x256xf32> to vector<1x256xf32>
    %425 = vector.broadcast %424 : vector<1x256xf32> to vector<16x256xf32>
    %426 = arith.addf %422, %425 : vector<16x256xf32>
    %427 = vector.extract_strided_slice %426 {offsets = [0, 0], sizes = [16, 128], strides = [1, 1]} : vector<16x256xf32> to vector<16x128xf32>
    %428 = vector.extract_strided_slice %426 {offsets = [0, 128], sizes = [16, 128], strides = [1, 1]} : vector<16x256xf32> to vector<16x128xf32>
    %c1_219 = arith.constant 1 : index
    %c0_220 = arith.constant 0 : index
    %c0_221 = arith.constant 0 : index
    %c0_222 = arith.constant 0 : index
    %429 = vector.load %arg7[%c1_219, %c0_220, %c0_221, %c0_222] : memref<2x6x128x128xbf16, #tpu.memory_space<vmem>>, vector<1x1x128x128xbf16>
    %430 = vector.shape_cast %429 : vector<1x1x128x128xbf16> to vector<128x128xbf16>
    %431 = arith.truncf %417 : vector<16x128xf32> to vector<16x128xbf16>
    %cst_223 = arith.constant dense<0.000000e+00> : vector<16x128xf32>
    %432 = tpu.matmul %431, %430, %cst_223 {dimension_numbers = #tpu.dot_dimension_numbers<[1], [0], [0], [1], [0, 0, 1, 1], [], []>} : vector<16x128xbf16>, vector<128x128xbf16>, vector<16x128xf32> -> vector<16x128xf32>
    %c1_224 = arith.constant 1 : index
    %c0_225 = arith.constant 0 : index
    %c0_226 = arith.constant 0 : index
    %c0_227 = arith.constant 0 : index
    %433 = vector.load %arg8[%c1_224, %c0_225, %c0_226, %c0_227] : memref<2x6x1x128xf32, #tpu.memory_space<vmem>>, vector<1x1x1x128xf32>
    %434 = vector.shape_cast %433 : vector<1x1x1x128xf32> to vector<1x128xf32>
    %435 = vector.broadcast %434 : vector<1x128xf32> to vector<16x128xf32>
    %436 = arith.addf %432, %435 : vector<16x128xf32>
    %437 = tpu.transpose %428, [1, 0] : vector<16x128xf32> -> vector<128x16xf32>
    %438 = vector.extract_strided_slice %427 {offsets = [0, 0], sizes = [8, 32], strides = [1, 1]} : vector<16x128xf32> to vector<8x32xf32>
    %439 = vector.extract_strided_slice %437 {offsets = [0, 0], sizes = [32, 8], strides = [1, 1]} : vector<128x16xf32> to vector<32x8xf32>
    %cst_228 = arith.constant dense<0.000000e+00> : vector<8x8xf32>
    %440 = tpu.matmul %438, %439, %cst_228 {dimension_numbers = #tpu.dot_dimension_numbers<[1], [0], [0], [1], [0, 0, 1, 1], [], []>} : vector<8x32xf32>, vector<32x8xf32>, vector<8x8xf32> -> vector<8x8xf32>
    %cst_229 = arith.constant dense<0xFF800000> : vector<8xf32>
    %441 = vector.multi_reduction <maximumf>, %440, %cst_229 [1] : vector<8x8xf32> to vector<8xf32>
    %442 = vector.shape_cast %441 : vector<8xf32> to vector<8x1xf32>
    %443 = vector.broadcast %442 : vector<8x1xf32> to vector<8x8xf32>
    %444 = arith.subf %440, %443 : vector<8x8xf32>
    %445 = math.exp %444 : vector<8x8xf32>
    %cst_230 = arith.constant dense<0.000000e+00> : vector<8xf32>
    %446 = vector.multi_reduction <add>, %445, %cst_230 [1] : vector<8x8xf32> to vector<8xf32>
    %447 = vector.shape_cast %446 : vector<8xf32> to vector<8x1xf32>
    %448 = tpu.reciprocal %447 {approx = true} : vector<8x1xf32> -> vector<8x1xf32>
    %449 = vector.broadcast %448 : vector<8x1xf32> to vector<8x8xf32>
    %450 = arith.mulf %445, %449 : vector<8x8xf32>
    %451 = vector.extract_strided_slice %436 {offsets = [0, 0], sizes = [8, 32], strides = [1, 1]} : vector<16x128xf32> to vector<8x32xf32>
    %cst_231 = arith.constant dense<0.000000e+00> : vector<8x32xf32>
    %452 = tpu.matmul %450, %451, %cst_231 {dimension_numbers = #tpu.dot_dimension_numbers<[1], [0], [0], [1], [0, 0, 1, 1], [], []>} : vector<8x8xf32>, vector<8x32xf32>, vector<8x32xf32> -> vector<8x32xf32>
    %c0_232 = arith.constant 0 : index
    %c0_233 = arith.constant 0 : index
    %453 = vector.load %arg16[%c0_232, %c0_233] : memref<16x128xf32, #tpu.memory_space<vmem>>, vector<8x32xf32>
    tpu.vector_store %arg16[%c0_232, %c0_233], %452 {strides = array<i32>} : memref<16x128xf32, #tpu.memory_space<vmem>>, vector<8x32xf32>,
    %454 = vector.extract_strided_slice %427 {offsets = [0, 32], sizes = [8, 32], strides = [1, 1]} : vector<16x128xf32> to vector<8x32xf32>
    %455 = vector.extract_strided_slice %437 {offsets = [32, 0], sizes = [32, 8], strides = [1, 1]} : vector<128x16xf32> to vector<32x8xf32>
    %cst_234 = arith.constant dense<0.000000e+00> : vector<8x8xf32>
    %456 = tpu.matmul %454, %455, %cst_234 {dimension_numbers = #tpu.dot_dimension_numbers<[1], [0], [0], [1], [0, 0, 1, 1], [], []>} : vector<8x32xf32>, vector<32x8xf32>, vector<8x8xf32> -> vector<8x8xf32>
    %cst_235 = arith.constant dense<0xFF800000> : vector<8xf32>
    %457 = vector.multi_reduction <maximumf>, %456, %cst_235 [1] : vector<8x8xf32> to vector<8xf32>
    %458 = vector.shape_cast %457 : vector<8xf32> to vector<8x1xf32>
    %459 = vector.broadcast %458 : vector<8x1xf32> to vector<8x8xf32>
    %460 = arith.subf %456, %459 : vector<8x8xf32>
    %461 = math.exp %460 : vector<8x8xf32>
    %cst_236 = arith.constant dense<0.000000e+00> : vector<8xf32>
    %462 = vector.multi_reduction <add>, %461, %cst_236 [1] : vector<8x8xf32> to vector<8xf32>
    %463 = vector.shape_cast %462 : vector<8xf32> to vector<8x1xf32>
    %464 = tpu.reciprocal %463 {approx = true} : vector<8x1xf32> -> vector<8x1xf32>
    %465 = vector.broadcast %464 : vector<8x1xf32> to vector<8x8xf32>
    %466 = arith.mulf %461, %465 : vector<8x8xf32>
    %467 = vector.extract_strided_slice %436 {offsets = [0, 32], sizes = [8, 32], strides = [1, 1]} : vector<16x128xf32> to vector<8x32xf32>
    %cst_237 = arith.constant dense<0.000000e+00> : vector<8x32xf32>
    %468 = tpu.matmul %466, %467, %cst_237 {dimension_numbers = #tpu.dot_dimension_numbers<[1], [0], [0], [1], [0, 0, 1, 1], [], []>} : vector<8x8xf32>, vector<8x32xf32>, vector<8x32xf32> -> vector<8x32xf32>
    %c0_238 = arith.constant 0 : index
    %c32_239 = arith.constant 32 : index
    %469 = vector.load %arg16[%c0_238, %c32_239] : memref<16x128xf32, #tpu.memory_space<vmem>>, vector<8x32xf32>
    tpu.vector_store %arg16[%c0_238, %c32_239], %468 {strides = array<i32>} : memref<16x128xf32, #tpu.memory_space<vmem>>, vector<8x32xf32>,
    %470 = vector.extract_strided_slice %427 {offsets = [0, 64], sizes = [8, 32], strides = [1, 1]} : vector<16x128xf32> to vector<8x32xf32>
    %471 = vector.extract_strided_slice %437 {offsets = [64, 0], sizes = [32, 8], strides = [1, 1]} : vector<128x16xf32> to vector<32x8xf32>
    %cst_240 = arith.constant dense<0.000000e+00> : vector<8x8xf32>
    %472 = tpu.matmul %470, %471, %cst_240 {dimension_numbers = #tpu.dot_dimension_numbers<[1], [0], [0], [1], [0, 0, 1, 1], [], []>} : vector<8x32xf32>, vector<32x8xf32>, vector<8x8xf32> -> vector<8x8xf32>
    %cst_241 = arith.constant dense<0xFF800000> : vector<8xf32>
    %473 = vector.multi_reduction <maximumf>, %472, %cst_241 [1] : vector<8x8xf32> to vector<8xf32>
    %474 = vector.shape_cast %473 : vector<8xf32> to vector<8x1xf32>
    %475 = vector.broadcast %474 : vector<8x1xf32> to vector<8x8xf32>
    %476 = arith.subf %472, %475 : vector<8x8xf32>
    %477 = math.exp %476 : vector<8x8xf32>
    %cst_242 = arith.constant dense<0.000000e+00> : vector<8xf32>
    %478 = vector.multi_reduction <add>, %477, %cst_242 [1] : vector<8x8xf32> to vector<8xf32>
    %479 = vector.shape_cast %478 : vector<8xf32> to vector<8x1xf32>
    %480 = tpu.reciprocal %479 {approx = true} : vector<8x1xf32> -> vector<8x1xf32>
    %481 = vector.broadcast %480 : vector<8x1xf32> to vector<8x8xf32>
    %482 = arith.mulf %477, %481 : vector<8x8xf32>
    %483 = vector.extract_strided_slice %436 {offsets = [0, 64], sizes = [8, 32], strides = [1, 1]} : vector<16x128xf32> to vector<8x32xf32>
    %cst_243 = arith.constant dense<0.000000e+00> : vector<8x32xf32>
    %484 = tpu.matmul %482, %483, %cst_243 {dimension_numbers = #tpu.dot_dimension_numbers<[1], [0], [0], [1], [0, 0, 1, 1], [], []>} : vector<8x8xf32>, vector<8x32xf32>, vector<8x32xf32> -> vector<8x32xf32>
    %c0_244 = arith.constant 0 : index
    %c64_245 = arith.constant 64 : index
    %485 = vector.load %arg16[%c0_244, %c64_245] : memref<16x128xf32, #tpu.memory_space<vmem>>, vector<8x32xf32>
    tpu.vector_store %arg16[%c0_244, %c64_245], %484 {strides = array<i32>} : memref<16x128xf32, #tpu.memory_space<vmem>>, vector<8x32xf32>,
    %486 = vector.extract_strided_slice %427 {offsets = [0, 96], sizes = [8, 32], strides = [1, 1]} : vector<16x128xf32> to vector<8x32xf32>
    %487 = vector.extract_strided_slice %437 {offsets = [96, 0], sizes = [32, 8], strides = [1, 1]} : vector<128x16xf32> to vector<32x8xf32>
    %cst_246 = arith.constant dense<0.000000e+00> : vector<8x8xf32>
    %488 = tpu.matmul %486, %487, %cst_246 {dimension_numbers = #tpu.dot_dimension_numbers<[1], [0], [0], [1], [0, 0, 1, 1], [], []>} : vector<8x32xf32>, vector<32x8xf32>, vector<8x8xf32> -> vector<8x8xf32>
    %cst_247 = arith.constant dense<0xFF800000> : vector<8xf32>
    %489 = vector.multi_reduction <maximumf>, %488, %cst_247 [1] : vector<8x8xf32> to vector<8xf32>
    %490 = vector.shape_cast %489 : vector<8xf32> to vector<8x1xf32>
    %491 = vector.broadcast %490 : vector<8x1xf32> to vector<8x8xf32>
    %492 = arith.subf %488, %491 : vector<8x8xf32>
    %493 = math.exp %492 : vector<8x8xf32>
    %cst_248 = arith.constant dense<0.000000e+00> : vector<8xf32>
    %494 = vector.multi_reduction <add>, %493, %cst_248 [1] : vector<8x8xf32> to vector<8xf32>
    %495 = vector.shape_cast %494 : vector<8xf32> to vector<8x1xf32>
    %496 = tpu.reciprocal %495 {approx = true} : vector<8x1xf32> -> vector<8x1xf32>
    %497 = vector.broadcast %496 : vector<8x1xf32> to vector<8x8xf32>
    %498 = arith.mulf %493, %497 : vector<8x8xf32>
    %499 = vector.extract_strided_slice %436 {offsets = [0, 96], sizes = [8, 32], strides = [1, 1]} : vector<16x128xf32> to vector<8x32xf32>
    %cst_249 = arith.constant dense<0.000000e+00> : vector<8x32xf32>
    %500 = tpu.matmul %498, %499, %cst_249 {dimension_numbers = #tpu.dot_dimension_numbers<[1], [0], [0], [1], [0, 0, 1, 1], [], []>} : vector<8x8xf32>, vector<8x32xf32>, vector<8x32xf32> -> vector<8x32xf32>
    %c0_250 = arith.constant 0 : index
    %c96_251 = arith.constant 96 : index
    %501 = vector.load %arg16[%c0_250, %c96_251] : memref<16x128xf32, #tpu.memory_space<vmem>>, vector<8x32xf32>
    tpu.vector_store %arg16[%c0_250, %c96_251], %500 {strides = array<i32>} : memref<16x128xf32, #tpu.memory_space<vmem>>, vector<8x32xf32>,
    %502 = vector.extract_strided_slice %427 {offsets = [8, 0], sizes = [8, 32], strides = [1, 1]} : vector<16x128xf32> to vector<8x32xf32>
    %503 = vector.extract_strided_slice %437 {offsets = [0, 8], sizes = [32, 8], strides = [1, 1]} : vector<128x16xf32> to vector<32x8xf32>
    %cst_252 = arith.constant dense<0.000000e+00> : vector<8x8xf32>
    %504 = tpu.matmul %502, %503, %cst_252 {dimension_numbers = #tpu.dot_dimension_numbers<[1], [0], [0], [1], [0, 0, 1, 1], [], []>} : vector<8x32xf32>, vector<32x8xf32>, vector<8x8xf32> -> vector<8x8xf32>
    %cst_253 = arith.constant dense<0xFF800000> : vector<8xf32>
    %505 = vector.multi_reduction <maximumf>, %504, %cst_253 [1] : vector<8x8xf32> to vector<8xf32>
    %506 = vector.shape_cast %505 : vector<8xf32> to vector<8x1xf32>
    %507 = vector.broadcast %506 : vector<8x1xf32> to vector<8x8xf32>
    %508 = arith.subf %504, %507 : vector<8x8xf32>
    %509 = math.exp %508 : vector<8x8xf32>
    %cst_254 = arith.constant dense<0.000000e+00> : vector<8xf32>
    %510 = vector.multi_reduction <add>, %509, %cst_254 [1] : vector<8x8xf32> to vector<8xf32>
    %511 = vector.shape_cast %510 : vector<8xf32> to vector<8x1xf32>
    %512 = tpu.reciprocal %511 {approx = true} : vector<8x1xf32> -> vector<8x1xf32>
    %513 = vector.broadcast %512 : vector<8x1xf32> to vector<8x8xf32>
    %514 = arith.mulf %509, %513 : vector<8x8xf32>
    %515 = vector.extract_strided_slice %436 {offsets = [8, 0], sizes = [8, 32], strides = [1, 1]} : vector<16x128xf32> to vector<8x32xf32>
    %cst_255 = arith.constant dense<0.000000e+00> : vector<8x32xf32>
    %516 = tpu.matmul %514, %515, %cst_255 {dimension_numbers = #tpu.dot_dimension_numbers<[1], [0], [0], [1], [0, 0, 1, 1], [], []>} : vector<8x8xf32>, vector<8x32xf32>, vector<8x32xf32> -> vector<8x32xf32>
    %c8_256 = arith.constant 8 : index
    %c0_257 = arith.constant 0 : index
    %517 = vector.load %arg16[%c8_256, %c0_257] : memref<16x128xf32, #tpu.memory_space<vmem>>, vector<8x32xf32>
    tpu.vector_store %arg16[%c8_256, %c0_257], %516 {strides = array<i32>} : memref<16x128xf32, #tpu.memory_space<vmem>>, vector<8x32xf32>,
    %518 = vector.extract_strided_slice %427 {offsets = [8, 32], sizes = [8, 32], strides = [1, 1]} : vector<16x128xf32> to vector<8x32xf32>
    %519 = vector.extract_strided_slice %437 {offsets = [32, 8], sizes = [32, 8], strides = [1, 1]} : vector<128x16xf32> to vector<32x8xf32>
    %cst_258 = arith.constant dense<0.000000e+00> : vector<8x8xf32>
    %520 = tpu.matmul %518, %519, %cst_258 {dimension_numbers = #tpu.dot_dimension_numbers<[1], [0], [0], [1], [0, 0, 1, 1], [], []>} : vector<8x32xf32>, vector<32x8xf32>, vector<8x8xf32> -> vector<8x8xf32>
    %cst_259 = arith.constant dense<0xFF800000> : vector<8xf32>
    %521 = vector.multi_reduction <maximumf>, %520, %cst_259 [1] : vector<8x8xf32> to vector<8xf32>
    %522 = vector.shape_cast %521 : vector<8xf32> to vector<8x1xf32>
    %523 = vector.broadcast %522 : vector<8x1xf32> to vector<8x8xf32>
    %524 = arith.subf %520, %523 : vector<8x8xf32>
    %525 = math.exp %524 : vector<8x8xf32>
    %cst_260 = arith.constant dense<0.000000e+00> : vector<8xf32>
    %526 = vector.multi_reduction <add>, %525, %cst_260 [1] : vector<8x8xf32> to vector<8xf32>
    %527 = vector.shape_cast %526 : vector<8xf32> to vector<8x1xf32>
    %528 = tpu.reciprocal %527 {approx = true} : vector<8x1xf32> -> vector<8x1xf32>
    %529 = vector.broadcast %528 : vector<8x1xf32> to vector<8x8xf32>
    %530 = arith.mulf %525, %529 : vector<8x8xf32>
    %531 = vector.extract_strided_slice %436 {offsets = [8, 32], sizes = [8, 32], strides = [1, 1]} : vector<16x128xf32> to vector<8x32xf32>
    %cst_261 = arith.constant dense<0.000000e+00> : vector<8x32xf32>
    %532 = tpu.matmul %530, %531, %cst_261 {dimension_numbers = #tpu.dot_dimension_numbers<[1], [0], [0], [1], [0, 0, 1, 1], [], []>} : vector<8x8xf32>, vector<8x32xf32>, vector<8x32xf32> -> vector<8x32xf32>
    %c8_262 = arith.constant 8 : index
    %c32_263 = arith.constant 32 : index
    %533 = vector.load %arg16[%c8_262, %c32_263] : memref<16x128xf32, #tpu.memory_space<vmem>>, vector<8x32xf32>
    tpu.vector_store %arg16[%c8_262, %c32_263], %532 {strides = array<i32>} : memref<16x128xf32, #tpu.memory_space<vmem>>, vector<8x32xf32>,
    %534 = vector.extract_strided_slice %427 {offsets = [8, 64], sizes = [8, 32], strides = [1, 1]} : vector<16x128xf32> to vector<8x32xf32>
    %535 = vector.extract_strided_slice %437 {offsets = [64, 8], sizes = [32, 8], strides = [1, 1]} : vector<128x16xf32> to vector<32x8xf32>
    %cst_264 = arith.constant dense<0.000000e+00> : vector<8x8xf32>
    %536 = tpu.matmul %534, %535, %cst_264 {dimension_numbers = #tpu.dot_dimension_numbers<[1], [0], [0], [1], [0, 0, 1, 1], [], []>} : vector<8x32xf32>, vector<32x8xf32>, vector<8x8xf32> -> vector<8x8xf32>
    %cst_265 = arith.constant dense<0xFF800000> : vector<8xf32>
    %537 = vector.multi_reduction <maximumf>, %536, %cst_265 [1] : vector<8x8xf32> to vector<8xf32>
    %538 = vector.shape_cast %537 : vector<8xf32> to vector<8x1xf32>
    %539 = vector.broadcast %538 : vector<8x1xf32> to vector<8x8xf32>
    %540 = arith.subf %536, %539 : vector<8x8xf32>
    %541 = math.exp %540 : vector<8x8xf32>
    %cst_266 = arith.constant dense<0.000000e+00> : vector<8xf32>
    %542 = vector.multi_reduction <add>, %541, %cst_266 [1] : vector<8x8xf32> to vector<8xf32>
    %543 = vector.shape_cast %542 : vector<8xf32> to vector<8x1xf32>
    %544 = tpu.reciprocal %543 {approx = true} : vector<8x1xf32> -> vector<8x1xf32>
    %545 = vector.broadcast %544 : vector<8x1xf32> to vector<8x8xf32>
    %546 = arith.mulf %541, %545 : vector<8x8xf32>
    %547 = vector.extract_strided_slice %436 {offsets = [8, 64], sizes = [8, 32], strides = [1, 1]} : vector<16x128xf32> to vector<8x32xf32>
    %cst_267 = arith.constant dense<0.000000e+00> : vector<8x32xf32>
    %548 = tpu.matmul %546, %547, %cst_267 {dimension_numbers = #tpu.dot_dimension_numbers<[1], [0], [0], [1], [0, 0, 1, 1], [], []>} : vector<8x8xf32>, vector<8x32xf32>, vector<8x32xf32> -> vector<8x32xf32>
    %c8_268 = arith.constant 8 : index
    %c64_269 = arith.constant 64 : index
    %549 = vector.load %arg16[%c8_268, %c64_269] : memref<16x128xf32, #tpu.memory_space<vmem>>, vector<8x32xf32>
    tpu.vector_store %arg16[%c8_268, %c64_269], %548 {strides = array<i32>} : memref<16x128xf32, #tpu.memory_space<vmem>>, vector<8x32xf32>,
    %550 = vector.extract_strided_slice %427 {offsets = [8, 96], sizes = [8, 32], strides = [1, 1]} : vector<16x128xf32> to vector<8x32xf32>
    %551 = vector.extract_strided_slice %437 {offsets = [96, 8], sizes = [32, 8], strides = [1, 1]} : vector<128x16xf32> to vector<32x8xf32>
    %cst_270 = arith.constant dense<0.000000e+00> : vector<8x8xf32>
    %552 = tpu.matmul %550, %551, %cst_270 {dimension_numbers = #tpu.dot_dimension_numbers<[1], [0], [0], [1], [0, 0, 1, 1], [], []>} : vector<8x32xf32>, vector<32x8xf32>, vector<8x8xf32> -> vector<8x8xf32>
    %cst_271 = arith.constant dense<0xFF800000> : vector<8xf32>
    %553 = vector.multi_reduction <maximumf>, %552, %cst_271 [1] : vector<8x8xf32> to vector<8xf32>
    %554 = vector.shape_cast %553 : vector<8xf32> to vector<8x1xf32>
    %555 = vector.broadcast %554 : vector<8x1xf32> to vector<8x8xf32>
    %556 = arith.subf %552, %555 : vector<8x8xf32>
    %557 = math.exp %556 : vector<8x8xf32>
    %cst_272 = arith.constant dense<0.000000e+00> : vector<8xf32>
    %558 = vector.multi_reduction <add>, %557, %cst_272 [1] : vector<8x8xf32> to vector<8xf32>
    %559 = vector.shape_cast %558 : vector<8xf32> to vector<8x1xf32>
    %560 = tpu.reciprocal %559 {approx = true} : vector<8x1xf32> -> vector<8x1xf32>
    %561 = vector.broadcast %560 : vector<8x1xf32> to vector<8x8xf32>
    %562 = arith.mulf %557, %561 : vector<8x8xf32>
    %563 = vector.extract_strided_slice %436 {offsets = [8, 96], sizes = [8, 32], strides = [1, 1]} : vector<16x128xf32> to vector<8x32xf32>
    %cst_273 = arith.constant dense<0.000000e+00> : vector<8x32xf32>
    %564 = tpu.matmul %562, %563, %cst_273 {dimension_numbers = #tpu.dot_dimension_numbers<[1], [0], [0], [1], [0, 0, 1, 1], [], []>} : vector<8x8xf32>, vector<8x32xf32>, vector<8x32xf32> -> vector<8x32xf32>
    %c8_274 = arith.constant 8 : index
    %c96_275 = arith.constant 96 : index
    %565 = vector.load %arg16[%c8_274, %c96_275] : memref<16x128xf32, #tpu.memory_space<vmem>>, vector<8x32xf32>
    tpu.vector_store %arg16[%c8_274, %c96_275], %564 {strides = array<i32>} : memref<16x128xf32, #tpu.memory_space<vmem>>, vector<8x32xf32>,
    %c0_276 = arith.constant 0 : index
    %c0_277 = arith.constant 0 : index
    %566 = vector.load %arg16[%c0_276, %c0_277] : memref<16x128xf32, #tpu.memory_space<vmem>>, vector<16x128xf32>
    %c1_278 = arith.constant 1 : index
    %c1_279 = arith.constant 1 : index
    %c0_280 = arith.constant 0 : index
    %c0_281 = arith.constant 0 : index
    %567 = vector.load %arg7[%c1_278, %c1_279, %c0_280, %c0_281] : memref<2x6x128x128xbf16, #tpu.memory_space<vmem>>, vector<1x1x128x128xbf16>
    %568 = vector.shape_cast %567 : vector<1x1x128x128xbf16> to vector<128x128xbf16>
    %569 = arith.truncf %566 : vector<16x128xf32> to vector<16x128xbf16>
    %cst_282 = arith.constant dense<0.000000e+00> : vector<16x128xf32>
    %570 = tpu.matmul %569, %568, %cst_282 {dimension_numbers = #tpu.dot_dimension_numbers<[1], [0], [0], [1], [0, 0, 1, 1], [], []>} : vector<16x128xbf16>, vector<128x128xbf16>, vector<16x128xf32> -> vector<16x128xf32>
    %c1_283 = arith.constant 1 : index
    %c1_284 = arith.constant 1 : index
    %c0_285 = arith.constant 0 : index
    %c0_286 = arith.constant 0 : index
    %571 = vector.load %arg8[%c1_283, %c1_284, %c0_285, %c0_286] : memref<2x6x1x128xf32, #tpu.memory_space<vmem>>, vector<1x1x1x128xf32>
    %572 = vector.shape_cast %571 : vector<1x1x1x128xf32> to vector<1x128xf32>
    %573 = vector.broadcast %572 : vector<1x128xf32> to vector<16x128xf32>
    %574 = arith.addf %570, %573 : vector<16x128xf32>
    %575 = arith.addf %417, %574 : vector<16x128xf32>
    %c1_287 = arith.constant 1 : index
    %c0_288 = arith.constant 0 : index
    %c0_289 = arith.constant 0 : index
    %c0_290 = arith.constant 0 : index
    %576 = vector.load %arg13[%c1_287, %c0_288, %c0_289, %c0_290] : memref<2x3x1x128xf32, #tpu.memory_space<vmem>>, vector<1x1x1x128xf32>
    %577 = vector.shape_cast %576 : vector<1x1x1x128xf32> to vector<1x128xf32>
    %c1_291 = arith.constant 1 : index
    %c0_292 = arith.constant 0 : index
    %c0_293 = arith.constant 0 : index
    %c0_294 = arith.constant 0 : index
    %578 = vector.load %arg14[%c1_291, %c0_292, %c0_293, %c0_294] : memref<2x3x1x128xf32, #tpu.memory_space<vmem>>, vector<1x1x1x128xf32>
    %579 = vector.shape_cast %578 : vector<1x1x1x128xf32> to vector<1x128xf32>
    %cst_295 = arith.constant dense<0.000000e+00> : vector<16xf32>
    %580 = vector.multi_reduction <add>, %575, %cst_295 [1] : vector<16x128xf32> to vector<16xf32>
    %581 = vector.shape_cast %580 : vector<16xf32> to vector<16x1xf32>
    %cst_296 = arith.constant 1.280000e+02 : f32
    %582 = vector.broadcast %cst_296 : f32 to vector<16x1xf32>
    %583 = arith.divf %581, %582 : vector<16x1xf32>
    %584 = vector.broadcast %583 : vector<16x1xf32> to vector<16x128xf32>
    %585 = arith.subf %575, %584 : vector<16x128xf32>
    %586 = arith.mulf %585, %585 : vector<16x128xf32>
    %cst_297 = arith.constant dense<0.000000e+00> : vector<16xf32>
    %587 = vector.multi_reduction <add>, %586, %cst_297 [1] : vector<16x128xf32> to vector<16xf32>
    %588 = vector.shape_cast %587 : vector<16xf32> to vector<16x1xf32>
    %cst_298 = arith.constant 1.280000e+02 : f32
    %589 = vector.broadcast %cst_298 : f32 to vector<16x1xf32>
    %590 = arith.divf %588, %589 : vector<16x1xf32>
    %cst_299 = arith.constant 9.99999974E-6 : f32
    %591 = vector.broadcast %cst_299 : f32 to vector<16x1xf32>
    %592 = arith.addf %590, %591 : vector<16x1xf32>
    %593 = math.rsqrt %592 : vector<16x1xf32>
    %594 = vector.broadcast %593 : vector<16x1xf32> to vector<16x128xf32>
    %595 = arith.mulf %585, %594 : vector<16x128xf32>
    %596 = vector.broadcast %577 : vector<1x128xf32> to vector<16x128xf32>
    %597 = arith.mulf %595, %596 : vector<16x128xf32>
    %598 = vector.broadcast %579 : vector<1x128xf32> to vector<16x128xf32>
    %599 = arith.addf %597, %598 : vector<16x128xf32>
    %600 = arith.addf %599, %2 : vector<16x128xf32>
    %c1_300 = arith.constant 1 : index
    %c2_301 = arith.constant 2 : index
    %c0_302 = arith.constant 0 : index
    %c0_303 = arith.constant 0 : index
    %601 = vector.load %arg7[%c1_300, %c2_301, %c0_302, %c0_303] : memref<2x6x128x128xbf16, #tpu.memory_space<vmem>>, vector<1x1x128x128xbf16>
    %602 = vector.shape_cast %601 : vector<1x1x128x128xbf16> to vector<128x128xbf16>
    %603 = arith.truncf %600 : vector<16x128xf32> to vector<16x128xbf16>
    %cst_304 = arith.constant dense<0.000000e+00> : vector<16x128xf32>
    %604 = tpu.matmul %603, %602, %cst_304 {dimension_numbers = #tpu.dot_dimension_numbers<[1], [0], [0], [1], [0, 0, 1, 1], [], []>} : vector<16x128xbf16>, vector<128x128xbf16>, vector<16x128xf32> -> vector<16x128xf32>
    %c1_305 = arith.constant 1 : index
    %c2_306 = arith.constant 2 : index
    %c0_307 = arith.constant 0 : index
    %c0_308 = arith.constant 0 : index
    %605 = vector.load %arg8[%c1_305, %c2_306, %c0_307, %c0_308] : memref<2x6x1x128xf32, #tpu.memory_space<vmem>>, vector<1x1x1x128xf32>
    %606 = vector.shape_cast %605 : vector<1x1x1x128xf32> to vector<1x128xf32>
    %607 = vector.broadcast %606 : vector<1x128xf32> to vector<16x128xf32>
    %608 = arith.addf %604, %607 : vector<16x128xf32>
    %c1_309 = arith.constant 1 : index
    %c3_310 = arith.constant 3 : index
    %c0_311 = arith.constant 0 : index
    %c0_312 = arith.constant 0 : index
    %609 = vector.load %arg7[%c1_309, %c3_310, %c0_311, %c0_312] : memref<2x6x128x128xbf16, #tpu.memory_space<vmem>>, vector<1x1x128x128xbf16>
    %610 = vector.shape_cast %609 : vector<1x1x128x128xbf16> to vector<128x128xbf16>
    %611 = arith.truncf %4 : vector<32x128xf32> to vector<32x128xbf16>
    %cst_313 = arith.constant dense<0.000000e+00> : vector<32x128xf32>
    %612 = tpu.matmul %611, %610, %cst_313 {dimension_numbers = #tpu.dot_dimension_numbers<[1], [0], [0], [1], [0, 0, 1, 1], [], []>} : vector<32x128xbf16>, vector<128x128xbf16>, vector<32x128xf32> -> vector<32x128xf32>
    %c1_314 = arith.constant 1 : index
    %c3_315 = arith.constant 3 : index
    %c0_316 = arith.constant 0 : index
    %c0_317 = arith.constant 0 : index
    %613 = vector.load %arg8[%c1_314, %c3_315, %c0_316, %c0_317] : memref<2x6x1x128xf32, #tpu.memory_space<vmem>>, vector<1x1x1x128xf32>
    %614 = vector.shape_cast %613 : vector<1x1x1x128xf32> to vector<1x128xf32>
    %615 = vector.broadcast %614 : vector<1x128xf32> to vector<32x128xf32>
    %616 = arith.addf %612, %615 : vector<32x128xf32>
    %c1_318 = arith.constant 1 : index
    %c4_319 = arith.constant 4 : index
    %c0_320 = arith.constant 0 : index
    %c0_321 = arith.constant 0 : index
    %617 = vector.load %arg7[%c1_318, %c4_319, %c0_320, %c0_321] : memref<2x6x128x128xbf16, #tpu.memory_space<vmem>>, vector<1x1x128x128xbf16>
    %618 = vector.shape_cast %617 : vector<1x1x128x128xbf16> to vector<128x128xbf16>
    %619 = arith.truncf %1 : vector<32x128xf32> to vector<32x128xbf16>
    %cst_322 = arith.constant dense<0.000000e+00> : vector<32x128xf32>
    %620 = tpu.matmul %619, %618, %cst_322 {dimension_numbers = #tpu.dot_dimension_numbers<[1], [0], [0], [1], [0, 0, 1, 1], [], []>} : vector<32x128xbf16>, vector<128x128xbf16>, vector<32x128xf32> -> vector<32x128xf32>
    %c1_323 = arith.constant 1 : index
    %c4_324 = arith.constant 4 : index
    %c0_325 = arith.constant 0 : index
    %c0_326 = arith.constant 0 : index
    %621 = vector.load %arg8[%c1_323, %c4_324, %c0_325, %c0_326] : memref<2x6x1x128xf32, #tpu.memory_space<vmem>>, vector<1x1x1x128xf32>
    %622 = vector.shape_cast %621 : vector<1x1x1x128xf32> to vector<1x128xf32>
    %623 = vector.broadcast %622 : vector<1x128xf32> to vector<32x128xf32>
    %624 = arith.addf %620, %623 : vector<32x128xf32>
    %625 = tpu.transpose %616, [1, 0] : vector<32x128xf32> -> vector<128x32xf32>
    %626 = vector.extract_strided_slice %608 {offsets = [0, 0], sizes = [8, 32], strides = [1, 1]} : vector<16x128xf32> to vector<8x32xf32>
    %627 = vector.extract_strided_slice %625 {offsets = [0, 0], sizes = [32, 16], strides = [1, 1]} : vector<128x32xf32> to vector<32x16xf32>
    %cst_327 = arith.constant dense<0.000000e+00> : vector<8x16xf32>
    %628 = tpu.matmul %626, %627, %cst_327 {dimension_numbers = #tpu.dot_dimension_numbers<[1], [0], [0], [1], [0, 0, 1, 1], [], []>} : vector<8x32xf32>, vector<32x16xf32>, vector<8x16xf32> -> vector<8x16xf32>
    %cst_328 = arith.constant dense<0xFF800000> : vector<8xf32>
    %629 = vector.multi_reduction <maximumf>, %628, %cst_328 [1] : vector<8x16xf32> to vector<8xf32>
    %630 = vector.shape_cast %629 : vector<8xf32> to vector<8x1xf32>
    %631 = vector.broadcast %630 : vector<8x1xf32> to vector<8x16xf32>
    %632 = arith.subf %628, %631 : vector<8x16xf32>
    %633 = math.exp %632 : vector<8x16xf32>
    %cst_329 = arith.constant dense<0.000000e+00> : vector<8xf32>
    %634 = vector.multi_reduction <add>, %633, %cst_329 [1] : vector<8x16xf32> to vector<8xf32>
    %635 = vector.shape_cast %634 : vector<8xf32> to vector<8x1xf32>
    %636 = tpu.reciprocal %635 {approx = true} : vector<8x1xf32> -> vector<8x1xf32>
    %637 = vector.broadcast %636 : vector<8x1xf32> to vector<8x16xf32>
    %638 = arith.mulf %633, %637 : vector<8x16xf32>
    %639 = vector.extract_strided_slice %624 {offsets = [0, 0], sizes = [16, 32], strides = [1, 1]} : vector<32x128xf32> to vector<16x32xf32>
    %cst_330 = arith.constant dense<0.000000e+00> : vector<8x32xf32>
    %640 = tpu.matmul %638, %639, %cst_330 {dimension_numbers = #tpu.dot_dimension_numbers<[1], [0], [0], [1], [0, 0, 1, 1], [], []>} : vector<8x16xf32>, vector<16x32xf32>, vector<8x32xf32> -> vector<8x32xf32>
    %c0_331 = arith.constant 0 : index
    %c0_332 = arith.constant 0 : index
    %641 = vector.load %arg16[%c0_331, %c0_332] : memref<16x128xf32, #tpu.memory_space<vmem>>, vector<8x32xf32>
    tpu.vector_store %arg16[%c0_331, %c0_332], %640 {strides = array<i32>} : memref<16x128xf32, #tpu.memory_space<vmem>>, vector<8x32xf32>,
    %642 = vector.extract_strided_slice %608 {offsets = [0, 32], sizes = [8, 32], strides = [1, 1]} : vector<16x128xf32> to vector<8x32xf32>
    %643 = vector.extract_strided_slice %625 {offsets = [32, 0], sizes = [32, 16], strides = [1, 1]} : vector<128x32xf32> to vector<32x16xf32>
    %cst_333 = arith.constant dense<0.000000e+00> : vector<8x16xf32>
    %644 = tpu.matmul %642, %643, %cst_333 {dimension_numbers = #tpu.dot_dimension_numbers<[1], [0], [0], [1], [0, 0, 1, 1], [], []>} : vector<8x32xf32>, vector<32x16xf32>, vector<8x16xf32> -> vector<8x16xf32>
    %cst_334 = arith.constant dense<0xFF800000> : vector<8xf32>
    %645 = vector.multi_reduction <maximumf>, %644, %cst_334 [1] : vector<8x16xf32> to vector<8xf32>
    %646 = vector.shape_cast %645 : vector<8xf32> to vector<8x1xf32>
    %647 = vector.broadcast %646 : vector<8x1xf32> to vector<8x16xf32>
    %648 = arith.subf %644, %647 : vector<8x16xf32>
    %649 = math.exp %648 : vector<8x16xf32>
    %cst_335 = arith.constant dense<0.000000e+00> : vector<8xf32>
    %650 = vector.multi_reduction <add>, %649, %cst_335 [1] : vector<8x16xf32> to vector<8xf32>
    %651 = vector.shape_cast %650 : vector<8xf32> to vector<8x1xf32>
    %652 = tpu.reciprocal %651 {approx = true} : vector<8x1xf32> -> vector<8x1xf32>
    %653 = vector.broadcast %652 : vector<8x1xf32> to vector<8x16xf32>
    %654 = arith.mulf %649, %653 : vector<8x16xf32>
    %655 = vector.extract_strided_slice %624 {offsets = [0, 32], sizes = [16, 32], strides = [1, 1]} : vector<32x128xf32> to vector<16x32xf32>
    %cst_336 = arith.constant dense<0.000000e+00> : vector<8x32xf32>
    %656 = tpu.matmul %654, %655, %cst_336 {dimension_numbers = #tpu.dot_dimension_numbers<[1], [0], [0], [1], [0, 0, 1, 1], [], []>} : vector<8x16xf32>, vector<16x32xf32>, vector<8x32xf32> -> vector<8x32xf32>
    %c0_337 = arith.constant 0 : index
    %c32_338 = arith.constant 32 : index
    %657 = vector.load %arg16[%c0_337, %c32_338] : memref<16x128xf32, #tpu.memory_space<vmem>>, vector<8x32xf32>
    tpu.vector_store %arg16[%c0_337, %c32_338], %656 {strides = array<i32>} : memref<16x128xf32, #tpu.memory_space<vmem>>, vector<8x32xf32>,
    %658 = vector.extract_strided_slice %608 {offsets = [0, 64], sizes = [8, 32], strides = [1, 1]} : vector<16x128xf32> to vector<8x32xf32>
    %659 = vector.extract_strided_slice %625 {offsets = [64, 0], sizes = [32, 16], strides = [1, 1]} : vector<128x32xf32> to vector<32x16xf32>
    %cst_339 = arith.constant dense<0.000000e+00> : vector<8x16xf32>
    %660 = tpu.matmul %658, %659, %cst_339 {dimension_numbers = #tpu.dot_dimension_numbers<[1], [0], [0], [1], [0, 0, 1, 1], [], []>} : vector<8x32xf32>, vector<32x16xf32>, vector<8x16xf32> -> vector<8x16xf32>
    %cst_340 = arith.constant dense<0xFF800000> : vector<8xf32>
    %661 = vector.multi_reduction <maximumf>, %660, %cst_340 [1] : vector<8x16xf32> to vector<8xf32>
    %662 = vector.shape_cast %661 : vector<8xf32> to vector<8x1xf32>
    %663 = vector.broadcast %662 : vector<8x1xf32> to vector<8x16xf32>
    %664 = arith.subf %660, %663 : vector<8x16xf32>
    %665 = math.exp %664 : vector<8x16xf32>
    %cst_341 = arith.constant dense<0.000000e+00> : vector<8xf32>
    %666 = vector.multi_reduction <add>, %665, %cst_341 [1] : vector<8x16xf32> to vector<8xf32>
    %667 = vector.shape_cast %666 : vector<8xf32> to vector<8x1xf32>
    %668 = tpu.reciprocal %667 {approx = true} : vector<8x1xf32> -> vector<8x1xf32>
    %669 = vector.broadcast %668 : vector<8x1xf32> to vector<8x16xf32>
    %670 = arith.mulf %665, %669 : vector<8x16xf32>
    %671 = vector.extract_strided_slice %624 {offsets = [0, 64], sizes = [16, 32], strides = [1, 1]} : vector<32x128xf32> to vector<16x32xf32>
    %cst_342 = arith.constant dense<0.000000e+00> : vector<8x32xf32>
    %672 = tpu.matmul %670, %671, %cst_342 {dimension_numbers = #tpu.dot_dimension_numbers<[1], [0], [0], [1], [0, 0, 1, 1], [], []>} : vector<8x16xf32>, vector<16x32xf32>, vector<8x32xf32> -> vector<8x32xf32>
    %c0_343 = arith.constant 0 : index
    %c64_344 = arith.constant 64 : index
    %673 = vector.load %arg16[%c0_343, %c64_344] : memref<16x128xf32, #tpu.memory_space<vmem>>, vector<8x32xf32>
    tpu.vector_store %arg16[%c0_343, %c64_344], %672 {strides = array<i32>} : memref<16x128xf32, #tpu.memory_space<vmem>>, vector<8x32xf32>,
    %674 = vector.extract_strided_slice %608 {offsets = [0, 96], sizes = [8, 32], strides = [1, 1]} : vector<16x128xf32> to vector<8x32xf32>
    %675 = vector.extract_strided_slice %625 {offsets = [96, 0], sizes = [32, 16], strides = [1, 1]} : vector<128x32xf32> to vector<32x16xf32>
    %cst_345 = arith.constant dense<0.000000e+00> : vector<8x16xf32>
    %676 = tpu.matmul %674, %675, %cst_345 {dimension_numbers = #tpu.dot_dimension_numbers<[1], [0], [0], [1], [0, 0, 1, 1], [], []>} : vector<8x32xf32>, vector<32x16xf32>, vector<8x16xf32> -> vector<8x16xf32>
    %cst_346 = arith.constant dense<0xFF800000> : vector<8xf32>
    %677 = vector.multi_reduction <maximumf>, %676, %cst_346 [1] : vector<8x16xf32> to vector<8xf32>
    %678 = vector.shape_cast %677 : vector<8xf32> to vector<8x1xf32>
    %679 = vector.broadcast %678 : vector<8x1xf32> to vector<8x16xf32>
    %680 = arith.subf %676, %679 : vector<8x16xf32>
    %681 = math.exp %680 : vector<8x16xf32>
    %cst_347 = arith.constant dense<0.000000e+00> : vector<8xf32>
    %682 = vector.multi_reduction <add>, %681, %cst_347 [1] : vector<8x16xf32> to vector<8xf32>
    %683 = vector.shape_cast %682 : vector<8xf32> to vector<8x1xf32>
    %684 = tpu.reciprocal %683 {approx = true} : vector<8x1xf32> -> vector<8x1xf32>
    %685 = vector.broadcast %684 : vector<8x1xf32> to vector<8x16xf32>
    %686 = arith.mulf %681, %685 : vector<8x16xf32>
    %687 = vector.extract_strided_slice %624 {offsets = [0, 96], sizes = [16, 32], strides = [1, 1]} : vector<32x128xf32> to vector<16x32xf32>
    %cst_348 = arith.constant dense<0.000000e+00> : vector<8x32xf32>
    %688 = tpu.matmul %686, %687, %cst_348 {dimension_numbers = #tpu.dot_dimension_numbers<[1], [0], [0], [1], [0, 0, 1, 1], [], []>} : vector<8x16xf32>, vector<16x32xf32>, vector<8x32xf32> -> vector<8x32xf32>
    %c0_349 = arith.constant 0 : index
    %c96_350 = arith.constant 96 : index
    %689 = vector.load %arg16[%c0_349, %c96_350] : memref<16x128xf32, #tpu.memory_space<vmem>>, vector<8x32xf32>
    tpu.vector_store %arg16[%c0_349, %c96_350], %688 {strides = array<i32>} : memref<16x128xf32, #tpu.memory_space<vmem>>, vector<8x32xf32>,
    %690 = vector.extract_strided_slice %608 {offsets = [8, 0], sizes = [8, 32], strides = [1, 1]} : vector<16x128xf32> to vector<8x32xf32>
    %691 = vector.extract_strided_slice %625 {offsets = [0, 16], sizes = [32, 16], strides = [1, 1]} : vector<128x32xf32> to vector<32x16xf32>
    %cst_351 = arith.constant dense<0.000000e+00> : vector<8x16xf32>
    %692 = tpu.matmul %690, %691, %cst_351 {dimension_numbers = #tpu.dot_dimension_numbers<[1], [0], [0], [1], [0, 0, 1, 1], [], []>} : vector<8x32xf32>, vector<32x16xf32>, vector<8x16xf32> -> vector<8x16xf32>
    %cst_352 = arith.constant dense<0xFF800000> : vector<8xf32>
    %693 = vector.multi_reduction <maximumf>, %692, %cst_352 [1] : vector<8x16xf32> to vector<8xf32>
    %694 = vector.shape_cast %693 : vector<8xf32> to vector<8x1xf32>
    %695 = vector.broadcast %694 : vector<8x1xf32> to vector<8x16xf32>
    %696 = arith.subf %692, %695 : vector<8x16xf32>
    %697 = math.exp %696 : vector<8x16xf32>
    %cst_353 = arith.constant dense<0.000000e+00> : vector<8xf32>
    %698 = vector.multi_reduction <add>, %697, %cst_353 [1] : vector<8x16xf32> to vector<8xf32>
    %699 = vector.shape_cast %698 : vector<8xf32> to vector<8x1xf32>
    %700 = tpu.reciprocal %699 {approx = true} : vector<8x1xf32> -> vector<8x1xf32>
    %701 = vector.broadcast %700 : vector<8x1xf32> to vector<8x16xf32>
    %702 = arith.mulf %697, %701 : vector<8x16xf32>
    %703 = vector.extract_strided_slice %624 {offsets = [16, 0], sizes = [16, 32], strides = [1, 1]} : vector<32x128xf32> to vector<16x32xf32>
    %cst_354 = arith.constant dense<0.000000e+00> : vector<8x32xf32>
    %704 = tpu.matmul %702, %703, %cst_354 {dimension_numbers = #tpu.dot_dimension_numbers<[1], [0], [0], [1], [0, 0, 1, 1], [], []>} : vector<8x16xf32>, vector<16x32xf32>, vector<8x32xf32> -> vector<8x32xf32>
    %c8_355 = arith.constant 8 : index
    %c0_356 = arith.constant 0 : index
    %705 = vector.load %arg16[%c8_355, %c0_356] : memref<16x128xf32, #tpu.memory_space<vmem>>, vector<8x32xf32>
    tpu.vector_store %arg16[%c8_355, %c0_356], %704 {strides = array<i32>} : memref<16x128xf32, #tpu.memory_space<vmem>>, vector<8x32xf32>,
    %706 = vector.extract_strided_slice %608 {offsets = [8, 32], sizes = [8, 32], strides = [1, 1]} : vector<16x128xf32> to vector<8x32xf32>
    %707 = vector.extract_strided_slice %625 {offsets = [32, 16], sizes = [32, 16], strides = [1, 1]} : vector<128x32xf32> to vector<32x16xf32>
    %cst_357 = arith.constant dense<0.000000e+00> : vector<8x16xf32>
    %708 = tpu.matmul %706, %707, %cst_357 {dimension_numbers = #tpu.dot_dimension_numbers<[1], [0], [0], [1], [0, 0, 1, 1], [], []>} : vector<8x32xf32>, vector<32x16xf32>, vector<8x16xf32> -> vector<8x16xf32>
    %cst_358 = arith.constant dense<0xFF800000> : vector<8xf32>
    %709 = vector.multi_reduction <maximumf>, %708, %cst_358 [1] : vector<8x16xf32> to vector<8xf32>
    %710 = vector.shape_cast %709 : vector<8xf32> to vector<8x1xf32>
    %711 = vector.broadcast %710 : vector<8x1xf32> to vector<8x16xf32>
    %712 = arith.subf %708, %711 : vector<8x16xf32>
    %713 = math.exp %712 : vector<8x16xf32>
    %cst_359 = arith.constant dense<0.000000e+00> : vector<8xf32>
    %714 = vector.multi_reduction <add>, %713, %cst_359 [1] : vector<8x16xf32> to vector<8xf32>
    %715 = vector.shape_cast %714 : vector<8xf32> to vector<8x1xf32>
    %716 = tpu.reciprocal %715 {approx = true} : vector<8x1xf32> -> vector<8x1xf32>
    %717 = vector.broadcast %716 : vector<8x1xf32> to vector<8x16xf32>
    %718 = arith.mulf %713, %717 : vector<8x16xf32>
    %719 = vector.extract_strided_slice %624 {offsets = [16, 32], sizes = [16, 32], strides = [1, 1]} : vector<32x128xf32> to vector<16x32xf32>
    %cst_360 = arith.constant dense<0.000000e+00> : vector<8x32xf32>
    %720 = tpu.matmul %718, %719, %cst_360 {dimension_numbers = #tpu.dot_dimension_numbers<[1], [0], [0], [1], [0, 0, 1, 1], [], []>} : vector<8x16xf32>, vector<16x32xf32>, vector<8x32xf32> -> vector<8x32xf32>
    %c8_361 = arith.constant 8 : index
    %c32_362 = arith.constant 32 : index
    %721 = vector.load %arg16[%c8_361, %c32_362] : memref<16x128xf32, #tpu.memory_space<vmem>>, vector<8x32xf32>
    tpu.vector_store %arg16[%c8_361, %c32_362], %720 {strides = array<i32>} : memref<16x128xf32, #tpu.memory_space<vmem>>, vector<8x32xf32>,
    %722 = vector.extract_strided_slice %608 {offsets = [8, 64], sizes = [8, 32], strides = [1, 1]} : vector<16x128xf32> to vector<8x32xf32>
    %723 = vector.extract_strided_slice %625 {offsets = [64, 16], sizes = [32, 16], strides = [1, 1]} : vector<128x32xf32> to vector<32x16xf32>
    %cst_363 = arith.constant dense<0.000000e+00> : vector<8x16xf32>
    %724 = tpu.matmul %722, %723, %cst_363 {dimension_numbers = #tpu.dot_dimension_numbers<[1], [0], [0], [1], [0, 0, 1, 1], [], []>} : vector<8x32xf32>, vector<32x16xf32>, vector<8x16xf32> -> vector<8x16xf32>
    %cst_364 = arith.constant dense<0xFF800000> : vector<8xf32>
    %725 = vector.multi_reduction <maximumf>, %724, %cst_364 [1] : vector<8x16xf32> to vector<8xf32>
    %726 = vector.shape_cast %725 : vector<8xf32> to vector<8x1xf32>
    %727 = vector.broadcast %726 : vector<8x1xf32> to vector<8x16xf32>
    %728 = arith.subf %724, %727 : vector<8x16xf32>
    %729 = math.exp %728 : vector<8x16xf32>
    %cst_365 = arith.constant dense<0.000000e+00> : vector<8xf32>
    %730 = vector.multi_reduction <add>, %729, %cst_365 [1] : vector<8x16xf32> to vector<8xf32>
    %731 = vector.shape_cast %730 : vector<8xf32> to vector<8x1xf32>
    %732 = tpu.reciprocal %731 {approx = true} : vector<8x1xf32> -> vector<8x1xf32>
    %733 = vector.broadcast %732 : vector<8x1xf32> to vector<8x16xf32>
    %734 = arith.mulf %729, %733 : vector<8x16xf32>
    %735 = vector.extract_strided_slice %624 {offsets = [16, 64], sizes = [16, 32], strides = [1, 1]} : vector<32x128xf32> to vector<16x32xf32>
    %cst_366 = arith.constant dense<0.000000e+00> : vector<8x32xf32>
    %736 = tpu.matmul %734, %735, %cst_366 {dimension_numbers = #tpu.dot_dimension_numbers<[1], [0], [0], [1], [0, 0, 1, 1], [], []>} : vector<8x16xf32>, vector<16x32xf32>, vector<8x32xf32> -> vector<8x32xf32>
    %c8_367 = arith.constant 8 : index
    %c64_368 = arith.constant 64 : index
    %737 = vector.load %arg16[%c8_367, %c64_368] : memref<16x128xf32, #tpu.memory_space<vmem>>, vector<8x32xf32>
    tpu.vector_store %arg16[%c8_367, %c64_368], %736 {strides = array<i32>} : memref<16x128xf32, #tpu.memory_space<vmem>>, vector<8x32xf32>,
    %738 = vector.extract_strided_slice %608 {offsets = [8, 96], sizes = [8, 32], strides = [1, 1]} : vector<16x128xf32> to vector<8x32xf32>
    %739 = vector.extract_strided_slice %625 {offsets = [96, 16], sizes = [32, 16], strides = [1, 1]} : vector<128x32xf32> to vector<32x16xf32>
    %cst_369 = arith.constant dense<0.000000e+00> : vector<8x16xf32>
    %740 = tpu.matmul %738, %739, %cst_369 {dimension_numbers = #tpu.dot_dimension_numbers<[1], [0], [0], [1], [0, 0, 1, 1], [], []>} : vector<8x32xf32>, vector<32x16xf32>, vector<8x16xf32> -> vector<8x16xf32>
    %cst_370 = arith.constant dense<0xFF800000> : vector<8xf32>
    %741 = vector.multi_reduction <maximumf>, %740, %cst_370 [1] : vector<8x16xf32> to vector<8xf32>
    %742 = vector.shape_cast %741 : vector<8xf32> to vector<8x1xf32>
    %743 = vector.broadcast %742 : vector<8x1xf32> to vector<8x16xf32>
    %744 = arith.subf %740, %743 : vector<8x16xf32>
    %745 = math.exp %744 : vector<8x16xf32>
    %cst_371 = arith.constant dense<0.000000e+00> : vector<8xf32>
    %746 = vector.multi_reduction <add>, %745, %cst_371 [1] : vector<8x16xf32> to vector<8xf32>
    %747 = vector.shape_cast %746 : vector<8xf32> to vector<8x1xf32>
    %748 = tpu.reciprocal %747 {approx = true} : vector<8x1xf32> -> vector<8x1xf32>
    %749 = vector.broadcast %748 : vector<8x1xf32> to vector<8x16xf32>
    %750 = arith.mulf %745, %749 : vector<8x16xf32>
    %751 = vector.extract_strided_slice %624 {offsets = [16, 96], sizes = [16, 32], strides = [1, 1]} : vector<32x128xf32> to vector<16x32xf32>
    %cst_372 = arith.constant dense<0.000000e+00> : vector<8x32xf32>
    %752 = tpu.matmul %750, %751, %cst_372 {dimension_numbers = #tpu.dot_dimension_numbers<[1], [0], [0], [1], [0, 0, 1, 1], [], []>} : vector<8x16xf32>, vector<16x32xf32>, vector<8x32xf32> -> vector<8x32xf32>
    %c8_373 = arith.constant 8 : index
    %c96_374 = arith.constant 96 : index
    %753 = vector.load %arg16[%c8_373, %c96_374] : memref<16x128xf32, #tpu.memory_space<vmem>>, vector<8x32xf32>
    tpu.vector_store %arg16[%c8_373, %c96_374], %752 {strides = array<i32>} : memref<16x128xf32, #tpu.memory_space<vmem>>, vector<8x32xf32>,
    %c0_375 = arith.constant 0 : index
    %c0_376 = arith.constant 0 : index
    %754 = vector.load %arg16[%c0_375, %c0_376] : memref<16x128xf32, #tpu.memory_space<vmem>>, vector<16x128xf32>
    %c1_377 = arith.constant 1 : index
    %c5_378 = arith.constant 5 : index
    %c0_379 = arith.constant 0 : index
    %c0_380 = arith.constant 0 : index
    %755 = vector.load %arg7[%c1_377, %c5_378, %c0_379, %c0_380] : memref<2x6x128x128xbf16, #tpu.memory_space<vmem>>, vector<1x1x128x128xbf16>
    %756 = vector.shape_cast %755 : vector<1x1x128x128xbf16> to vector<128x128xbf16>
    %757 = arith.truncf %754 : vector<16x128xf32> to vector<16x128xbf16>
    %cst_381 = arith.constant dense<0.000000e+00> : vector<16x128xf32>
    %758 = tpu.matmul %757, %756, %cst_381 {dimension_numbers = #tpu.dot_dimension_numbers<[1], [0], [0], [1], [0, 0, 1, 1], [], []>} : vector<16x128xbf16>, vector<128x128xbf16>, vector<16x128xf32> -> vector<16x128xf32>
    %c1_382 = arith.constant 1 : index
    %c5_383 = arith.constant 5 : index
    %c0_384 = arith.constant 0 : index
    %c0_385 = arith.constant 0 : index
    %759 = vector.load %arg8[%c1_382, %c5_383, %c0_384, %c0_385] : memref<2x6x1x128xf32, #tpu.memory_space<vmem>>, vector<1x1x1x128xf32>
    %760 = vector.shape_cast %759 : vector<1x1x1x128xf32> to vector<1x128xf32>
    %761 = vector.broadcast %760 : vector<1x128xf32> to vector<16x128xf32>
    %762 = arith.addf %758, %761 : vector<16x128xf32>
    %763 = arith.addf %599, %762 : vector<16x128xf32>
    %c1_386 = arith.constant 1 : index
    %c1_387 = arith.constant 1 : index
    %c0_388 = arith.constant 0 : index
    %c0_389 = arith.constant 0 : index
    %764 = vector.load %arg13[%c1_386, %c1_387, %c0_388, %c0_389] : memref<2x3x1x128xf32, #tpu.memory_space<vmem>>, vector<1x1x1x128xf32>
    %765 = vector.shape_cast %764 : vector<1x1x1x128xf32> to vector<1x128xf32>
    %c1_390 = arith.constant 1 : index
    %c1_391 = arith.constant 1 : index
    %c0_392 = arith.constant 0 : index
    %c0_393 = arith.constant 0 : index
    %766 = vector.load %arg14[%c1_390, %c1_391, %c0_392, %c0_393] : memref<2x3x1x128xf32, #tpu.memory_space<vmem>>, vector<1x1x1x128xf32>
    %767 = vector.shape_cast %766 : vector<1x1x1x128xf32> to vector<1x128xf32>
    %cst_394 = arith.constant dense<0.000000e+00> : vector<16xf32>
    %768 = vector.multi_reduction <add>, %763, %cst_394 [1] : vector<16x128xf32> to vector<16xf32>
    %769 = vector.shape_cast %768 : vector<16xf32> to vector<16x1xf32>
    %cst_395 = arith.constant 1.280000e+02 : f32
    %770 = vector.broadcast %cst_395 : f32 to vector<16x1xf32>
    %771 = arith.divf %769, %770 : vector<16x1xf32>
    %772 = vector.broadcast %771 : vector<16x1xf32> to vector<16x128xf32>
    %773 = arith.subf %763, %772 : vector<16x128xf32>
    %774 = arith.mulf %773, %773 : vector<16x128xf32>
    %cst_396 = arith.constant dense<0.000000e+00> : vector<16xf32>
    %775 = vector.multi_reduction <add>, %774, %cst_396 [1] : vector<16x128xf32> to vector<16xf32>
    %776 = vector.shape_cast %775 : vector<16xf32> to vector<16x1xf32>
    %cst_397 = arith.constant 1.280000e+02 : f32
    %777 = vector.broadcast %cst_397 : f32 to vector<16x1xf32>
    %778 = arith.divf %776, %777 : vector<16x1xf32>
    %cst_398 = arith.constant 9.99999974E-6 : f32
    %779 = vector.broadcast %cst_398 : f32 to vector<16x1xf32>
    %780 = arith.addf %778, %779 : vector<16x1xf32>
    %781 = math.rsqrt %780 : vector<16x1xf32>
    %782 = vector.broadcast %781 : vector<16x1xf32> to vector<16x128xf32>
    %783 = arith.mulf %773, %782 : vector<16x128xf32>
    %784 = vector.broadcast %765 : vector<1x128xf32> to vector<16x128xf32>
    %785 = arith.mulf %783, %784 : vector<16x128xf32>
    %786 = vector.broadcast %767 : vector<1x128xf32> to vector<16x128xf32>
    %787 = arith.addf %785, %786 : vector<16x128xf32>
    %c1_399 = arith.constant 1 : index
    %c0_400 = arith.constant 0 : index
    %c0_401 = arith.constant 0 : index
    %788 = vector.load %arg9[%c1_399, %c0_400, %c0_401] : memref<2x128x256xbf16, #tpu.memory_space<vmem>>, vector<1x128x256xbf16>
    %789 = vector.shape_cast %788 : vector<1x128x256xbf16> to vector<128x256xbf16>
    %790 = arith.truncf %787 : vector<16x128xf32> to vector<16x128xbf16>
    %cst_402 = arith.constant dense<0.000000e+00> : vector<16x256xf32>
    %791 = tpu.matmul %790, %789, %cst_402 {dimension_numbers = #tpu.dot_dimension_numbers<[1], [0], [0], [1], [0, 0, 1, 1], [], []>} : vector<16x128xbf16>, vector<128x256xbf16>, vector<16x256xf32> -> vector<16x256xf32>
    %c1_403 = arith.constant 1 : index
    %c0_404 = arith.constant 0 : index
    %c0_405 = arith.constant 0 : index
    %792 = vector.load %arg10[%c1_403, %c0_404, %c0_405] : memref<2x1x256xf32, #tpu.memory_space<vmem>>, vector<1x1x256xf32>
    %793 = vector.shape_cast %792 : vector<1x1x256xf32> to vector<1x256xf32>
    %794 = vector.broadcast %793 : vector<1x256xf32> to vector<16x256xf32>
    %795 = arith.addf %791, %794 : vector<16x256xf32>
    %cst_406 = arith.constant 0.000000e+00 : f32
    %796 = vector.broadcast %cst_406 : f32 to vector<16x256xf32>
    %797 = arith.maximumf %795, %796 : vector<16x256xf32>
    %c1_407 = arith.constant 1 : index
    %c0_408 = arith.constant 0 : index
    %c0_409 = arith.constant 0 : index
    %798 = vector.load %arg11[%c1_407, %c0_408, %c0_409] : memref<2x256x128xbf16, #tpu.memory_space<vmem>>, vector<1x256x128xbf16>
    %799 = vector.shape_cast %798 : vector<1x256x128xbf16> to vector<256x128xbf16>
    %800 = arith.truncf %797 : vector<16x256xf32> to vector<16x256xbf16>
    %cst_410 = arith.constant dense<0.000000e+00> : vector<16x128xf32>
    %801 = tpu.matmul %800, %799, %cst_410 {dimension_numbers = #tpu.dot_dimension_numbers<[1], [0], [0], [1], [0, 0, 1, 1], [], []>} : vector<16x256xbf16>, vector<256x128xbf16>, vector<16x128xf32> -> vector<16x128xf32>
    %c1_411 = arith.constant 1 : index
    %c0_412 = arith.constant 0 : index
    %c0_413 = arith.constant 0 : index
    %802 = vector.load %arg12[%c1_411, %c0_412, %c0_413] : memref<2x1x128xf32, #tpu.memory_space<vmem>>, vector<1x1x128xf32>
    %803 = vector.shape_cast %802 : vector<1x1x128xf32> to vector<1x128xf32>
    %804 = vector.broadcast %803 : vector<1x128xf32> to vector<16x128xf32>
    %805 = arith.addf %801, %804 : vector<16x128xf32>
    %806 = arith.addf %787, %805 : vector<16x128xf32>
    %c1_414 = arith.constant 1 : index
    %c2_415 = arith.constant 2 : index
    %c0_416 = arith.constant 0 : index
    %c0_417 = arith.constant 0 : index
    %807 = vector.load %arg13[%c1_414, %c2_415, %c0_416, %c0_417] : memref<2x3x1x128xf32, #tpu.memory_space<vmem>>, vector<1x1x1x128xf32>
    %808 = vector.shape_cast %807 : vector<1x1x1x128xf32> to vector<1x128xf32>
    %c1_418 = arith.constant 1 : index
    %c2_419 = arith.constant 2 : index
    %c0_420 = arith.constant 0 : index
    %c0_421 = arith.constant 0 : index
    %809 = vector.load %arg14[%c1_418, %c2_419, %c0_420, %c0_421] : memref<2x3x1x128xf32, #tpu.memory_space<vmem>>, vector<1x1x1x128xf32>
    %810 = vector.shape_cast %809 : vector<1x1x1x128xf32> to vector<1x128xf32>
    %cst_422 = arith.constant dense<0.000000e+00> : vector<16xf32>
    %811 = vector.multi_reduction <add>, %806, %cst_422 [1] : vector<16x128xf32> to vector<16xf32>
    %812 = vector.shape_cast %811 : vector<16xf32> to vector<16x1xf32>
    %cst_423 = arith.constant 1.280000e+02 : f32
    %813 = vector.broadcast %cst_423 : f32 to vector<16x1xf32>
    %814 = arith.divf %812, %813 : vector<16x1xf32>
    %815 = vector.broadcast %814 : vector<16x1xf32> to vector<16x128xf32>
    %816 = arith.subf %806, %815 : vector<16x128xf32>
    %817 = arith.mulf %816, %816 : vector<16x128xf32>
    %cst_424 = arith.constant dense<0.000000e+00> : vector<16xf32>
    %818 = vector.multi_reduction <add>, %817, %cst_424 [1] : vector<16x128xf32> to vector<16xf32>
    %819 = vector.shape_cast %818 : vector<16xf32> to vector<16x1xf32>
    %cst_425 = arith.constant 1.280000e+02 : f32
    %820 = vector.broadcast %cst_425 : f32 to vector<16x1xf32>
    %821 = arith.divf %819, %820 : vector<16x1xf32>
    %cst_426 = arith.constant 9.99999974E-6 : f32
    %822 = vector.broadcast %cst_426 : f32 to vector<16x1xf32>
    %823 = arith.addf %821, %822 : vector<16x1xf32>
    %824 = math.rsqrt %823 : vector<16x1xf32>
    %825 = vector.broadcast %824 : vector<16x1xf32> to vector<16x128xf32>
    %826 = arith.mulf %816, %825 : vector<16x128xf32>
    %827 = vector.broadcast %808 : vector<1x128xf32> to vector<16x128xf32>
    %828 = arith.mulf %826, %827 : vector<16x128xf32>
    %829 = vector.broadcast %810 : vector<1x128xf32> to vector<16x128xf32>
    %830 = arith.addf %828, %829 : vector<16x128xf32>
    %c0_427 = arith.constant 0 : index
    %c0_428 = arith.constant 0 : index
    %831 = vector.load %arg15[%c0_427, %c0_428] : memref<16x128xf32, #tpu.memory_space<vmem>>, vector<16x128xf32>
    tpu.vector_store %arg15[%c0_427, %c0_428], %830 {strides = array<i32>} : memref<16x128xf32, #tpu.memory_space<vmem>>, vector<16x128xf32>,
    return
  }
  func.func @transform_0(%arg0: i32) -> (i32, i32) {
    %c0_i32 = arith.constant 0 : i32
    %c0_i32_0 = arith.constant 0 : i32
    %c0_i32_1 = arith.constant 0 : i32
    return %c0_i32, %c0_i32_0 : i32, i32
  }
  func.func @transform_1(%arg0: i32) -> (i32, i32) {
    %c0_i32 = arith.constant 0 : i32
    %c0_i32_0 = arith.constant 0 : i32
    %c0_i32_1 = arith.constant 0 : i32
    return %c0_i32, %c0_i32_0 : i32, i32
  }
  func.func @transform_2(%arg0: i32) -> (i32, i32) {
    %c0_i32 = arith.constant 0 : i32
    %c0_i32_0 = arith.constant 0 : i32
    %c0_i32_1 = arith.constant 0 : i32
    return %c0_i32, %c0_i32_0 : i32, i32
  }
  func.func @transform_3(%arg0: i32) -> (i32, i32) {
    %c0_i32 = arith.constant 0 : i32
    %c0_i32_0 = arith.constant 0 : i32
    %c0_i32_1 = arith.constant 0 : i32
    return %c0_i32, %c0_i32_0 : i32, i32
  }
  func.func @transform_4(%arg0: i32) -> (i32, i32, i32) {
    %c0_i32 = arith.constant 0 : i32
    %c0_i32_0 = arith.constant 0 : i32
    %c0_i32_1 = arith.constant 0 : i32
    %c0_i32_2 = arith.constant 0 : i32
    return %c0_i32, %c0_i32_0, %c0_i32_1 : i32, i32, i32
  }
  func.func @transform_5(%arg0: i32) -> (i32, i32, i32) {
    %c0_i32 = arith.constant 0 : i32
    %c0_i32_0 = arith.constant 0 : i32
    %c0_i32_1 = arith.constant 0 : i32
    %c0_i32_2 = arith.constant 0 : i32
    return %c0_i32, %c0_i32_0, %c0_i32_1 : i32, i32, i32
  }
  func.func @transform_6(%arg0: i32) -> (i32, i32, i32, i32) {
    %c0_i32 = arith.constant 0 : i32
    %c0_i32_0 = arith.constant 0 : i32
    %c0_i32_1 = arith.constant 0 : i32
    %c0_i32_2 = arith.constant 0 : i32
    %c0_i32_3 = arith.constant 0 : i32
    return %c0_i32, %c0_i32_0, %c0_i32_1, %c0_i32_2 : i32, i32, i32, i32
  }
  func.func @transform_7(%arg0: i32) -> (i32, i32, i32, i32) {
    %c0_i32 = arith.constant 0 : i32
    %c0_i32_0 = arith.constant 0 : i32
    %c0_i32_1 = arith.constant 0 : i32
    %c0_i32_2 = arith.constant 0 : i32
    %c0_i32_3 = arith.constant 0 : i32
    return %c0_i32, %c0_i32_0, %c0_i32_1, %c0_i32_2 : i32, i32, i32, i32
  }
  func.func @transform_8(%arg0: i32) -> (i32, i32, i32) {
    %c0_i32 = arith.constant 0 : i32
    %c0_i32_0 = arith.constant 0 : i32
    %c0_i32_1 = arith.constant 0 : i32
    %c0_i32_2 = arith.constant 0 : i32
    return %c0_i32, %c0_i32_0, %c0_i32_1 : i32, i32, i32
  }
  func.func @transform_9(%arg0: i32) -> (i32, i32, i32) {
    %c0_i32 = arith.constant 0 : i32
    %c0_i32_0 = arith.constant 0 : i32
    %c0_i32_1 = arith.constant 0 : i32
    %c0_i32_2 = arith.constant 0 : i32
    return %c0_i32, %c0_i32_0, %c0_i32_1 : i32, i32, i32
  }
  func.func @transform_10(%arg0: i32) -> (i32, i32, i32) {
    %c0_i32 = arith.constant 0 : i32
    %c0_i32_0 = arith.constant 0 : i32
    %c0_i32_1 = arith.constant 0 : i32
    %c0_i32_2 = arith.constant 0 : i32
    return %c0_i32, %c0_i32_0, %c0_i32_1 : i32, i32, i32
  }
  func.func @transform_11(%arg0: i32) -> (i32, i32, i32) {
    %c0_i32 = arith.constant 0 : i32
    %c0_i32_0 = arith.constant 0 : i32
    %c0_i32_1 = arith.constant 0 : i32
    %c0_i32_2 = arith.constant 0 : i32
    return %c0_i32, %c0_i32_0, %c0_i32_1 : i32, i32, i32
  }
  func.func @transform_12(%arg0: i32) -> (i32, i32, i32, i32) {
    %c0_i32 = arith.constant 0 : i32
    %c0_i32_0 = arith.constant 0 : i32
    %c0_i32_1 = arith.constant 0 : i32
    %c0_i32_2 = arith.constant 0 : i32
    %c0_i32_3 = arith.constant 0 : i32
    return %c0_i32, %c0_i32_0, %c0_i32_1, %c0_i32_2 : i32, i32, i32, i32
  }
  func.func @transform_13(%arg0: i32) -> (i32, i32, i32, i32) {
    %c0_i32 = arith.constant 0 : i32
    %c0_i32_0 = arith.constant 0 : i32
    %c0_i32_1 = arith.constant 0 : i32
    %c0_i32_2 = arith.constant 0 : i32
    %c0_i32_3 = arith.constant 0 : i32
    return %c0_i32, %c0_i32_0, %c0_i32_1, %c0_i32_2 : i32, i32, i32, i32
  }
  func.func @transform_14(%arg0: i32) -> (i32, i32) {
    %c0_i32 = arith.constant 0 : i32
    %c0_i32_0 = arith.constant 0 : i32
    %c0_i32_1 = arith.constant 0 : i32
    return %c0_i32, %c0_i32_0 : i32, i32
  }
}

</mosaic_0001>

<bundles_post_ra>
// kernel: transformer_decoder_forward.1
= control target key start
LH: loop header
LB: loop body
LE: loop exit
PB: predicated region body
PF: predicated region fallthrough
CT: control target
= control target key end

     0   :  { %19 = vsyncpa [#allocation4], 0  ;;  %s11701_s0 = inlined_call_operand.hbm [shape: f32[16,128], index: 0, kind: input, shape index: {}]   ;;  %s11702_s1 = inlined_call_operand.hbm [shape: f32[32,128], index: 1, kind: input, shape index: {}]   ;;  %s11703_s2 = inlined_call_operand.hbm [shape: f32[32,128], index: 2, kind: input, shape index: {}]   ;;  %s11704_s3 = inlined_call_operand.vmem [shape: f32[16,128], index: 3, kind: input, shape index: {}]   ;;  %s11705_s4 = inlined_call_operand.hbm [shape: bf16[2,128,256], index: 4, kind: input, shape index: {}]   ;;  %s11706_s5 = inlined_call_operand.hbm [shape: f32[2,1,256], index: 5, kind: input, shape index: {}]   ;;  %s11707_s6 = inlined_call_operand.hbm [shape: bf16[2,6,128,128], index: 6, kind: input, shape index: {}]   ;;  %s11708_s7 = inlined_call_operand.vmem [shape: f32[2,6,1,128], index: 7, kind: input, shape index: {}]   ;;  %s11709_s8 = inlined_call_operand.hbm [shape: bf16[2,128,256], index: 8, kind: input, shape index: {}]   ;;  %s11710_s9 = inlined_call_operand.vmem [shape: f32[2,1,256], index: 9, kind: input, shape index: {}]   ;;  %s11711_s10 = inlined_call_operand.hbm [shape: bf16[2,256,128], index: 10, kind: input, shape index: {}]   ;;  %s11712_s11 = inlined_call_operand.vmem [shape: f32[2,1,128], index: 11, kind: input, shape index: {}]   ;;  %s11713_s12 = inlined_call_operand.vmem [shape: f32[2,3,1,128], index: 12, kind: input, shape index: {}]   ;;  %s11714_s13 = inlined_call_operand.vmem [shape: f32[2,3,1,128], index: 13, kind: input, shape index: {}]   ;;  %s11715_s14 = inlined_call_operand.hbm [shape: f32[16,128], index: 14, kind: output, shape index: {}]  }
   0x1   :  { %20 = vsyncpa [#allocation7], 0 }
   0x2   :  { %21 = vsyncpa [#allocation10], 0 }
   0x3   :  { %22 = vsyncpa [#allocation13], 0 }
   0x4   :  { %23 = vsyncpa [#allocation16], 0 }
   0x5   :  { %24 = vsyncpa [#allocation5], 0  ;;  %s10483_s29 = smov [#allocation6]   ;;  %s10484_s15 = smov [#allocation9]  }
   0x6   :  { %s42_s30 = sshll.u32 %s10483_s29, 4  ;;  %s68_s16 = sshll.u32 %s10484_s15, 4  ;;  %s43_s30 = int_to_ptr.vmem [resolvable:$true] %s42_s30  ;;  %s10578_s16 = int_to_ptr.vmem [resolvable:$true] %s68_s16 }
   0x7   :  { %s10273_s19 = scalar_lea.hbm %s11702_s1, 512 }
   0x8   :  { %p10274_p0 = scmp.ne.s32.totalorder %s11702_s1, %s10273_s19  ;;  %p10277_p1 = scmp.lt.u32.totalorder %s10273_s19, %s11702_s1 }
   0xa   :  { %p10279_p2 = pnand %p10277_p1, %p10274_p0 }
   0xc   :  { %10282 = shalt.err (!%p10279_p2)
}
   0xd   :  { %s10283_s24 = scalar_lea.vmem %s43_s30, 512  ;;  %p10288_p4 = scmp.lt.s32.totalorder %s43_s30, %s43_s30 }
   0xe   :  { %p10284_p3 = scmp.ne.s32.totalorder %s43_s30, %s10283_s24  ;;  %p10289_p5 = scmp.lt.s32.totalorder %s10283_s24, %s10283_s24 }
  0x10   :  { %p10290_p6 = por %p10289_p5, %p10288_p4 }
  0x12   :  { %p10291_p7 = pnand %p10290_p6, %p10284_p3 }
  0x14   :  { %10294 = shalt.err (!%p10291_p7)
}
  0x15   :  { %s10485_s25 = smov 128   ;;  %s10486_s26 = smov 8  }
  0x16   :  { %48 = dma.hbm_to_vmem [thread:$0]  %s11702_s1, 512, %s43_s30, [#allocation7], %s10485_s25, %s10485_s25, %s10486_s26  }
  0x17   :  { %s10295_s17 = scalar_lea.hbm %s11705_s4, 4096 }
  0x18   :  { %p10296_p8 = scmp.ne.s32.totalorder %s11705_s4, %s10295_s17  ;;  %p10299_p9 = scmp.lt.u32.totalorder %s10295_s17, %s11705_s4 }
  0x1a   :  { %p10301_p10 = pnand %p10299_p9, %p10296_p8 }
  0x1c   :  { %10304 = shalt.err (!%p10301_p10)
}
  0x1d   :  { %s10305_s22 = scalar_lea.vmem %s10578_s16, 4096  ;;  %p10310_p12 = scmp.lt.s32.totalorder %s10578_s16, %s10578_s16 }
  0x1e   :  { %p10306_p11 = scmp.ne.s32.totalorder %s10578_s16, %s10305_s22  ;;  %p10311_p13 = scmp.lt.s32.totalorder %s10305_s22, %s10305_s22 }
  0x20   :  { %p10312_p0 = por %p10311_p13, %p10310_p12 }
  0x22   :  { %p10313_p1 = pnand %p10312_p0, %p10306_p11 }
  0x24   :  { %10316 = shalt.err (!%p10313_p1)
}
  0x25   :  { %74 = dma.hbm_to_vmem [thread:$0]  %s11705_s4, 4096, %s10578_s16, [#allocation10], %s10485_s25, %s10485_s25, %s10486_s26  }
  0x26   :  { %s10487_s23 = smov [#allocation12]   ;;  %s10317_s29 = scalar_lea.hbm %s11707_s6, 12288 }
  0x27   :  { %s92_s24 = sshll.u32 %s10487_s23, 4  ;;  %p10318_p2 = scmp.ne.s32.totalorder %s11707_s6, %s10317_s29  ;;  %s93_s24 = int_to_ptr.vmem [resolvable:$true] %s92_s24 }
  0x28   :  { %p10321_p3 = scmp.lt.u32.totalorder %s10317_s29, %s11707_s6 }
  0x2a   :  { %p10323_p4 = pnand %p10321_p3, %p10318_p2 }
  0x2c   :  { %10326 = shalt.err (!%p10323_p4)
}
  0x2d   :  { %s10327_s20 = scalar_lea.vmem %s93_s24, 12288  ;;  %p10332_p6 = scmp.lt.s32.totalorder %s93_s24, %s93_s24 }
  0x2e   :  { %p10328_p5 = scmp.ne.s32.totalorder %s93_s24, %s10327_s20  ;;  %p10333_p7 = scmp.lt.s32.totalorder %s10327_s20, %s10327_s20 }
  0x30   :  { %p10334_p8 = por %p10333_p7, %p10332_p6 }
  0x32   :  { %p10335_p9 = pnand %p10334_p8, %p10328_p5 }
  0x34   :  { %10338 = shalt.err (!%p10335_p9)
}
  0x35   :  { %s10488_s4 = smov 64   ;;  %s10489_s16 = smov 4  }
  0x36   :  { %98 = dma.hbm_to_vmem [thread:$0]  %s11707_s6, 12288, %s93_s24, [#allocation13], %s10488_s4, %s10488_s4, %s10489_s16  }
  0x37   :  { %s10490_s1 = smov [#allocation3]   ;;  %s10491_s23 = smov [#allocation8]  }
  0x38   :  { %s30_s30 = sshll.u32 %s10490_s1, 4  ;;  %s54_s27 = sshll.u32 %s10491_s23, 4  ;;  %s31_s30 = int_to_ptr.vmem [resolvable:$true] %s30_s30  ;;  %s55_s27 = int_to_ptr.vmem [resolvable:$true] %s54_s27 }
  0x39   :  { %s10339_s15 = scalar_lea.hbm %s11701_s0, 256 }
  0x3a   :  { %p10340_p10 = scmp.ne.s32.totalorder %s11701_s0, %s10339_s15  ;;  %p10343_p11 = scmp.lt.u32.totalorder %s10339_s15, %s11701_s0 }
  0x3c   :  { %p10345_p12 = pnand %p10343_p11, %p10340_p10 }
  0x3e   :  { %10348 = shalt.err (!%p10345_p12)
}
  0x3f   :  { %s10349_s6 = scalar_lea.vmem %s31_s30, 256  ;;  %p10354_p0 = scmp.lt.s32.totalorder %s31_s30, %s31_s30 }
  0x40   :  { %p10350_p13 = scmp.ne.s32.totalorder %s31_s30, %s10349_s6  ;;  %p10355_p1 = scmp.lt.s32.totalorder %s10349_s6, %s10349_s6 }
  0x42   :  { %p10356_p2 = por %p10355_p1, %p10354_p0 }
  0x44   :  { %p10357_p3 = pnand %p10356_p2, %p10350_p13 }
  0x46   :  { %10360 = shalt.err (!%p10357_p3)
}
  0x47   :  { %36 = dma.hbm_to_vmem [thread:$0]  %s11701_s0, 256, %s31_s30, [#allocation4], %s10485_s25, %s10485_s25, %s10486_s26  }
  0x48   :  { %s10361_s23 = scalar_lea.hbm %s11703_s2, 512 }
  0x49   :  { %p10362_p4 = scmp.ne.s32.totalorder %s11703_s2, %s10361_s23  ;;  %p10365_p5 = scmp.lt.u32.totalorder %s10361_s23, %s11703_s2 }
  0x4b   :  { %p10367_p6 = pnand %p10365_p5, %p10362_p4 }
  0x4d   :  { %10370 = shalt.err (!%p10367_p6)
}
  0x4e   :  { %s10371_s18 = scalar_lea.vmem %s55_s27, 512  ;;  %p10376_p8 = scmp.lt.s32.totalorder %s55_s27, %s55_s27 }
  0x4f   :  { %p10372_p7 = scmp.ne.s32.totalorder %s55_s27, %s10371_s18  ;;  %p10377_p9 = scmp.lt.s32.totalorder %s10371_s18, %s10371_s18 }
  0x51   :  { %p10378_p10 = por %p10377_p9, %p10376_p8 }
  0x53   :  { %p10379_p11 = pnand %p10378_p10, %p10372_p7 }
  0x55   :  { %10382 = shalt.err (!%p10379_p11)
}
  0x56   :  { %60 = dma.hbm_to_vmem [thread:$0]  %s11703_s2, 512, %s55_s27, [#allocation7], %s10485_s25, %s10485_s25, %s10486_s26  }
  0x57   :  { %s10492_s19 = smov [#allocation11]   ;;  %s10383_s21 = scalar_lea.hbm %s11706_s5, 64 }
  0x58   :  { %s80_s20 = sshll.u32 %s10492_s19, 4  ;;  %p10384_p12 = scmp.ne.s32.totalorder %s11706_s5, %s10383_s21  ;;  %s81_s20 = int_to_ptr.vmem [resolvable:$true] %s80_s20 }
  0x59   :  { %p10387_p13 = scmp.lt.u32.totalorder %s10383_s21, %s11706_s5 }
  0x5b   :  { %p10389_p0 = pnand %p10387_p13, %p10384_p12 }
  0x5d   :  { %10392 = shalt.err (!%p10389_p0)
}
  0x5e   :  { %s10393_s29 = scalar_lea.vmem %s81_s20, 64  ;;  %p10398_p2 = scmp.lt.s32.totalorder %s81_s20, %s81_s20 }
  0x5f   :  { %p10394_p1 = scmp.ne.s32.totalorder %s81_s20, %s10393_s29  ;;  %p10399_p3 = scmp.lt.s32.totalorder %s10393_s29, %s10393_s29 }
  0x61   :  { %p10400_p4 = por %p10399_p3, %p10398_p2 }
  0x63   :  { %p10401_p5 = pnand %p10400_p4, %p10394_p1 }
  0x65   :  { %10404 = shalt.err (!%p10401_p5)
}
  0x66   :  { %s10493_s2 = smov 32   ;;  %s10494_s27 = smov 2  }
  0x67   :  { %86 = dma.hbm_to_vmem [thread:$0]  %s11706_s5, 64, %s81_s20, [#allocation10], %s10493_s2, %s10493_s2, %s10494_s27  }
  0x68   :  { %s10495_s18 = smov [#allocation14]   ;;  %s10496_s30 = smov [#allocation15]  }
  0x69   :  { %s106_s0 = sshll.u32 %s10495_s18, 4  ;;  %s120_s19 = sshll.u32 %s10496_s30, 4  ;;  %s107_s0 = int_to_ptr.vmem [resolvable:$true] %s106_s0  ;;  %s10674_s19 = int_to_ptr.vmem [resolvable:$true] %s120_s19 }
  0x6a   :  { %s10405_s21 = scalar_lea.hbm %s11709_s8, 4096 }
  0x6b   :  { %p10406_p6 = scmp.ne.s32.totalorder %s11709_s8, %s10405_s21  ;;  %p10409_p7 = scmp.lt.u32.totalorder %s10405_s21, %s11709_s8 }
  0x6d   :  { %p10411_p8 = pnand %p10409_p7, %p10406_p6 }
  0x6f   :  { %10414 = shalt.err (!%p10411_p8)
}
  0x70   :  { %s10415_s5 = scalar_lea.vmem %s107_s0, 4096  ;;  %p10420_p10 = scmp.lt.s32.totalorder %s107_s0, %s107_s0 }
  0x71   :  { %p10416_p9 = scmp.ne.s32.totalorder %s107_s0, %s10415_s5  ;;  %p10421_p11 = scmp.lt.s32.totalorder %s10415_s5, %s10415_s5 }
  0x73   :  { %p10422_p12 = por %p10421_p11, %p10420_p10 }
  0x75   :  { %p10423_p13 = pnand %p10422_p12, %p10416_p9 }
  0x77   :  { %10426 = shalt.err (!%p10423_p13)
}
  0x78   :  { %112 = dma.hbm_to_vmem [thread:$0]  %s11709_s8, 4096, %s107_s0, [#allocation13], %s10485_s25, %s10485_s25, %s10486_s26  }
  0x79   :  { %s10427_s17 = scalar_lea.hbm %s11711_s10, 4096 }
  0x7a   :  { %p10428_p0 = scmp.ne.s32.totalorder %s11711_s10, %s10427_s17  ;;  %p10431_p1 = scmp.lt.u32.totalorder %s10427_s17, %s11711_s10 }
  0x7c   :  { %p10433_p2 = pnand %p10431_p1, %p10428_p0 }
  0x7e   :  { %10436 = shalt.err (!%p10433_p2)
}
  0x7f   :  { %s10437_s21 = scalar_lea.vmem %s10674_s19, 4096  ;;  %p10442_p4 = scmp.lt.s32.totalorder %s10674_s19, %s10674_s19 }
  0x80   :  { %p10438_p3 = scmp.ne.s32.totalorder %s10674_s19, %s10437_s21  ;;  %p10443_p5 = scmp.lt.s32.totalorder %s10437_s21, %s10437_s21 }
  0x82   :  { %p10444_p6 = por %p10443_p5, %p10442_p4 }
  0x84   :  { %p10445_p7 = pnand %p10444_p6, %p10438_p3 }
  0x86   :  { %10448 = shalt.err (!%p10445_p7)
}
  0x87   :  { %126 = dma.hbm_to_vmem [thread:$0]  %s11711_s10, 4096, %s10674_s19, [#allocation16], %s10488_s4, %s10488_s4, %s10489_s16  }
  0x88   :  { %10471 = dma.done.wait [#allocation4], 256  }
  0x89   :  { %10472 = vsyncadd [#allocation4], 4294967040 }
  0x8a   :  { %10473 = dma.done.wait [#allocation7], 1024  }
  0x8b   :  { %10474 = vsyncadd [#allocation7], 4294966272 }
  0x8c   :  { %10475 = dma.done.wait [#allocation10], 4160  }
  0x8d   :  { %10476 = vsyncadd [#allocation10], 4294963136 }
  0x8e   :  { %10477 = dma.done.wait [#allocation13], 16384  }
  0x8f   :  { %10478 = vsyncadd [#allocation13], 4294950912 }
  0x90   :  { %10479 = dma.done.wait [#allocation16], 4096  }
  0x91   :  { %10480 = vsyncadd [#allocation16], 4294963200  ;;  %v10497_v0 = vmov 0   ;;  %v9891_v1 = vld [vmem:[#allocation9 + $0x4] ss:$8 sps:$4 sm:$0xff]   ;;  %v10712_v15 = vld [vmem:[#allocation3] sm:$0xff]  ;;  %v195_v25 = vlaneseq }
  0x92   :  { %317 = vmatprep.mubr.bf16.mxu0 %v10497_v0  ;;  %v9893_v2 = vld [vmem:[#allocation9] ss:$8 sps:$4 sm:$0xff]   ;;  %285 = vmatprep.subr.bf16.mxu0 %v9891_v1  ;;  %v9894_v3 = vld [vmem:[#allocation9 + $0x14] ss:$8 sps:$4 sm:$0xff]   ;;  %v9896_v4 = vld [vmem:[#allocation9 + $0x10] ss:$8 sps:$4 sm:$0xff]  }
  0x93   :  { %286 = vmatpush1.bf16.msra.mxu0 %v9893_v2  ;;  %v9897_v5 = vld [vmem:[#allocation9 + $0x24] ss:$8 sps:$4 sm:$0xff]   ;;  %v9899_v6 = vld [vmem:[#allocation9 + $0x20] ss:$8 sps:$4 sm:$0xff]   ;;  %v9900_v7 = vld [vmem:[#allocation9 + $0x34] ss:$8 sps:$4 sm:$0xff]  }
  0x94   :  { %287 = vmatprep.subr.bf16.mxu0 %v9894_v3  ;;  %v9902_v8 = vld [vmem:[#allocation9 + $0x30] ss:$8 sps:$4 sm:$0xff]   ;;  %v9903_v9 = vld [vmem:[#allocation9 + $0x44] ss:$8 sps:$4 sm:$0xff]   ;;  %v9905_v10 = vld [vmem:[#allocation9 + $0x40] ss:$8 sps:$4 sm:$0xff]  }
  0x95   :  { %v9906_v11 = vld [vmem:[#allocation9 + $0x54] ss:$8 sps:$4 sm:$0xff]   ;;  %v9908_v12 = vld [vmem:[#allocation9 + $0x50] ss:$8 sps:$4 sm:$0xff]   ;;  %v9909_v13 = vld [vmem:[#allocation9 + $0x64] ss:$8 sps:$4 sm:$0xff]  }
  0x96   :  { %v9911_v14 = vld [vmem:[#allocation9 + $0x60] ss:$8 sps:$4 sm:$0xff]   ;;  %v10714_v16 = vld [vmem:[#allocation3 + $0x8] sm:$0xff]  ;;  %v10498_v24 = vmov 0.0   ;;  %vm10499_vm0 = vmmov 0   ;;  %v196_v26 = vshrl.u32 %v195_v25, 7 }
  0x97   :  { %288 = vmatpush1.bf16.msra.mxu0 %v9896_v4  ;;  %v164_v17 = vld [vmem:[%s11704_s3] sm:$0xff]  ;;  %v165_v18 = vld [vmem:[%s11704_s3 + $0x8] sm:$0xff]  ;;  %v9912_v19 = vld [vmem:[#allocation9 + $0x74] ss:$8 sps:$4 sm:$0xff]   ;;  %9015 = vmatprep.subr.bf16.mxu1 %v10498_v24  ;;  %vm441_vm1 = vcmask 261120   ;;  %s10500_s1 = smov 96   ;;  %v344_v48 = vpack.c.bf16 %v10714_v16, %v10712_v15 }
  0x98   :  { %289 = vmatprep.subr.bf16.mxu0 %v9897_v5  ;;  %v9914_v20 = vld [vmem:[#allocation9 + $0x70] ss:$8 sps:$4 sm:$0xff]   ;;  %v174_v21 = vadd.f32 %v164_v17, %v10712_v15  ;;  %v175_v22 = vadd.f32 %v165_v18, %v10714_v16  ;;  %9031 = vmatprep.mubr.msk.bf16.mxu1 %vm10499_vm0, %v10498_v24  ;;  %v10730_v27 = vsub.s32 1, %v196_v26  ;;  %v193_v28 = vld [vmem:[#allocation11] sm:$0x3]  ;;  %v10732_v29 = vsub.s32 0, %v196_v26  ;;  %vm10975_vm6 = vmpackc.low %vm441_vm1, %vm441_vm1 }
  0x99   :  { %v9915_v32 = vld [vmem:[#allocation12] sm:$0xff]   ;;  %v9916_v38 = vld [vmem:[#allocation12 + $0x8] sm:$0xff]   ;;  %v9917_v40 = vld [vmem:[#allocation12 + $0x10] sm:$0xff]   ;;  %vm518_vm2 = vcmask 64512   ;;  %vm774_vm3 = vcmask 523520   ;;  %vm945_vm4 = vcmask 785920  }
  0x9a   :  { %v192_v23 = vpack.c.bf16 %v175_v22, %v174_v21  ;;  %v202_v30 = vrot.slane %v193_v28, %v10730_v27  ;;  %v198_v34 = vrot.slane %v193_v28, %v10732_v29  ;;  %9016 = vmatpush3.bf16.msra.mxu1 %v9915_v32  ;;  %v9918_v41 = vld [vmem:[#allocation12 + $0x18] sm:$0xff]   ;;  %v9919_v44 = vld [vmem:[#allocation12 + $0x20] sm:$0xff]   ;;  %v9920_v45 = vld [vmem:[#allocation12 + $0x28] sm:$0xff]   ;;  %vm1116_vm5 = vcmask 1048320   ;;  %s10502_s22 = smov [#allocation17]  }
  0x9b   :  { %290 = vmatpush1.bf16.msra.mxu0 %v9899_v6  ;;  %9017 = vmatprep.subr.bf16.mxu1 %v10498_v24  ;;  %v9921_v46 = vld [vmem:[#allocation12 + $0x30] sm:$0xff]   ;;  %v9922_v47 = vld [vmem:[#allocation12 + $0x38] sm:$0xff]   ;;  %vm2394_vm7 = vcmask 130048   ;;  %s8330_s23 = sshll.u32 %s10502_s22, 4  ;;  %s8331_s23 = int_to_ptr.vmem [resolvable:$true] %s8330_s23 }
  0x9c   :  { %291 = vmatprep.subr.bf16.mxu0 %v9900_v7  ;;  %v8362_v1 = vld [vmem:[%s11708_s7] ss:$0 sm:$0xff]  ;;  %s10449_s28 = scalar_lea.vmem %s8331_s23, 256  ;;  %p10454_p9 = scmp.lt.s32.totalorder %s8331_s23, %s8331_s23 }
  0x9d   :  { %p10450_p8 = scmp.ne.s32.totalorder %s8331_s23, %s10449_s28  ;;  %p10455_p10 = scmp.lt.s32.totalorder %s10449_s28, %s10449_s28 }
  0x9e   :  { %9018 = vmatpush3.bf16.msra.mxu1 %v9916_v38 }
  0x9f   :  { %292 = vmatpush1.bf16.msra.mxu0 %v9902_v8  ;;  %9019 = vmatprep.subr.bf16.mxu1 %v10498_v24  ;;  %p10456_p11 = por %p10455_p10, %p10454_p9 }
  0xa0   :  { %293 = vmatprep.subr.bf16.mxu0 %v9903_v9 }
  0xa1   :  { %p10457_p12 = pnand %p10456_p11, %p10450_p8 }
  0xa2   :  { %9020 = vmatpush3.bf16.msra.mxu1 %v9917_v40 }
  0xa3   :  { %294 = vmatpush1.bf16.msra.mxu0 %v9905_v10  ;;  %9021 = vmatprep.subr.bf16.mxu1 %v10498_v24 }
  0xa4   :  { %295 = vmatprep.subr.bf16.mxu0 %v9906_v11 }
  0xa6   :  { %9022 = vmatpush3.bf16.msra.mxu1 %v9918_v41 }
  0xa7   :  { %296 = vmatpush1.bf16.msra.mxu0 %v9908_v12  ;;  %9023 = vmatprep.subr.bf16.mxu1 %v10498_v24 }
  0xa8   :  { %297 = vmatprep.subr.bf16.mxu0 %v9909_v13 }
  0xaa   :  { %9024 = vmatpush3.bf16.msra.mxu1 %v9919_v44 }
  0xab   :  { %298 = vmatpush1.bf16.msra.mxu0 %v9911_v14  ;;  %9025 = vmatprep.subr.bf16.mxu1 %v10498_v24 }
  0xac   :  { %299 = vmatprep.subr.bf16.mxu0 %v9912_v19 }
  0xae   :  { %9026 = vmatpush3.bf16.msra.mxu1 %v9920_v45 }
  0xaf   :  { %300 = vmatpush1.bf16.msra.mxu0 %v9914_v20  ;;  %9027 = vmatprep.subr.bf16.mxu1 %v10498_v24 }
  0xb0   :  { %9035 = vmatprep.subr.mxu0 %v10498_v24 }
  0xb2   :  { %318 = vmatmul.mubr.bf16.vlgmr.msra.gmra.mrb[0].mxu0 %v192_v23  ;;  %9028 = vmatpush3.bf16.msra.mxu1 %v9921_v46 }
  0xb3   :  { %9037 = vmatprep.mubr.msk.f32.mxu0 %vm10499_vm0, %v10498_v24  ;;  %9029 = vmatprep.subr.bf16.mxu1 %v10498_v24 }
  0xb6   :  { %9030 = vmatpush3.bf16.msra.mxu1 %v9922_v47 }
  0xb7   :  { %9040 = vmatprep.subr.mxu1 %v10498_v24 }
  0xb9   :  { %9032 = vmatmul.mubr.bf16.vlgmr.msra.gmra.mrb[0].mxu1 %v344_v48 }
  0xba   :  { %9042 = vmatprep.mubr.msk.f32.mxu1 %vm10499_vm0, %v10498_v24 }
 0x185   :  { %v319_v31 = vpop.f32.mrb[0].mxu0 }
 0x186   :  { %v321_v33 = vpop.f32.mrb[1].mxu0  ;;  %v320_v39 = vadd.f32 %v319_v31, %v198_v34 }
 0x187   :  { %v322_v35 = vadd.f32 %v321_v33, %v202_v30  ;;  %v323_v36 = vpop.f32.mrb[2].mxu0 }
 0x188   :  { %v325_v37 = vpop.f32.mrb[3].mxu0  ;;  %v324_v42 = vadd.f32 %v323_v36, %v198_v34 }
 0x189   :  { %778 = vrot.lane.b32.xlu1 %v322_v35, %s10488_s4  ;;  %606 = vrot.lane.b32.xlu0 %v322_v35, %s10500_s1  ;;  %v326_v43 = vadd.f32 %v325_v37, %v202_v30 }
 0x18a   :  { %9036 = vmatpush3.xpose.msk.msra.mxu0 %vm441_vm1, %v322_v35 }
 0x18b   :  { %9045 = vmatprep.subr.mxu0 %v10498_v24 }
 0x18c   :  { %v434_v2 = vpop.f32.mrb[0].mxu1 }
 0x18d   :  { %9038 = vmatmul.mubr.msk.f32.vlgmr.msra.gmra.mrb[4].mxu0 %vm441_vm1, %v320_v39  ;;  %776 = vrot.lane.b32.xlu1 %v320_v39, %s10488_s4  ;;  %v435_v3 = vadd.f32 %v8362_v1, %v434_v2  ;;  %v9033_v4 = vpop.f32.mrb[1].mxu1 }
 0x18e   :  { %604 = vrot.lane.b32.xlu0 %v320_v39, %s10500_s1  ;;  %9047 = vmatprep.mubr.msk.f32.mxu0 %vm10499_vm0, %v10498_v24  ;;  %v437_v5 = vpop.f32.mrb[2].mxu1 }
 0x18f   :  { %v10804_v6 = vadd.f32 %v8362_v1, %v437_v5  ;;  %v9034_v7 = vpop.f32.mrb[3].mxu1  ;;  %9041 = vmatpush3.msra.mxu1 %v435_v3 }
 0x190   :  { %9050 = vmatprep.subr.mxu1 %v10498_v24 }
 0x191   :  { %947 = vrot.lane.b32.xlu1 %v320_v39, %s10493_s2 }
 0x192   :  { %949 = vrot.lane.b32.xlu0 %v322_v35, %s10493_s2 }
 0x195   :  { %1279 = vrot.lane.b32.xlu1 %v324_v42, %s10500_s1 }
 0x196   :  { %1281 = vrot.lane.b32.xlu0 %v326_v43, %s10500_s1 }
 0x199   :  { %1450 = vrot.lane.b32.xlu1 %v324_v42, %s10488_s4 }
 0x19a   :  { %1452 = vrot.lane.b32.xlu0 %v326_v43, %s10488_s4 }
 0x19d   :  { %1620 = vrot.lane.b32.xlu1 %v324_v42, %s10493_s2 }
 0x19e   :  { %1622 = vrot.lane.b32.xlu0 %v326_v43, %s10493_s2 }
 0x1fb   :  { %v779_v49 = vpop.permute.xlu1 %778  ;;  %v607_v50 = vpop.permute.xlu0 %606 }
 0x1fc   :  { %9046 = vmatpush3.xpose.msk.msra.mxu0 %vm441_vm1, %v607_v50 }
 0x1fd   :  { %9055 = vmatprep.subr.mxu0 %v10498_v24 }
 0x1ff   :  { %v777_v51 = vpop.permute.xlu1 %776 }
 0x200   :  { %v605_v52 = vpop.permute.xlu0 %604 }
 0x201   :  { %9048 = vmatmul.mubr.msk.f32.vlgmr.msra.gmra.mrb[6].mxu0 %vm441_vm1, %v605_v52 }
 0x202   :  { %9056 = vmatpush3.xpose.msk.msra.mxu0 %vm441_vm1, %v779_v49  ;;  %9057 = vmatprep.mubr.msk.f32.mxu0 %vm10499_vm0, %v10498_v24 }
 0x203   :  { %9065 = vmatprep.subr.mxu0 %v10498_v24  ;;  %v948_v54 = vpop.permute.xlu1 %947 }
 0x204   :  { %v950_v53 = vpop.permute.xlu0 %949 }
 0x205   :  { %9058 = vmatmul.mubr.msk.f32.vlgmr.msra.gmra.mrb[8].mxu0 %vm441_vm1, %v777_v51 }
 0x206   :  { %9066 = vmatpush3.xpose.msk.msra.mxu0 %vm441_vm1, %v950_v53  ;;  %9067 = vmatprep.mubr.msk.f32.mxu0 %vm10499_vm0, %v10498_v24 }
 0x207   :  { %9075 = vmatprep.subr.mxu0 %v10498_v24  ;;  %v1280_v56 = vpop.permute.xlu1 %1279 }
 0x208   :  { %v1282_v55 = vpop.permute.xlu0 %1281 }
 0x209   :  { %9068 = vmatmul.mubr.msk.f32.vlgmr.msra.gmra.mrb[10].mxu0 %vm441_vm1, %v948_v54 }
 0x20a   :  { %9076 = vmatpush3.xpose.msk.msra.mxu0 %vm441_vm1, %v326_v43  ;;  %9077 = vmatprep.mubr.msk.f32.mxu0 %vm10499_vm0, %v10498_v24 }
 0x20b   :  { %9085 = vmatprep.subr.mxu0 %v10498_v24  ;;  %v1451_v58 = vpop.permute.xlu1 %1450 }
 0x20c   :  { %v1453_v57 = vpop.permute.xlu0 %1452 }
 0x20d   :  { %9078 = vmatmul.mubr.msk.f32.vlgmr.msra.gmra.mrb[12].mxu0 %vm441_vm1, %v324_v42 }
 0x20e   :  { %9086 = vmatpush3.xpose.msk.msra.mxu0 %vm441_vm1, %v1282_v55  ;;  %9087 = vmatprep.mubr.msk.f32.mxu0 %vm10499_vm0, %v10498_v24 }
 0x20f   :  { %9095 = vmatprep.subr.mxu0 %v10498_v24  ;;  %v1621_v60 = vpop.permute.xlu1 %1620 }
 0x210   :  { %v1623_v59 = vpop.permute.xlu0 %1622 }
 0x211   :  { %9088 = vmatmul.mubr.msk.f32.vlgmr.msra.gmra.mrb[14].mxu0 %vm441_vm1, %v1280_v56 }
 0x212   :  { %9096 = vmatpush3.xpose.msk.msra.mxu0 %vm441_vm1, %v1453_v57  ;;  %9097 = vmatprep.mubr.msk.f32.mxu0 %vm10499_vm0, %v10498_v24 }
 0x213   :  { %9105 = vmatprep.subr.mxu0 %v10498_v24 }
 0x215   :  { %9098 = vmatmul.mubr.msk.f32.vlgmr.msra.gmra.mrb[16].mxu0 %vm441_vm1, %v1451_v58 }
 0x216   :  { %9106 = vmatpush3.xpose.msk.msra.mxu0 %vm441_vm1, %v1623_v59  ;;  %9107 = vmatprep.mubr.msk.f32.mxu0 %vm10499_vm0, %v10498_v24 }
 0x217   :  { %9115 = vmatprep.subr.bf16.mxu0 %v10498_v24 }
 0x219   :  { %9108 = vmatmul.mubr.msk.f32.vlgmr.msra.gmra.mrb[18].mxu0 %vm441_vm1, %v1621_v60 }
 0x21a   :  { %9131 = vmatprep.mubr.msk.bf16.mxu0 %vm10499_vm0, %v10498_v24 }
 0x260   :  { %v514_v61 = vpop.f32.mrb[4].mxu0 }
 0x261   :  { %v9039_v62 = vpop.f32.mrb[5].mxu0  ;;  %v519_v63 = vsel %vm518_vm2, %v514_v61, -inf }
 0x262   :  { %520 = vmax.xlane.f32.xlu0 %v519_v63 }
 0x2d4   :  { %v678_v8 = vpop.f32.mrb[6].mxu0 }
 0x2d5   :  { %v9049_v9 = vpop.f32.mrb[7].mxu0  ;;  %v682_v10 = vsel %vm518_vm2, %v678_v8, -inf }
 0x2d6   :  { %683 = vmax.xlane.f32.xlu1 %v682_v10 }
 0x2d8   :  { %v850_v11 = vpop.f32.mrb[8].mxu0 }
 0x2d9   :  { %v9059_v12 = vpop.f32.mrb[9].mxu0  ;;  %v854_v13 = vsel %vm518_vm2, %v850_v11, -inf }
 0x2da   :  { %855 = vmax.xlane.f32.xlu0 %v854_v13 }
 0x2dc   :  { %v1021_v14 = vpop.f32.mrb[10].mxu0 }
 0x2dd   :  { %v9069_v15 = vpop.f32.mrb[11].mxu0  ;;  %v1025_v16 = vsel %vm518_vm2, %v1021_v14, -inf }
 0x2de   :  { %1026 = vmax.xlane.f32.xlu0 %v1025_v16 }
 0x2e0   :  { %v1190_v17 = vpop.f32.mrb[12].mxu0 }
 0x2e1   :  { %v9079_v18 = vpop.f32.mrb[13].mxu0  ;;  %v1194_v19 = vsel %vm518_vm2, %v1190_v17, -inf }
 0x2e2   :  { %1195 = vmax.xlane.f32.xlu1 %v1194_v19 }
 0x2e4   :  { %v1353_v20 = vpop.f32.mrb[14].mxu0 }
 0x2e5   :  { %v9089_v21 = vpop.f32.mrb[15].mxu0  ;;  %v1357_v22 = vsel %vm518_vm2, %v1353_v20, -inf }
 0x2e6   :  { %1358 = vmax.xlane.f32.xlu0 %v1357_v22 }
 0x2e8   :  { %v1524_v23 = vpop.f32.mrb[16].mxu0 }
 0x2e9   :  { %v9099_v25 = vpop.f32.mrb[17].mxu0  ;;  %v1528_v26 = vsel %vm518_vm2, %v1524_v23, -inf }
 0x2ea   :  { %1529 = vmax.xlane.f32.xlu1 %v1528_v26 }
 0x2ec   :  { %v1694_v28 = vpop.f32.mrb[18].mxu0 }
 0x2ed   :  { %v9109_v30 = vpop.f32.mrb[19].mxu0  ;;  %v1698_v31 = vsel %vm518_vm2, %v1694_v28, -inf }
 0x2ee   :  { %1699 = vmax.xlane.f32.xlu0 %v1698_v31 }
 0x2ef   :  { %v521_v32 = vpop.xlane.xlu0 %520 }
 0x2f0   :  { %v522_v33 = vsub.f32 %v514_v61, %v521_v32 }
 0x2f2   :  { %v523_v34 = vmul.f32 1.442695, %v522_v33 }
 0x2f4   :  { %10115 = vpow2.f32 %v523_v34 }
 0x2fb   :  { %694 = vrot.lane.b32.xlu1 %v435_v3, %s10500_s1 }
 0x2fe   :  { %v10116_v35 = vpop.eup %10115 }
 0x2ff   :  { %v525_v36 = vsel %vm518_vm2, %v10116_v35, 0.0 }
 0x31f   :  { %526 = vadd.xlane.f32.xlu1 %v525_v36 }
 0x330   :  { %1036 = vrot.lane.b32.xlu1 %v435_v3, %s10493_s2 }
 0x363   :  { %v684_v37 = vpop.xlane.xlu1 %683 }
 0x364   :  { %v685_v38 = vsub.f32 %v678_v8, %v684_v37 }
 0x366   :  { %v686_v39 = vmul.f32 1.442695, %v685_v38 }
 0x367   :  { %v856_v40 = vpop.xlane.xlu0 %855 }
 0x368   :  { %10117 = vpow2.f32 %v686_v39  ;;  %v857_v41 = vsub.f32 %v850_v11, %v856_v40 }
 0x36a   :  { %v858_v42 = vmul.f32 1.442695, %v857_v41 }
 0x36b   :  { %v1027_v47 = vpop.xlane.xlu0 %1026 }
 0x36c   :  { %10119 = vpow2.f32 %v858_v42  ;;  %v1028_v48 = vsub.f32 %v1021_v14, %v1027_v47 }
 0x36e   :  { %v1029_v52 = vmul.f32 1.442695, %v1028_v48 }
 0x36f   :  { %v1196_v49 = vpop.xlane.xlu1 %1195 }
 0x370   :  { %v1197_v51 = vsub.f32 %v1190_v17, %v1196_v49  ;;  %10121 = vpow2.f32 %v1029_v52  ;;  %v9927_v52 = vld [vmem:[#allocation12 + $0x60] sm:$0xff]  }
 0x372   :  { %v10118_v43 = vpop.eup %10117  ;;  %v1198_v56 = vmul.f32 1.442695, %v1197_v51  ;;  %v9926_v51 = vld [vmem:[#allocation12 + $0x58] sm:$0xff]  }
 0x373   :  { %v688_v44 = vsel %vm518_vm2, %v10118_v43, 0.0  ;;  %v1359_v50 = vpop.xlane.xlu0 %1358 }
 0x374   :  { %689 = vadd.xlane.f32.xlu0 %v688_v44  ;;  %v1360_v53 = vsub.f32 %v1353_v20, %v1359_v50  ;;  %10123 = vpow2.f32 %v1198_v56  ;;  %v9923_v44 = vld [vmem:[#allocation12 + $0x40] sm:$0xff]   ;;  %v9925_v50 = vld [vmem:[#allocation12 + $0x50] sm:$0xff]  }
 0x375   :  { %9116 = vmatpush3.bf16.msra.mxu0 %v9923_v44  ;;  %v9941_v44 = vld [vmem:[#allocation12 + $0xf8] sm:$0xff]  }
 0x376   :  { %v10818_v45 = vpop.eup %10119  ;;  %v1361_v58 = vmul.f32 1.442695, %v1360_v53  ;;  %9117 = vmatprep.subr.bf16.mxu0 %v10498_v24 }
 0x377   :  { %v860_v46 = vsel %vm518_vm2, %v10818_v45, 0.0  ;;  %v1530_v54 = vpop.xlane.xlu1 %1529 }
 0x378   :  { %861 = vadd.xlane.f32.xlu1 %v860_v46  ;;  %v1531_v57 = vsub.f32 %v1524_v23, %v1530_v54  ;;  %10125 = vpow2.f32 %v1361_v58  ;;  %v9928_v54 = vld [vmem:[#allocation12 + $0x68] sm:$0xff]  }
 0x37a   :  { %v1532_v60 = vmul.f32 1.442695, %v1531_v57  ;;  %v10122_v62 = vpop.eup %10121  ;;  %v9929_v57 = vld [vmem:[#allocation12 + $0x70] sm:$0xff]  }
 0x37b   :  { %v1700_v55 = vpop.xlane.xlu0 %1699  ;;  %v695_v1 = vpop.permute.xlu1 %694  ;;  %v1031_v2 = vsel %vm518_vm2, %v10122_v62, 0.0 }
 0x37c   :  { %v1701_v59 = vsub.f32 %v1694_v28, %v1700_v55  ;;  %10127 = vpow2.f32 %v1532_v60 }
 0x37e   :  { %v1702_v61 = vmul.f32 1.442695, %v1701_v59  ;;  %v10124_v63 = vpop.eup %10123  ;;  %v9930_v59 = vld [vmem:[#allocation12 + $0x78] sm:$0xff]  }
 0x37f   :  { %v1200_v7 = vsel %vm518_vm2, %v10124_v63, 0.0 }
 0x380   :  { %10129 = vpow2.f32 %v1702_v61 }
 0x389   :  { %1369 = vrot.lane.b32.xlu1 %v10804_v6, %s10500_s1 }
 0x38a   :  { %865 = vrot.lane.b32.xlu0 %v435_v3, %s10488_s4  ;;  %v10826_v3 = vpop.eup %10125 }
 0x38b   :  { %v10828_v4 = vpop.eup %10127  ;;  %v1363_v8 = vsel %vm518_vm2, %v10826_v3, 0.0 }
 0x38c   :  { %v10833_v9 = vpop.eup %10129  ;;  %v1534_v10 = vsel %vm518_vm2, %v10828_v4, 0.0 }
 0x38d   :  { %v1704_v11 = vsel %vm518_vm2, %v10833_v9, 0.0 }
 0x3a9   :  { %1032 = vadd.xlane.f32.xlu0 %v1031_v2 }
 0x3ac   :  { %v527_v5 = vpop.xlane.xlu1 %526 }
 0x3ad   :  { %10131 = vrcp.f32 %v527_v5  ;;  %1201 = vadd.xlane.f32.xlu1 %v1200_v7  ;;  %1364 = vadd.xlane.f32.xlu0 %v1363_v8 }
 0x3b0   :  { %v1037_v14 = vpop.permute.xlu1 %1036 }
 0x3b1   :  { %1535 = vadd.xlane.f32.xlu1 %v1534_v10  ;;  %1705 = vadd.xlane.f32.xlu0 %v1704_v11 }
 0x3b7   :  { %v10132_v12 = vpop.eup %10131 }
 0x3b8   :  { %v529_v13 = vmul.f32 %v10132_v12, %v10116_v35 }
 0x3ba   :  { %9043 = vmatmul.mubr.msk.f32.vlgmr.msra.gmra.mrb[4].mxu1 %vm518_vm2, %v529_v13  ;;  %v8396_v13 = vld [vmem:[%s11708_s7 + $0x1] ss:$0 sm:$0xff] }
 0x3bb   :  { %9051 = vmatpush3.msra.mxu1 %v695_v1  ;;  %9052 = vmatprep.mubr.msk.f32.mxu1 %vm10499_vm0, %v10498_v24 }
 0x3bc   :  { %9060 = vmatprep.subr.mxu1 %v10498_v24 }
 0x3c2   :  { %1709 = vrot.lane.b32.xlu1 %v10804_v6, %s10493_s2 }
 0x3c7   :  { %1539 = vrot.lane.b32.xlu0 %v10804_v6, %s10488_s4 }
 0x401   :  { %v690_v15 = vpop.xlane.xlu0 %689 }
 0x402   :  { %10133 = vrcp.f32 %v690_v15 }
 0x405   :  { %v862_v16 = vpop.xlane.xlu1 %861  ;;  %v866_v19 = vpop.permute.xlu0 %865 }
 0x406   :  { %10135 = vrcp.f32 %v862_v16 }
 0x409   :  { %v1370_v22 = vpop.permute.xlu1 %1369 }
 0x40c   :  { %v10134_v17 = vpop.eup %10133 }
 0x40d   :  { %v692_v18 = vmul.f32 %v10134_v17, %v10118_v43 }
 0x40f   :  { %9053 = vmatmul.mubr.msk.f32.vlgmr.msra.gmra.mrb[6].mxu1 %vm518_vm2, %v692_v18 }
 0x410   :  { %v10136_v20 = vpop.eup %10135  ;;  %9061 = vmatpush3.msra.mxu1 %v866_v19  ;;  %9062 = vmatprep.mubr.msk.f32.mxu1 %vm10499_vm0, %v10498_v24 }
 0x411   :  { %9070 = vmatprep.subr.mxu1 %v10498_v24  ;;  %v864_v21 = vmul.f32 %v10136_v20, %v10818_v45  ;;  %v9924_v45 = vld [vmem:[#allocation12 + $0x48] sm:$0xff]  }
 0x412   :  { %9118 = vmatpush3.bf16.msra.mxu0 %v9924_v45  ;;  %v10267_v20 = vld [vmem:[#allocation3] sm:$0xff]  ;;  %v160_v45 = vld [vmem:[#allocation6] sm:$0xff] }
 0x413   :  { %9063 = vmatmul.mubr.msk.f32.vlgmr.msra.gmra.mrb[8].mxu1 %vm518_vm2, %v864_v21  ;;  %9119 = vmatprep.subr.bf16.mxu0 %v10498_v24 }
 0x414   :  { %9071 = vmatpush3.msra.mxu1 %v1037_v14  ;;  %9072 = vmatprep.mubr.msk.f32.mxu1 %vm10499_vm0, %v10498_v24 }
 0x415   :  { %9080 = vmatprep.subr.mxu1 %v10498_v24 }
 0x416   :  { %9120 = vmatpush3.bf16.msra.mxu0 %v9925_v50 }
 0x417   :  { %9121 = vmatprep.subr.bf16.mxu0 %v10498_v24 }
 0x41a   :  { %9122 = vmatpush3.bf16.msra.mxu0 %v9926_v51  ;;  %v10913_v51 = vld [vmem:[#allocation6 + $0x10] sm:$0xff] }
 0x41b   :  { %9123 = vmatprep.subr.bf16.mxu0 %v10498_v24 }
 0x41e   :  { %9124 = vmatpush3.bf16.msra.mxu0 %v9927_v52  ;;  %v10915_v52 = vld [vmem:[#allocation6 + $0x18] sm:$0xff] }
 0x41f   :  { %9125 = vmatprep.subr.bf16.mxu0 %v10498_v24 }
 0x422   :  { %9126 = vmatpush3.bf16.msra.mxu0 %v9928_v54  ;;  %v169_v54 = vld [vmem:[#allocation8 + $0x18] sm:$0xff] }
 0x423   :  { %9127 = vmatprep.subr.bf16.mxu0 %v10498_v24 }
 0x426   :  { %9128 = vmatpush3.bf16.msra.mxu0 %v9929_v57  ;;  %v9942_v57 = vld [vmem:[#allocation12 + $0x98] sm:$0xff]  }
 0x427   :  { %9129 = vmatprep.subr.bf16.mxu0 %v10498_v24 }
 0x42a   :  { %9130 = vmatpush3.bf16.msra.mxu0 %v9930_v59 }
 0x436   :  { %v1033_v23 = vpop.xlane.xlu0 %1032 }
 0x437   :  { %10137 = vrcp.f32 %v1033_v23 }
 0x43a   :  { %v1202_v25 = vpop.xlane.xlu1 %1201  ;;  %v1365_v26 = vpop.xlane.xlu0 %1364 }
 0x43b   :  { %10139 = vrcp.f32 %v1202_v25  ;;  %v9931_v25 = vld [vmem:[#allocation12 + $0xc0] sm:$0xff]  }
 0x43c   :  { %10141 = vrcp.f32 %v1365_v26  ;;  %v9932_v26 = vld [vmem:[#allocation12 + $0xc8] sm:$0xff]   ;;  %9155 = vmatprep.subr.bf16.mxu0 %v9931_v25 }
 0x43e   :  { %v1536_v28 = vpop.xlane.xlu1 %1535  ;;  %v1706_v31 = vpop.xlane.xlu0 %1705 }
 0x43f   :  { %10143 = vrcp.f32 %v1536_v28  ;;  %v9936_v28 = vld [vmem:[#allocation12 + $0x80] sm:$0xff]  }
 0x440   :  { %10145 = vrcp.f32 %v1706_v31  ;;  %v9934_v31 = vld [vmem:[#allocation12 + $0xd8] sm:$0xff]  }
 0x441   :  { %v10138_v30 = vpop.eup %10137 }
 0x442   :  { %v1035_v32 = vmul.f32 %v10138_v30, %v10122_v62  ;;  %v1540_v38 = vpop.permute.xlu0 %1539  ;;  %v1710_v40 = vpop.permute.xlu1 %1709  ;;  %v9933_v30 = vld [vmem:[#allocation12 + $0xd0] sm:$0xff]  }
 0x444   :  { %9073 = vmatmul.mubr.msk.f32.vlgmr.msra.gmra.mrb[10].mxu1 %vm518_vm2, %v1035_v32  ;;  %v9935_v32 = vld [vmem:[#allocation12 + $0xe0] sm:$0xff]  }
 0x445   :  { %v10140_v33 = vpop.eup %10139  ;;  %9081 = vmatpush3.msra.mxu1 %v10804_v6  ;;  %9082 = vmatprep.mubr.msk.f32.mxu1 %vm10499_vm0, %v10498_v24 }
 0x446   :  { %9090 = vmatprep.subr.mxu1 %v10498_v24  ;;  %v1204_v34 = vmul.f32 %v10140_v33, %v10124_v63  ;;  %v10142_v35 = vpop.eup %10141  ;;  %v9937_v33 = vld [vmem:[#allocation12 + $0xe8] sm:$0xff]  }
 0x447   :  { %v1367_v36 = vmul.f32 %v10142_v35, %v10826_v3 }
 0x448   :  { %9083 = vmatmul.mubr.msk.f32.vlgmr.msra.gmra.mrb[12].mxu1 %vm518_vm2, %v1204_v34 }
 0x449   :  { %9091 = vmatpush3.msra.mxu1 %v1370_v22  ;;  %9092 = vmatprep.mubr.msk.f32.mxu1 %vm10499_vm0, %v10498_v24  ;;  %v10144_v37 = vpop.eup %10143  ;;  %v10268_v22 = vld [vmem:[#allocation3 + $0x8] sm:$0xff] }
 0x44a   :  { %9100 = vmatprep.subr.mxu1 %v10498_v24  ;;  %v1538_v6 = vmul.f32 %v10144_v37, %v10828_v4  ;;  %v10146_v39 = vpop.eup %10145 }
 0x44b   :  { %v1708_v41 = vmul.f32 %v10146_v39, %v10833_v9 }
 0x44c   :  { %9093 = vmatmul.mubr.msk.f32.vlgmr.msra.gmra.mrb[14].mxu1 %vm518_vm2, %v1367_v36 }
 0x44d   :  { %9101 = vmatpush3.msra.mxu1 %v1540_v38  ;;  %9102 = vmatprep.mubr.msk.f32.mxu1 %vm10499_vm0, %v10498_v24 }
 0x44e   :  { %9110 = vmatprep.subr.mxu1 %v10498_v24 }
 0x450   :  { %9103 = vmatmul.mubr.msk.f32.vlgmr.msra.gmra.mrb[16].mxu1 %vm518_vm2, %v1538_v6 }
 0x451   :  { %9111 = vmatpush3.msra.mxu1 %v1710_v40  ;;  %9112 = vmatprep.mubr.msk.f32.mxu1 %vm10499_vm0, %v10498_v24 }
 0x452   :  { %9135 = vmatprep.subr.bf16.mxu1 %v10498_v24 }
 0x454   :  { %9113 = vmatmul.mubr.msk.f32.vlgmr.msra.gmra.mrb[18].mxu1 %vm518_vm2, %v1708_v41  ;;  %v9938_v41 = vld [vmem:[#allocation12 + $0x88] sm:$0xff]  }
 0x455   :  { %9151 = vmatprep.mubr.msk.bf16.mxu1 %vm10499_vm0, %v10498_v24  ;;  %9136 = vmatpush3.bf16.msra.mxu1 %v9936_v28  ;;  %v9948_v28 = vld [vmem:[#allocation12 + $0x108] sm:$0xff]  }
 0x456   :  { %9137 = vmatprep.subr.bf16.mxu1 %v10498_v24 }
 0x459   :  { %9138 = vmatpush3.bf16.msra.mxu1 %v9938_v41 }
 0x45a   :  { %9139 = vmatprep.subr.bf16.mxu1 %v10498_v24 }
 0x48d   :  { %v599_v42 = vpop.f32.mrb[4].mxu1 }
 0x48e   :  { %603 = vst.msk [vmem:[#allocation2] sm:$0xff] %vm441_vm1, %v599_v42  ;;  %v9044_v43 = vpop.f32.mrb[5].mxu1  ;;  %v9939_v42 = vld [vmem:[#allocation12 + $0xf0] sm:$0xff]  }
 0x48f   :  { %v9940_v43 = vld [vmem:[#allocation12 + $0x90] sm:$0xff]  }
 0x490   :  { %9140 = vmatpush3.bf16.msra.mxu1 %v9940_v43 }
 0x491   :  { %9141 = vmatprep.subr.bf16.mxu1 %v10498_v24 }
 0x494   :  { %9142 = vmatpush3.bf16.msra.mxu1 %v9942_v57 }
 0x495   :  { %9143 = vmatprep.subr.bf16.mxu1 %v10498_v24 }
 0x4e2   :  { %v766_v46 = vpop.f32.mrb[6].mxu1 }
 0x4e3   :  { %771 = vrot.lane.b32.xlu0 %v766_v46, %s10493_s2  ;;  %v9054_v47 = vpop.f32.mrb[7].mxu1  ;;  %v161_v46 = vld [vmem:[#allocation6 + $0x8] sm:$0xff] }
 0x4e4   :  { %v166_v47 = vld [vmem:[#allocation8] sm:$0xff] }
 0x4e6   :  { %v937_v48 = vpop.f32.mrb[8].mxu1 }
 0x4e7   :  { %942 = vrot.lane.b32.xlu0 %v937_v48, %s10488_s4  ;;  %v9064_v49 = vpop.f32.mrb[9].mxu1  ;;  %v167_v48 = vld [vmem:[#allocation8 + $0x8] sm:$0xff] }
 0x4e8   :  { %v170_v49 = vadd.f32 %v166_v47, %v160_v45  ;;  %v171_v50 = vadd.f32 %v167_v48, %v161_v46 }
 0x517   :  { %v1108_v53 = vpop.f32.mrb[10].mxu1 }
 0x518   :  { %1113 = vrot.lane.b32.xlu0 %v1108_v53, %s10500_s1  ;;  %v9074_v55 = vpop.f32.mrb[11].mxu1  ;;  %v168_v53 = vld [vmem:[#allocation8 + $0x10] sm:$0xff] }
 0x519   :  { %v172_v55 = vadd.f32 %v168_v53, %v10913_v51 }
 0x51b   :  { %v1274_v56 = vpop.f32.mrb[12].mxu1 }
 0x51c   :  { %1278 = vst.msk [vmem:[#allocation2 + $0x8] sm:$0xff] %vm441_vm1, %v1274_v56  ;;  %v9084_v58 = vpop.f32.mrb[13].mxu1  ;;  %v10919_v56 = vpack.c.bf16 %v171_v50, %v170_v49 }
 0x51d   :  { %v173_v58 = vadd.f32 %v169_v54, %v10915_v52  ;;  %v8408_v54 = vld [vmem:[%s11708_s7 + $0x2] ss:$0 sm:$0xff] }
 0x51f   :  { %v1441_v60 = vpop.f32.mrb[14].mxu1  ;;  %v10923_v59 = vpack.c.bf16 %v173_v58, %v172_v55 }
 0x520   :  { %1446 = vrot.lane.b32.xlu1 %v1441_v60, %s10493_s2  ;;  %v9094_v61 = vpop.f32.mrb[15].mxu1  ;;  %v9943_v60 = vld [vmem:[#allocation12 + $0xa0] sm:$0xff]  }
 0x521   :  { %9144 = vmatpush3.bf16.msra.mxu1 %v9943_v60  ;;  %v9944_v61 = vld [vmem:[#allocation12 + $0xa8] sm:$0xff]  }
 0x522   :  { %9145 = vmatprep.subr.bf16.mxu1 %v10498_v24 }
 0x523   :  { %v1611_v62 = vpop.f32.mrb[16].mxu1 }
 0x524   :  { %1616 = vrot.lane.b32.xlu1 %v1611_v62, %s10488_s4  ;;  %v9104_v63 = vpop.f32.mrb[17].mxu1  ;;  %v9945_v62 = vld [vmem:[#allocation12 + $0xb0] sm:$0xff]  }
 0x525   :  { %9146 = vmatpush3.bf16.msra.mxu1 %v9944_v61  ;;  %v9946_v63 = vld [vmem:[#allocation12 + $0xb8] sm:$0xff]  }
 0x526   :  { %9147 = vmatprep.subr.bf16.mxu1 %v10498_v24 }
 0x527   :  { %v1781_v1 = vpop.f32.mrb[18].mxu1 }
 0x528   :  { %1786 = vrot.lane.b32.xlu1 %v1781_v1, %s10500_s1  ;;  %v9114_v2 = vpop.f32.mrb[19].mxu1  ;;  %v9947_v1 = vld [vmem:[#allocation12 + $0x100] sm:$0xff]  }
 0x529   :  { %9148 = vmatpush3.bf16.msra.mxu1 %v9945_v62  ;;  %v10501_v2 = vmov 0.0|0.0  }
 0x52a   :  { %9149 = vmatprep.subr.bf16.mxu1 %v10498_v24 }
 0x52d   :  { %9150 = vmatpush3.bf16.msra.mxu1 %v9946_v63  ;;  %v8428_v63 = vld [vmem:[%s11708_s7 + $0x4] ss:$0 sm:$0xff] }
 0x52e   :  { %9175 = vmatprep.subr.bf16.mxu1 %v9947_v1 }
 0x555   :  { %v772_v3 = vpop.permute.xlu0 %771 }
 0x556   :  { %775 = vst.msk [vmem:[#allocation2] sm:$0xff] %vm774_vm3, %v772_v3 }
 0x559   :  { %v943_v4 = vpop.permute.xlu0 %942 }
 0x55a   :  { %946 = vst.msk [vmem:[#allocation2] sm:$0xff] %vm945_vm4, %v943_v4 }
 0x58a   :  { %v1114_v5 = vpop.permute.xlu0 %1113 }
 0x58b   :  { %1117 = vst.msk [vmem:[#allocation2] sm:$0xff] %vm1116_vm5, %v1114_v5 }
 0x592   :  { %v1447_v7 = vpop.permute.xlu1 %1446  ;;  %v1790_v10 = vld [vmem:[#allocation2] sm:$0xff] }
 0x593   :  { %1449 = vst.msk [vmem:[#allocation2 + $0x8] sm:$0xff] %vm774_vm3, %v1447_v7 }
 0x596   :  { %v1617_v8 = vpop.permute.xlu1 %1616 }
 0x597   :  { %1619 = vst.msk [vmem:[#allocation2 + $0x8] sm:$0xff] %vm945_vm4, %v1617_v8 }
 0x59a   :  { %v1787_v9 = vpop.permute.xlu1 %1786 }
 0x59b   :  { %1789 = vst.msk [vmem:[#allocation2 + $0x8] sm:$0xff] %vm1116_vm5, %v1787_v9 }
 0x5a2   :  { %v1791_v11 = vld [vmem:[#allocation2 + $0x8] sm:$0xff] }
 0x5a3   :  { %v1809_v12 = vpack.c.bf16 %v1791_v11, %v1790_v10  ;;  %v8405_v11 = vld [vmem:[%s11713_s12] ss:$0 sm:$0xff] }
 0x5a5   :  { %9132 = vmatmul.mubr.bf16.vlgmr.msra.gmra.mrb[20].mxu0 %v1809_v12 }
 0x5a6   :  { %9156 = vmatpush3.bf16.msra.mxu0 %v9931_v25  ;;  %9171 = vmatprep.mubr.bf16.mxu0 %v10919_v56  ;;  %v10953_v25 = vpack.c.bf16 %v161_v46, %v160_v45 }
 0x5a7   :  { %9157 = vmatprep.subr.bf16.mxu0 %v9932_v26 }
 0x5aa   :  { %9158 = vmatpush3.bf16.msra.mxu0 %v9932_v26 }
 0x5ab   :  { %9159 = vmatprep.subr.bf16.mxu0 %v9933_v30 }
 0x5ae   :  { %9160 = vmatpush3.bf16.msra.mxu0 %v9933_v30  ;;  %v9949_v30 = vld [vmem:[#allocation12 + $0x110] sm:$0xff]  }
 0x5af   :  { %9161 = vmatprep.subr.bf16.mxu0 %v9934_v31 }
 0x5b2   :  { %9162 = vmatpush3.bf16.msra.mxu0 %v9934_v31  ;;  %v9950_v31 = vld [vmem:[#allocation12 + $0x118] sm:$0xff]  }
 0x5b3   :  { %9163 = vmatprep.subr.bf16.mxu0 %v9935_v32 }
 0x5b6   :  { %9164 = vmatpush3.bf16.msra.mxu0 %v9935_v32  ;;  %v9951_v32 = vld [vmem:[#allocation12 + $0x120] sm:$0xff]  }
 0x5b7   :  { %9165 = vmatprep.subr.bf16.mxu0 %v9937_v33 }
 0x5ba   :  { %9166 = vmatpush3.bf16.msra.mxu0 %v9937_v33  ;;  %v9952_v33 = vld [vmem:[#allocation12 + $0x128] sm:$0xff]  }
 0x5bb   :  { %9167 = vmatprep.subr.bf16.mxu0 %v9939_v42 }
 0x5be   :  { %9168 = vmatpush3.bf16.msra.mxu0 %v9939_v42 }
 0x5bf   :  { %9169 = vmatprep.subr.bf16.mxu0 %v9941_v44 }
 0x5c2   :  { %9170 = vmatpush3.bf16.msra.mxu0 %v9941_v44 }
 0x5c3   :  { %9646 = vmatprep.subr.bf16.mxu0 %v10501_v2 }
 0x5c5   :  { %9172 = vmatmul.mubr.bf16.vlgmr.msra.gmra.mrb[24].mxu0 %v10923_v59 }
 0x5c6   :  { %9213 = vmatprep.mubr.msk.f32.mxu0 %vm10499_vm0, %v10498_v24 }
 0x678   :  { %v1900_v14 = vpop.f32.mrb[20].mxu0 }
 0x679   :  { %v1901_v15 = vadd.f32 %v8396_v13, %v1900_v14  ;;  %v9133_v16 = vpop.f32.mrb[21].mxu0 }
 0x67a   :  { %v1903_v17 = vpop.f32.mrb[22].mxu0 }
 0x67b   :  { %v1904_v18 = vadd.f32 %v8396_v13, %v1903_v17  ;;  %v9134_v19 = vpop.f32.mrb[23].mxu0  ;;  %v1907_v21 = vadd.f32 %v10267_v20, %v1901_v15  ;;  %v8406_v15 = vld [vmem:[%s11714_s13] ss:$0 sm:$0xff] }
 0x67c   :  { %v10269_v20 = vld [vmem:[%s11704_s3] sm:$0xff] }
 0x67d   :  { %1911 = vadd.xlane.f32.xlu0 %v1907_v21  ;;  %v1908_v23 = vadd.f32 %v10268_v22, %v1904_v18  ;;  %v10270_v22 = vld [vmem:[%s11704_s3 + $0x8] sm:$0xff] }
 0x67f   :  { %1913 = vadd.xlane.f32.xlu1 %v1908_v23 }
 0x70a   :  { %v1912_v34 = vpop.xlane.xlu0 %1911 }
 0x70b   :  { %v1916_v35 = vmul.f32 0.0078125, %v1912_v34  ;;  %v9953_v34 = vld [vmem:[#allocation12 + $0x130] sm:$0xff]  }
 0x70c   :  { %v1914_v36 = vpop.xlane.xlu1 %1913 }
 0x70d   :  { %v1917_v37 = vmul.f32 0.0078125, %v1914_v36  ;;  %v10904_v38 = vsub.f32 %v1907_v21, %v1916_v35  ;;  %v9954_v35 = vld [vmem:[#allocation12 + $0x138] sm:$0xff]   ;;  %v10958_v36 = vpack.c.bf16 %v10915_v52, %v10913_v51 }
 0x70f   :  { %v1920_v6 = vmul.f32 %v10904_v38, %v10904_v38  ;;  %v10908_v39 = vsub.f32 %v1908_v23, %v1917_v37  ;;  %v8418_v37 = vld [vmem:[%s11708_s7 + $0x3] ss:$0 sm:$0xff] }
 0x711   :  { %1922 = vadd.xlane.f32.xlu0 %v1920_v6  ;;  %v1921_v40 = vmul.f32 %v10908_v39, %v10908_v39 }
 0x715   :  { %1924 = vadd.xlane.f32.xlu0 %v1921_v40 }
 0x79e   :  { %v1923_v3 = vpop.xlane.xlu0 %1922 }
 0x79f   :  { %v1926_v4 = vmul.f32 0.0078125, %v1923_v3 }
 0x7a1   :  { %v1928_v5 = vadd.f32 1e-05, %v1926_v4 }
 0x7a2   :  { %v1925_v7 = vpop.xlane.xlu0 %1924 }
 0x7a3   :  { %10147 = vrsqrt.f32 %v1928_v5  ;;  %v1927_v8 = vmul.f32 0.0078125, %v1925_v7 }
 0x7a5   :  { %v1929_v9 = vadd.f32 1e-05, %v1927_v8 }
 0x7a7   :  { %10149 = vrsqrt.f32 %v1929_v9 }
 0x7ad   :  { %v10148_v10 = vpop.eup %10147 }
 0x7ae   :  { %v1932_v12 = vmul.f32 %v10148_v10, %v10904_v38  ;;  %v9173_v38 = vpop.f32.mrb[24].mxu0 }
 0x7af   :  { %v10967_v6 = vadd.f32 %v9173_v38, %v8418_v37 }
 0x7b0   :  { %v1940_v13 = vmul.f32 %v8405_v11, %v1932_v12 }
 0x7b1   :  { %v10150_v14 = vpop.eup %10149 }
 0x7b2   :  { %v1933_v16 = vmul.f32 %v10150_v14, %v10908_v39  ;;  %v10941_v18 = vadd.f32 %v8406_v15, %v1940_v13  ;;  %v2176_v39 = vpop.f32.mrb[25].mxu0 }
 0x7b3   :  { %v2177_v40 = vadd.f32 %v8418_v37, %v2176_v39  ;;  %v9174_v41 = vpop.f32.mrb[26].mxu0 }
 0x7b4   :  { %v1941_v17 = vmul.f32 %v8405_v11, %v1933_v16  ;;  %v1950_v21 = vadd.f32 %v10269_v20, %v10941_v18  ;;  %v10969_v42 = vadd.f32 %v9174_v41, %v8418_v37  ;;  %v2179_v43 = vpop.f32.mrb[27].mxu0 }
 0x7b5   :  { %v2180_v44 = vadd.f32 %v8418_v37, %v2179_v43 }
 0x7b6   :  { %v10943_v19 = vadd.f32 %v8406_v15, %v1941_v17  ;;  %v9668_v45 = vpack.c.bf16 %v10969_v42, %v10967_v6  ;;  %v10981_v47 = vpack.i.bf16 %v10969_v42, %v10967_v6 }
 0x7b7   :  { %v9640_v48 = vpack.c.bf16 %v2180_v44, %v2177_v40  ;;  %v10983_v49 = vpack.i.bf16 %v2180_v44, %v2177_v40 }
 0x7b8   :  { %v1951_v23 = vadd.f32 %v10270_v22, %v10943_v19 }
 0x7b9   :  { %9772 = vrot.lane.b32.xlu1 %v10983_v49, %s10500_s1 }
 0x7ba   :  { %v1969_v26 = vpack.c.bf16 %v1951_v23, %v1950_v21 }
 0x7bc   :  { %9152 = vmatmul.mubr.bf16.vlgmr.msra.gmra.mrb[20].mxu1 %v1969_v26 }
 0x7bd   :  { %9176 = vmatpush3.bf16.msra.mxu1 %v9947_v1  ;;  %9191 = vmatprep.mubr.bf16.mxu1 %v10953_v25 }
 0x7be   :  { %9177 = vmatprep.subr.bf16.mxu1 %v9948_v28 }
 0x7c1   :  { %9178 = vmatpush3.bf16.msra.mxu1 %v9948_v28 }
 0x7c2   :  { %9179 = vmatprep.subr.bf16.mxu1 %v9949_v30 }
 0x7c5   :  { %9180 = vmatpush3.bf16.msra.mxu1 %v9949_v30 }
 0x7c6   :  { %9181 = vmatprep.subr.bf16.mxu1 %v9950_v31 }
 0x7c9   :  { %9182 = vmatpush3.bf16.msra.mxu1 %v9950_v31 }
 0x7ca   :  { %9183 = vmatprep.subr.bf16.mxu1 %v9951_v32 }
 0x7cd   :  { %9184 = vmatpush3.bf16.msra.mxu1 %v9951_v32 }
 0x7ce   :  { %9185 = vmatprep.subr.bf16.mxu1 %v9952_v33 }
 0x7d1   :  { %9186 = vmatpush3.bf16.msra.mxu1 %v9952_v33 }
 0x7d2   :  { %9187 = vmatprep.subr.bf16.mxu1 %v9953_v34 }
 0x7d5   :  { %9188 = vmatpush3.bf16.msra.mxu1 %v9953_v34 }
 0x7d6   :  { %9189 = vmatprep.subr.bf16.mxu1 %v9954_v35 }
 0x7d9   :  { %9190 = vmatpush3.bf16.msra.mxu1 %v9954_v35 }
 0x7da   :  { %9639 = vmatprep.subr.bf16.mxu1 %v10501_v2 }
 0x7dc   :  { %9192 = vmatmul.mubr.bf16.vlgmr.msra.gmra.mrb[24].mxu1 %v10958_v36 }
 0x7dd   :  { %9199 = vmatprep.mubr.msk.f32.mxu1 %vm10499_vm0, %v10498_v24 }
 0x7e2   :  { %9642 = vmatpush3.bf16.xpose.msk.msra.mxu1 %vm10975_vm6, %v9640_v48 }
 0x7e3   :  { %9643 = vmatprep.subr.bf16.mxu1 %v10501_v2 }
 0x82b   :  { %v9773_v50 = vpop.permute.xlu1 %9772 }
 0x82c   :  { %v9775_v51 = vunpack.i.h.bf16 %v9773_v50  ;;  %v9774_v52 = vunpack.i.l.bf16 %v9773_v50 }
 0x82e   :  { %v9647_v53 = vpack.c.bf16 %v9775_v51, %v9774_v52 }
 0x830   :  { %9649 = vmatpush3.bf16.xpose.msk.msra.mxu0 %vm10975_vm6, %v9647_v53 }
 0x831   :  { %9657 = vmatprep.subr.bf16.mxu0 %v10501_v2 }
 0x88f   :  { %v2060_v55 = vpop.f32.mrb[20].mxu1 }
 0x890   :  { %v2061_v57 = vadd.f32 %v8408_v54, %v2060_v55  ;;  %v9153_v58 = vpop.f32.mrb[21].mxu1 }
 0x891   :  { %v2063_v60 = vpop.f32.mrb[22].mxu1 }
 0x892   :  { %v10996_v61 = vadd.f32 %v8408_v54, %v2063_v60  ;;  %2480 = vrot.lane.b32.xlu0 %v2061_v57, %s10500_s1  ;;  %v9154_v62 = vpop.f32.mrb[23].mxu1  ;;  %9200 = vmatmul.mubr.msk.f32.vlgmr.msra.gmra.mrb[28].mxu1 %vm441_vm1, %v2061_v57 }
 0x893   :  { %9206 = vmatprep.mubr.msk.f32.mxu1 %vm10499_vm0, %v10498_v24 }
 0x8af   :  { %v9193_v1 = vpop.f32.mrb[24].mxu1 }
 0x8b0   :  { %v11005_v3 = vadd.f32 %v9193_v1, %v8428_v63  ;;  %v2300_v4 = vpop.f32.mrb[25].mxu1 }
 0x8b1   :  { %v9194_v5 = vpop.f32.mrb[26].mxu1  ;;  %v2301_v9 = vadd.f32 %v8428_v63, %v2300_v4 }
 0x8b2   :  { %v11007_v7 = vadd.f32 %v9194_v5, %v8428_v63  ;;  %v2303_v8 = vpop.f32.mrb[27].mxu1 }
 0x8b3   :  { %v2304_v10 = vadd.f32 %v8428_v63, %v2303_v8 }
 0x8b4   :  { %v9672_v13 = vpack.c.bf16 %v11007_v7, %v11005_v3  ;;  %v11017_v14 = vpack.i.bf16 %v11007_v7, %v11005_v3 }
 0x8b5   :  { %v9644_v11 = vpack.c.bf16 %v2304_v10, %v2301_v9  ;;  %v11022_v32 = vpack.i.bf16 %v2304_v10, %v2301_v9 }
 0x8b7   :  { %9645 = vmatpush3.bf16.msra.mxu1 %v9644_v11 }
 0x8b8   :  { %9650 = vmatprep.subr.bf16.mxu1 %v10501_v2 }
 0x904   :  { %v2481_v12 = vpop.permute.xlu0 %2480 }
 0x905   :  { %9214 = vmatmul.mubr.msk.f32.vlgmr.msra.gmra.mrb[28].mxu0 %vm441_vm1, %v2481_v12 }
 0x906   :  { %9234 = vmatprep.mubr.msk.f32.mxu0 %vm10499_vm0, %v10498_v24 }
 0x965   :  { %v2390_v15 = vpop.f32.mrb[28].mxu1 }
 0x966   :  { %v9201_v16 = vpop.f32.mrb[29].mxu1  ;;  %v2395_v17 = vsel %vm2394_vm7, %v2390_v15, -inf }
 0x967   :  { %2396 = vmax.xlane.f32.xlu1 %v2395_v17 }
 0x9d8   :  { %v2558_v20 = vpop.f32.mrb[28].mxu0 }
 0x9d9   :  { %v9215_v21 = vpop.f32.mrb[29].mxu0  ;;  %v2562_v22 = vsel %vm2394_vm7, %v2558_v20, -inf }
 0x9da   :  { %2563 = vmax.xlane.f32.xlu0 %v2562_v22 }
 0x9f4   :  { %v2397_v23 = vpop.xlane.xlu1 %2396 }
 0x9f5   :  { %v2398_v26 = vsub.f32 %v2390_v15, %v2397_v23 }
 0x9f7   :  { %v2399_v28 = vmul.f32 1.442695, %v2398_v26 }
 0x9f9   :  { %10151 = vpow2.f32 %v2399_v28 }
 0xa03   :  { %v10152_v30 = vpop.eup %10151 }
 0xa04   :  { %v2401_v31 = vsel %vm2394_vm7, %v10152_v30, 0.0 }
 0xa05   :  { %2402 = vadd.xlane.f32.xlu1 %v2401_v31 }
 0xa16   :  { %9777 = vrot.lane.b32.xlu1 %v11022_v32, %s10500_s1 }
 0xa1a   :  { %9787 = vrot.lane.b32.xlu1 %v10983_v49, %s10493_s2 }
 0xa1e   :  { %2659 = vrot.lane.b32.xlu1 %v2061_v57, %s10488_s4 }
 0xa67   :  { %v2564_v33 = vpop.xlane.xlu0 %2563 }
 0xa68   :  { %v2565_v34 = vsub.f32 %v2558_v20, %v2564_v33 }
 0xa6a   :  { %v2566_v35 = vmul.f32 1.442695, %v2565_v34 }
 0xa6c   :  { %10153 = vpow2.f32 %v2566_v35 }
 0xa76   :  { %v10154_v37 = vpop.eup %10153 }
 0xa77   :  { %v2568_v38 = vsel %vm2394_vm7, %v10154_v37, 0.0 }
 0xa78   :  { %2569 = vadd.xlane.f32.xlu0 %v2568_v38 }
 0xa8e   :  { %9782 = vrot.lane.b32.xlu0 %v10983_v49, %s10488_s4 }
 0xa92   :  { %2836 = vrot.lane.b32.xlu0 %v2061_v57, %s10493_s2  ;;  %v2403_v39 = vpop.xlane.xlu1 %2402 }
 0xa93   :  { %10155 = vrcp.f32 %v2403_v39 }
 0xa96   :  { %v9778_v40 = vpop.permute.xlu1 %9777 }
 0xa97   :  { %v9780_v41 = vunpack.i.h.bf16 %v9778_v40  ;;  %v9779_v43 = vunpack.i.l.bf16 %v9778_v40 }
 0xa99   :  { %v9651_v50 = vpack.c.bf16 %v9780_v41, %v9779_v43 }
 0xa9a   :  { %v9788_v58 = vpop.permute.xlu1 %9787 }
 0xa9b   :  { %v9790_v60 = vunpack.i.h.bf16 %v9788_v58  ;;  %v9789_v62 = vunpack.i.l.bf16 %v9788_v58 }
 0xa9d   :  { %v10156_v44 = vpop.eup %10155  ;;  %v9661_v63 = vpack.c.bf16 %v9790_v60, %v9789_v62 }
 0xa9e   :  { %v2405_v48 = vmul.f32 %v10156_v44, %v10152_v30  ;;  %v2660_v1 = vpop.permute.xlu1 %2659 }
 0xaa0   :  { %9207 = vmatmul.mubr.msk.f32.vlgmr.msra.gmra.mrb[30].mxu1 %vm2394_vm7, %v2405_v48 }
 0xaa1   :  { %9652 = vmatpush3.bf16.msra.mxu1 %v9651_v50  ;;  %9220 = vmatprep.mubr.msk.f32.mxu1 %vm10499_vm0, %v10498_v24 }
 0xaa2   :  { %9653 = vmatprep.subr.bf16.mxu1 %v10501_v2 }
 0xb05   :  { %v2570_v51 = vpop.xlane.xlu0 %2569 }
 0xb06   :  { %10157 = vrcp.f32 %v2570_v51 }
 0xb09   :  { %v9783_v49 = vpop.permute.xlu0 %9782 }
 0xb0a   :  { %v9785_v52 = vunpack.i.h.bf16 %v9783_v49  ;;  %v9784_v53 = vunpack.i.l.bf16 %v9783_v49 }
 0xb0c   :  { %v9654_v57 = vpack.c.bf16 %v9785_v52, %v9784_v53 }
 0xb0d   :  { %v2837_v4 = vpop.permute.xlu0 %2836 }
 0xb10   :  { %v10158_v54 = vpop.eup %10157 }
 0xb11   :  { %v2572_v55 = vmul.f32 %v10158_v54, %v10154_v37 }
 0xb13   :  { %9221 = vmatmul.mubr.msk.f32.vlgmr.msra.gmra.mrb[32].mxu1 %vm2394_vm7, %v2572_v55 }
 0xb14   :  { %9656 = vmatpush3.bf16.xpose.msk.msra.mxu1 %vm10975_vm6, %v9654_v57  ;;  %9227 = vmatprep.mubr.msk.f32.mxu1 %vm10499_vm0, %v10498_v24 }
 0xb15   :  { %9660 = vmatprep.subr.bf16.mxu1 %v10501_v2 }
 0xb1b   :  { %9228 = vmatmul.mubr.msk.f32.vlgmr.msra.gmra.mrb[34].mxu1 %vm441_vm1, %v2660_v1 }
 0xb1c   :  { %9663 = vmatpush3.bf16.xpose.msk.msra.mxu1 %vm10975_vm6, %v9661_v63  ;;  %9241 = vmatprep.mubr.msk.f32.mxu1 %vm10499_vm0, %v10498_v24 }
 0xb1d   :  { %9664 = vmatprep.subr.bf16.mxu1 %v10501_v2 }
 0xb23   :  { %9242 = vmatmul.mubr.msk.f32.vlgmr.msra.gmra.mrb[36].mxu1 %vm441_vm1, %v2837_v4 }
 0xb24   :  { %9248 = vmatprep.mubr.msk.f32.mxu1 %vm10499_vm0, %v10498_v24 }
 0xb73   :  { %v2475_v5 = vpop.f32.mrb[30].mxu1 }
 0xb74   :  { %2479 = vst.msk [vmem:[#allocation2] sm:$0xff] %vm441_vm1, %v2475_v5  ;;  %v9208_v8 = vpop.f32.mrb[31].mxu1 }
 0xbe6   :  { %v11053_v9 = vpop.f32.mrb[32].mxu1 }
 0xbe7   :  { %v9222_v10 = vpop.f32.mrb[33].mxu1 }
 0xbee   :  { %v2737_v11 = vpop.f32.mrb[34].mxu1 }
 0xbef   :  { %v9229_v12 = vpop.f32.mrb[35].mxu1  ;;  %v2741_v20 = vsel %vm2394_vm7, %v2737_v11, -inf }
 0xbf6   :  { %v2914_v15 = vpop.f32.mrb[36].mxu1 }
 0xbf7   :  { %v9243_v16 = vpop.f32.mrb[37].mxu1  ;;  %v2918_v17 = vsel %vm2394_vm7, %v2914_v15, -inf }
 0xbf8   :  { %2919 = vmax.xlane.f32.xlu1 %v2918_v17 }
 0xbfc   :  { %2742 = vmax.xlane.f32.xlu1 %v2741_v20 }
 0xc85   :  { %v2920_v21 = vpop.xlane.xlu1 %2919 }
 0xc86   :  { %v2921_v22 = vsub.f32 %v2914_v15, %v2920_v21 }
 0xc88   :  { %v2922_v23 = vmul.f32 1.442695, %v2921_v22 }
 0xc89   :  { %v2743_v39 = vpop.xlane.xlu1 %2742 }
 0xc8a   :  { %10159 = vpow2.f32 %v2922_v23  ;;  %v2744_v40 = vsub.f32 %v2737_v11, %v2743_v39 }
 0xc8c   :  { %v2745_v41 = vmul.f32 1.442695, %v2744_v40 }
 0xc94   :  { %v10160_v26 = vpop.eup %10159 }
 0xc95   :  { %v2924_v28 = vsel %vm2394_vm7, %v10160_v26, 0.0 }
 0xc96   :  { %2925 = vadd.xlane.f32.xlu0 %v2924_v28 }
 0xcac   :  { %9792 = vrot.lane.b32.xlu0 %v11022_v32, %s10493_s2 }
 0xcb0   :  { %9802 = vrot.lane.b32.xlu0 %v10981_v47, %s10500_s1 }
 0xcb4   :  { %3177 = vrot.lane.b32.xlu0 %v10996_v61, %s10500_s1 }
 0xd23   :  { %v2926_v30 = vpop.xlane.xlu0 %2925 }
 0xd24   :  { %10161 = vrcp.f32 %v2926_v30 }
 0xd25   :  { %10163 = vpow2.f32 %v2745_v41 }
 0xd27   :  { %v9793_v31 = vpop.permute.xlu0 %9792 }
 0xd28   :  { %v9795_v33 = vunpack.i.h.bf16 %v9793_v31  ;;  %v9794_v34 = vunpack.i.l.bf16 %v9793_v31 }
 0xd2a   :  { %v9665_v35 = vpack.c.bf16 %v9795_v33, %v9794_v34 }
 0xd2b   :  { %v9803_v8 = vpop.permute.xlu0 %9802 }
 0xd2c   :  { %9666 = vmatpush3.bf16.msra.mxu1 %v9665_v35  ;;  %v9805_v10 = vunpack.i.h.bf16 %v9803_v8  ;;  %v9804_v11 = vunpack.i.l.bf16 %v9803_v8 }
 0xd2d   :  { %9667 = vmatprep.subr.bf16.mxu1 %v10501_v2 }
 0xd2e   :  { %v10162_v37 = vpop.eup %10161  ;;  %v9675_v12 = vpack.c.bf16 %v9805_v10, %v9804_v11 }
 0xd2f   :  { %v2928_v38 = vmul.f32 %v10162_v37, %v10160_v26  ;;  %v3178_v3 = vpop.permute.xlu0 %3177 }
 0xd31   :  { %9249 = vmatmul.mubr.msk.f32.vlgmr.msra.gmra.mrb[38].mxu1 %vm2394_vm7, %v2928_v38 }
 0xd32   :  { %9255 = vmatprep.mubr.msk.f32.mxu1 %vm10499_vm0, %v10498_v24 }
 0xd35   :  { %9670 = vmatpush3.bf16.xpose.msk.msra.mxu1 %vm10975_vm6, %v9668_v45  ;;  %v10164_v45 = vpop.eup %10163 }
 0xd36   :  { %9678 = vmatprep.subr.bf16.mxu1 %v10501_v2  ;;  %v2747_v50 = vsel %vm2394_vm7, %v10164_v45, 0.0 }
 0xd3c   :  { %9256 = vmatmul.mubr.msk.f32.vlgmr.msra.gmra.mrb[40].mxu1 %vm441_vm1, %v10996_v61 }
 0xd3d   :  { %9276 = vmatprep.mubr.msk.f32.mxu1 %vm10499_vm0, %v10498_v24 }
 0xe04   :  { %v11078_v43 = vpop.f32.mrb[38].mxu1 }
 0xe05   :  { %v9250_v44 = vpop.f32.mrb[39].mxu1 }
 0xe0f   :  { %v3088_v48 = vpop.f32.mrb[40].mxu1 }
 0xe10   :  { %v9257_v6 = vpop.f32.mrb[41].mxu1  ;;  %v3092_v42 = vsel %vm2394_vm7, %v3088_v48, -inf }
 0xe11   :  { %3093 = vmax.xlane.f32.xlu1 %v3092_v42 }
 0xe15   :  { %2748 = vadd.xlane.f32.xlu1 %v2747_v50 }
 0xe9e   :  { %v3094_v51 = vpop.xlane.xlu1 %3093 }
 0xe9f   :  { %v3095_v49 = vsub.f32 %v3088_v48, %v3094_v51 }
 0xea1   :  { %v3096_v52 = vmul.f32 1.442695, %v3095_v49 }
 0xea2   :  { %v2749_v55 = vpop.xlane.xlu1 %2748 }
 0xea3   :  { %10165 = vpow2.f32 %v3096_v52 }
 0xea4   :  { %10167 = vrcp.f32 %v2749_v55 }
 0xead   :  { %v10166_v53 = vpop.eup %10165 }
 0xeae   :  { %v3098_v54 = vsel %vm2394_vm7, %v10166_v53, 0.0  ;;  %v10168_v63 = vpop.eup %10167 }
 0xeaf   :  { %3099 = vadd.xlane.f32.xlu1 %v3098_v54  ;;  %v2751_v4 = vmul.f32 %v10168_v63, %v10164_v45 }
 0xec0   :  { %9797 = vrot.lane.b32.xlu1 %v11022_v32, %s10488_s4 }
 0xf3c   :  { %v3100_v57 = vpop.xlane.xlu1 %3099 }
 0xf3d   :  { %10169 = vrcp.f32 %v3100_v57 }
 0xf40   :  { %v9798_v58 = vpop.permute.xlu1 %9797 }
 0xf41   :  { %v9800_v60 = vunpack.i.h.bf16 %v9798_v58  ;;  %v9799_v62 = vunpack.i.l.bf16 %v9798_v58 }
 0xf43   :  { %v9658_v1 = vpack.c.bf16 %v9800_v60, %v9799_v62 }
 0xf45   :  { %9659 = vmatpush3.bf16.msra.mxu0 %v9658_v1 }
 0xf46   :  { %9671 = vmatprep.subr.bf16.mxu0 %v10501_v2 }
 0xf47   :  { %v10170_v5 = vpop.eup %10169 }
 0xf48   :  { %9235 = vmatmul.mubr.msk.f32.vlgmr.msra.gmra.mrb[30].mxu0 %vm2394_vm7, %v2751_v4  ;;  %v3102_v32 = vmul.f32 %v10170_v5, %v10166_v53 }
 0xf49   :  { %9673 = vmatpush3.bf16.msra.mxu0 %v9672_v13  ;;  %9262 = vmatprep.mubr.msk.f32.mxu0 %vm10499_vm0, %v10498_v24 }
 0xf4a   :  { %9674 = vmatprep.subr.bf16.mxu0 %v10501_v2 }
 0xf4c   :  { %9263 = vmatmul.mubr.msk.f32.vlgmr.msra.gmra.mrb[32].mxu0 %vm2394_vm7, %v3102_v32 }
 0xf4d   :  { %9269 = vmatprep.mubr.msk.f32.mxu0 %vm10499_vm0, %v10498_v24 }
 0xf52   :  { %9677 = vmatpush3.bf16.xpose.msk.msra.mxu0 %vm10975_vm6, %v9675_v12 }
 0xf53   :  { %9685 = vmatprep.subr.bf16.mxu0 %v10501_v2 }
 0xf59   :  { %9270 = vmatmul.mubr.msk.f32.vlgmr.msra.gmra.mrb[34].mxu0 %vm441_vm1, %v3178_v3 }
 0xf5a   :  { %9290 = vmatprep.mubr.msk.f32.mxu0 %vm10499_vm0, %v10498_v24 }
0x101b   :  { %v11102_v7 = vpop.f32.mrb[30].mxu0 }
0x101c   :  { %v9236_v13 = vpop.f32.mrb[31].mxu0 }
0x101f   :  { %v3172_v15 = vpop.f32.mrb[32].mxu0 }
0x1020   :  { %3176 = vst.msk [vmem:[#allocation2 + $0x8] sm:$0xff] %vm441_vm1, %v3172_v15  ;;  %v9264_v16 = vpop.f32.mrb[33].mxu0 }
0x102c   :  { %v3255_v17 = vpop.f32.mrb[34].mxu0 }
0x102d   :  { %v9271_v20 = vpop.f32.mrb[35].mxu0  ;;  %v3259_v21 = vsel %vm2394_vm7, %v3255_v17, -inf }
0x102e   :  { %3260 = vmax.xlane.f32.xlu0 %v3259_v21 }
0x1044   :  { %9807 = vrot.lane.b32.xlu0 %v11017_v14, %s10500_s1 }
0x1048   :  { %3356 = vrot.lane.b32.xlu0 %v10996_v61, %s10488_s4 }
0x10bb   :  { %v3261_v22 = vpop.xlane.xlu0 %3260 }
0x10bc   :  { %v3262_v23 = vsub.f32 %v3255_v17, %v3261_v22 }
0x10be   :  { %v3263_v26 = vmul.f32 1.442695, %v3262_v23 }
0x10bf   :  { %v9808_v28 = vpop.permute.xlu0 %9807 }
0x10c0   :  { %10171 = vpow2.f32 %v3263_v26  ;;  %v9810_v30 = vunpack.i.h.bf16 %v9808_v28  ;;  %v9809_v31 = vunpack.i.l.bf16 %v9808_v28 }
0x10c2   :  { %v9679_v33 = vpack.c.bf16 %v9810_v30, %v9809_v31 }
0x10c3   :  { %v3357_v6 = vpop.permute.xlu0 %3356 }
0x10c4   :  { %9680 = vmatpush3.bf16.msra.mxu1 %v9679_v33 }
0x10c5   :  { %9681 = vmatprep.subr.bf16.mxu1 %v10501_v2 }
0x10ca   :  { %v10172_v34 = vpop.eup %10171 }
0x10cb   :  { %v3265_v35 = vsel %vm2394_vm7, %v10172_v34, 0.0 }
0x10cc   :  { %3266 = vadd.xlane.f32.xlu1 %v3265_v35 }
0x10dd   :  { %9812 = vrot.lane.b32.xlu1 %v10981_v47, %s10488_s4 }
0x1159   :  { %v3267_v37 = vpop.xlane.xlu1 %3266 }
0x115a   :  { %10173 = vrcp.f32 %v3267_v37 }
0x115d   :  { %v9813_v38 = vpop.permute.xlu1 %9812 }
0x115e   :  { %v9815_v39 = vunpack.i.h.bf16 %v9813_v38  ;;  %v9814_v40 = vunpack.i.l.bf16 %v9813_v38 }
0x1160   :  { %v9682_v48 = vpack.c.bf16 %v9815_v39, %v9814_v40  ;;  %v9957_v39 = vld [vmem:[#allocation12 + $0x150] sm:$0xff]   ;;  %v9958_v40 = vld [vmem:[#allocation12 + $0x158] sm:$0xff]  }
0x1164   :  { %v10174_v41 = vpop.eup %10173 }
0x1165   :  { %v3269_v44 = vmul.f32 %v10174_v41, %v10172_v34  ;;  %v9959_v41 = vld [vmem:[#allocation12 + $0x160] sm:$0xff]  }
0x1167   :  { %9277 = vmatmul.mubr.msk.f32.vlgmr.msra.gmra.mrb[42].mxu1 %vm2394_vm7, %v3269_v44  ;;  %v9960_v44 = vld [vmem:[#allocation12 + $0x168] sm:$0xff]  }
0x1168   :  { %9684 = vmatpush3.bf16.xpose.msk.msra.mxu1 %vm10975_vm6, %v9682_v48  ;;  %9283 = vmatprep.mubr.msk.f32.mxu1 %vm10499_vm0, %v10498_v24  ;;  %v9961_v48 = vld [vmem:[#allocation12 + $0x170] sm:$0xff]  }
0x1169   :  { %9692 = vmatprep.subr.bf16.mxu1 %v10501_v2 }
0x116f   :  { %9284 = vmatmul.mubr.msk.f32.vlgmr.msra.gmra.mrb[44].mxu1 %vm441_vm1, %v3357_v6  ;;  %v9962_v6 = vld [vmem:[#allocation12 + $0x178] sm:$0xff]  }
0x1170   :  { %9304 = vmatprep.mubr.msk.f32.mxu1 %vm10499_vm0, %v10498_v24 }
0x123a   :  { %v3347_v42 = vpop.f32.mrb[42].mxu1 }
0x123b   :  { %v9278_v45 = vpop.f32.mrb[43].mxu1 }
0x1242   :  { %v3434_v50 = vpop.f32.mrb[44].mxu1 }
0x1243   :  { %v9285_v51 = vpop.f32.mrb[45].mxu1  ;;  %v3438_v49 = vsel %vm2394_vm7, %v3434_v50, -inf }
0x1244   :  { %3439 = vmax.xlane.f32.xlu0 %v3438_v49 }
0x125a   :  { %9817 = vrot.lane.b32.xlu0 %v11017_v14, %s10488_s4 }
0x125e   :  { %3533 = vrot.lane.b32.xlu0 %v10996_v61, %s10493_s2 }
0x12d1   :  { %v3440_v52 = vpop.xlane.xlu0 %3439 }
0x12d2   :  { %v3441_v53 = vsub.f32 %v3434_v50, %v3440_v52 }
0x12d4   :  { %v3442_v54 = vmul.f32 1.442695, %v3441_v53  ;;  %v8470_v53 = vld [vmem:[%s11708_s7 + $0x5] ss:$0 sm:$0xff] }
0x12d5   :  { %v9818_v55 = vpop.permute.xlu0 %9817 }
0x12d6   :  { %10175 = vpow2.f32 %v3442_v54  ;;  %v9820_v57 = vunpack.i.h.bf16 %v9818_v55  ;;  %v9819_v58 = vunpack.i.l.bf16 %v9818_v55 }
0x12d8   :  { %v9686_v60 = vpack.c.bf16 %v9820_v57, %v9819_v58 }
0x12d9   :  { %v3534_v11 = vpop.permute.xlu0 %3533 }
0x12da   :  { %9687 = vmatpush3.bf16.msra.mxu0 %v9686_v60 }
0x12db   :  { %9688 = vmatprep.subr.bf16.mxu0 %v10501_v2 }
0x12e0   :  { %v10176_v62 = vpop.eup %10175 }
0x12e1   :  { %v3444_v63 = vsel %vm2394_vm7, %v10176_v62, 0.0 }
0x12e2   :  { %3445 = vadd.xlane.f32.xlu1 %v3444_v63 }
0x12f3   :  { %9822 = vrot.lane.b32.xlu1 %v10981_v47, %s10493_s2 }
0x136f   :  { %v3446_v1 = vpop.xlane.xlu1 %3445 }
0x1370   :  { %10177 = vrcp.f32 %v3446_v1 }
0x1373   :  { %v9823_v61 = vpop.permute.xlu1 %9822 }
0x1374   :  { %v9825_v4 = vunpack.i.h.bf16 %v9823_v61  ;;  %v9824_v5 = vunpack.i.l.bf16 %v9823_v61  ;;  %v9963_v61 = vld [vmem:[#allocation14] ss:$8 sps:$4 sm:$0xff]  }
0x1376   :  { %v9689_v10 = vpack.c.bf16 %v9825_v4, %v9824_v5  ;;  %v9965_v4 = vld [vmem:[#allocation14 + $0x4] ss:$8 sps:$4 sm:$0xff]   ;;  %v9968_v5 = vld [vmem:[#allocation14 + $0x14] ss:$8 sps:$4 sm:$0xff]  }
0x137a   :  { %v10178_v8 = vpop.eup %10177 }
0x137b   :  { %v3448_v32 = vmul.f32 %v10178_v8, %v10176_v62  ;;  %v9966_v8 = vld [vmem:[#allocation14 + $0x10] ss:$8 sps:$4 sm:$0xff]  }
0x137d   :  { %9291 = vmatmul.mubr.msk.f32.vlgmr.msra.gmra.mrb[36].mxu0 %vm2394_vm7, %v3448_v32 }
0x137e   :  { %9691 = vmatpush3.bf16.xpose.msk.msra.mxu0 %vm10975_vm6, %v9689_v10  ;;  %9297 = vmatprep.mubr.msk.f32.mxu0 %vm10499_vm0, %v10498_v24 }
0x137f   :  { %3980 = vmatprep.subr.bf16.mxu0 %v9965_v4  ;;  %v10001_v4 = vld [vmem:[#allocation15 + $0x78] sm:$0xff]  }
0x1385   :  { %9298 = vmatmul.mubr.msk.f32.vlgmr.msra.gmra.mrb[38].mxu0 %vm441_vm1, %v3534_v11 }
0x1386   :  { %4012 = vmatprep.mubr.bf16.mxu0 %v10497_v0  ;;  %3981 = vmatpush1.bf16.msra.mxu0 %v9963_v61  ;;  %v10000_v61 = vld [vmem:[#allocation15 + $0x30] sm:$0xff]  }
0x1387   :  { %3982 = vmatprep.subr.bf16.mxu0 %v9968_v5  ;;  %v10002_v5 = vld [vmem:[#allocation15 + $0x38] sm:$0xff]  }
0x138a   :  { %3983 = vmatpush1.bf16.msra.mxu0 %v9966_v8  ;;  %v3888_v8 = vld [vmem:[%s11710_s9] sm:$0x3] }
0x1450   :  { %v3524_v47 = vpop.f32.mrb[36].mxu0 }
0x1451   :  { %v9292_v12 = vpop.f32.mrb[37].mxu0 }
0x1458   :  { %v3611_v3 = vpop.f32.mrb[38].mxu0 }
0x1459   :  { %v9299_v13 = vpop.f32.mrb[39].mxu0  ;;  %v3615_v15 = vsel %vm2394_vm7, %v3611_v3, -inf }
0x145a   :  { %3616 = vmax.xlane.f32.xlu1 %v3615_v15  ;;  %v9971_v13 = vld [vmem:[#allocation14 + $0x24] ss:$8 sps:$4 sm:$0xff]   ;;  %v9969_v15 = vld [vmem:[#allocation14 + $0x20] ss:$8 sps:$4 sm:$0xff]  }
0x145b   :  { %3984 = vmatprep.subr.bf16.mxu0 %v9971_v13 }
0x145c   :  { %3985 = vmatpush1.bf16.msra.mxu0 %v9969_v15 }
0x146b   :  { %2655 = vrot.lane.b32.xlu1 %v11053_v9, %s10493_s2 }
0x146f   :  { %3352 = vrot.lane.b32.xlu1 %v3347_v42, %s10493_s2 }
0x1473   :  { %3529 = vrot.lane.b32.xlu1 %v3524_v47, %s10488_s4 }
0x14e7   :  { %v3617_v16 = vpop.xlane.xlu1 %3616 }
0x14e8   :  { %v3618_v17 = vsub.f32 %v3611_v3, %v3617_v16  ;;  %v9974_v16 = vld [vmem:[#allocation14 + $0x34] ss:$8 sps:$4 sm:$0xff]  }
0x14e9   :  { %3986 = vmatprep.subr.bf16.mxu0 %v9974_v16 }
0x14ea   :  { %v3619_v20 = vmul.f32 1.442695, %v3618_v17  ;;  %v9972_v17 = vld [vmem:[#allocation14 + $0x30] ss:$8 sps:$4 sm:$0xff]  }
0x14eb   :  { %v2656_v21 = vpop.permute.xlu1 %2655  ;;  %3987 = vmatpush1.bf16.msra.mxu0 %v9972_v17 }
0x14ec   :  { %10179 = vpow2.f32 %v3619_v20  ;;  %2658 = vst.msk [vmem:[#allocation2] sm:$0xff] %vm774_vm3, %v2656_v21  ;;  %v9977_v20 = vld [vmem:[#allocation14 + $0x44] ss:$8 sps:$4 sm:$0xff]   ;;  %v9975_v21 = vld [vmem:[#allocation14 + $0x40] ss:$8 sps:$4 sm:$0xff]  }
0x14ed   :  { %3988 = vmatprep.subr.bf16.mxu0 %v9977_v20 }
0x14ef   :  { %v3353_v22 = vpop.permute.xlu1 %3352  ;;  %3989 = vmatpush1.bf16.msra.mxu0 %v9975_v21 }
0x14f0   :  { %3355 = vst.msk [vmem:[#allocation2 + $0x8] sm:$0xff] %vm774_vm3, %v3353_v22  ;;  %v9980_v22 = vld [vmem:[#allocation14 + $0x54] ss:$8 sps:$4 sm:$0xff]  }
0x14f1   :  { %3990 = vmatprep.subr.bf16.mxu0 %v9980_v22 }
0x14f3   :  { %v3530_v23 = vpop.permute.xlu1 %3529 }
0x14f4   :  { %3532 = vst.msk [vmem:[#allocation2 + $0x8] sm:$0xff] %vm945_vm4, %v3530_v23  ;;  %v9978_v23 = vld [vmem:[#allocation14 + $0x50] ss:$8 sps:$4 sm:$0xff]  }
0x14f5   :  { %3991 = vmatpush1.bf16.msra.mxu0 %v9978_v23 }
0x14f6   :  { %v10180_v26 = vpop.eup %10179 }
0x14f7   :  { %v3621_v9 = vsel %vm2394_vm7, %v10180_v26, 0.0 }
0x14f8   :  { %3622 = vadd.xlane.f32.xlu0 %v3621_v9  ;;  %v9981_v9 = vld [vmem:[#allocation14 + $0x60] ss:$8 sps:$4 sm:$0xff]  }
0x150e   :  { %9827 = vrot.lane.b32.xlu0 %v11017_v14, %s10493_s2 }
0x1512   :  { %2832 = vrot.lane.b32.xlu0 %v11102_v7, %s10488_s4  ;;  %v9956_v7 = vld [vmem:[#allocation12 + $0x148] sm:$0xff]  }
0x1516   :  { %3009 = vrot.lane.b32.xlu0 %v11078_v43, %s10500_s1  ;;  %v9955_v43 = vld [vmem:[#allocation12 + $0x140] sm:$0xff]  }
0x1585   :  { %v3623_v28 = vpop.xlane.xlu0 %3622 }
0x1586   :  { %10181 = vrcp.f32 %v3623_v28  ;;  %v9986_v28 = vld [vmem:[#allocation14 + $0x74] ss:$8 sps:$4 sm:$0xff]  }
0x1589   :  { %v9828_v30 = vpop.permute.xlu0 %9827 }
0x158a   :  { %v9830_v31 = vunpack.i.h.bf16 %v9828_v30  ;;  %v9829_v33 = vunpack.i.l.bf16 %v9828_v30  ;;  %v9984_v30 = vld [vmem:[#allocation14 + $0x70] ss:$8 sps:$4 sm:$0xff]  }
0x158c   :  { %v9693_v34 = vpack.c.bf16 %v9830_v31, %v9829_v33  ;;  %v9987_v31 = vld [vmem:[#allocation15 + $0x40] sm:$0xff]  }
0x158d   :  { %v2833_v35 = vpop.permute.xlu0 %2832  ;;  %v9988_v33 = vld [vmem:[#allocation15] sm:$0xff]  }
0x158e   :  { %2835 = vst.msk [vmem:[#allocation2] sm:$0xff] %vm945_vm4, %v2833_v35  ;;  %9694 = vmatpush3.bf16.msra.mxu1 %v9693_v34  ;;  %v9989_v34 = vld [vmem:[#allocation15 + $0x48] sm:$0xff]  }
0x158f   :  { %9307 = vmatprep.subr.bf16.mxu1 %v10498_v24  ;;  %v9990_v35 = vld [vmem:[#allocation15 + $0x8] sm:$0xff]  }
0x1590   :  { %v10182_v37 = vpop.eup %10181 }
0x1591   :  { %v3010_v14 = vpop.permute.xlu0 %3009  ;;  %v3625_v38 = vmul.f32 %v10182_v37, %v10180_v26  ;;  %v9983_v26 = vld [vmem:[#allocation14 + $0x64] ss:$8 sps:$4 sm:$0xff]   ;;  %v9991_v37 = vld [vmem:[#allocation15 + $0x50] sm:$0xff]  }
0x1592   :  { %3012 = vst.msk [vmem:[#allocation2] sm:$0xff] %vm1116_vm5, %v3010_v14  ;;  %3992 = vmatprep.subr.bf16.mxu0 %v9983_v26  ;;  %v9992_v14 = vld [vmem:[#allocation15 + $0x10] sm:$0xff]  }
0x1593   :  { %9305 = vmatmul.mubr.msk.f32.vlgmr.msra.gmra.mrb[46].mxu1 %vm2394_vm7, %v3625_v38  ;;  %3993 = vmatpush1.bf16.msra.mxu0 %v9981_v9  ;;  %v9993_v38 = vld [vmem:[#allocation15 + $0x58] sm:$0xff]  }
0x1594   :  { %9323 = vmatprep.mubr.msk.bf16.mxu1 %vm10499_vm0, %v10498_v24  ;;  %9308 = vmatpush3.bf16.msra.mxu1 %v9955_v43  ;;  %v9994_v43 = vld [vmem:[#allocation15 + $0x18] sm:$0xff]  }
0x1595   :  { %9309 = vmatprep.subr.bf16.mxu1 %v10498_v24  ;;  %3994 = vmatprep.subr.bf16.mxu0 %v9986_v28  ;;  %v8499_v9 = vld [vmem:[%s11712_s11] ss:$0 sm:$0xff] }
0x1597   :  { %3995 = vmatpush1.bf16.msra.mxu0 %v9984_v30 }
0x1598   :  { %9310 = vmatpush3.bf16.msra.mxu1 %v9956_v7  ;;  %v9995_v7 = vld [vmem:[#allocation15 + $0x60] sm:$0xff]  }
0x1599   :  { %9311 = vmatprep.subr.bf16.mxu1 %v10498_v24  ;;  %v3710_v51 = vld [vmem:[#allocation2] sm:$0xff] }
0x159c   :  { %9312 = vmatpush3.bf16.msra.mxu1 %v9957_v39  ;;  %v9996_v39 = vld [vmem:[#allocation15 + $0x20] sm:$0xff]  }
0x159d   :  { %9313 = vmatprep.subr.bf16.mxu1 %v10498_v24 }
0x15a0   :  { %9314 = vmatpush3.bf16.msra.mxu1 %v9958_v40  ;;  %v9997_v40 = vld [vmem:[#allocation15 + $0x68] sm:$0xff]  }
0x15a1   :  { %9315 = vmatprep.subr.bf16.mxu1 %v10498_v24 }
0x15a4   :  { %9316 = vmatpush3.bf16.msra.mxu1 %v9959_v41 }
0x15a5   :  { %9317 = vmatprep.subr.bf16.mxu1 %v10498_v24 }
0x15a8   :  { %9318 = vmatpush3.bf16.msra.mxu1 %v9960_v44 }
0x15a9   :  { %9319 = vmatprep.subr.bf16.mxu1 %v10498_v24 }
0x15ac   :  { %9320 = vmatpush3.bf16.msra.mxu1 %v9961_v48 }
0x15ad   :  { %9321 = vmatprep.subr.bf16.mxu1 %v10498_v24 }
0x15b0   :  { %9322 = vmatpush3.bf16.msra.mxu1 %v9962_v6 }
0x15b1   :  { %8835 = vmatprep.subr.bf16.mxu1 %v9987_v31 }
0x1666   :  { %v3701_v42 = vpop.f32.mrb[46].mxu1 }
0x1667   :  { %3706 = vrot.lane.b32.xlu1 %v3701_v42, %s10500_s1  ;;  %v9306_v45 = vpop.f32.mrb[47].mxu1 }
0x16d9   :  { %v3707_v50 = vpop.permute.xlu1 %3706 }
0x16da   :  { %3709 = vst.msk [vmem:[#allocation2 + $0x8] sm:$0xff] %vm1116_vm5, %v3707_v50 }
0x16e1   :  { %v3711_v49 = vld [vmem:[#allocation2 + $0x8] sm:$0xff] }
0x16e2   :  { %v3729_v52 = vpack.c.bf16 %v3711_v49, %v3710_v51  ;;  %v8481_v49 = vld [vmem:[%s11713_s12 + $0x1] ss:$0 sm:$0xff] }
0x16e4   :  { %9324 = vmatmul.mubr.bf16.vlgmr.msra.gmra.mrb[48].mxu1 %v3729_v52 }
0x16e5   :  { %8836 = vmatpush3.bf16.msra.mxu1 %v9988_v33 }
0x16e6   :  { %8837 = vmatprep.subr.bf16.mxu1 %v9989_v34 }
0x16e9   :  { %8838 = vmatpush3.bf16.msra.mxu1 %v9990_v35 }
0x16ea   :  { %8839 = vmatprep.subr.bf16.mxu1 %v9991_v37 }
0x16ed   :  { %8840 = vmatpush3.bf16.msra.mxu1 %v9992_v14 }
0x16ee   :  { %8841 = vmatprep.subr.bf16.mxu1 %v9993_v38 }
0x16f1   :  { %8842 = vmatpush3.bf16.msra.mxu1 %v9994_v43  ;;  %v10003_v43 = vld [vmem:[#allocation12 + $0x180] sm:$0xff]  }
0x16f2   :  { %8843 = vmatprep.subr.bf16.mxu1 %v9995_v7  ;;  %v10004_v7 = vld [vmem:[#allocation9 + $0x80] ss:$8 sps:$4 sm:$0xff]  }
0x16f5   :  { %8844 = vmatpush3.bf16.msra.mxu1 %v9996_v39  ;;  %v10006_v39 = vld [vmem:[#allocation9 + $0x84] ss:$8 sps:$4 sm:$0xff]  }
0x16f6   :  { %8845 = vmatprep.subr.bf16.mxu1 %v9997_v40  ;;  %v10010_v40 = vld [vmem:[#allocation9 + $0x94] ss:$8 sps:$4 sm:$0xff]   ;;  %4362 = vmatprep.subr.bf16.mxu0 %v10006_v39 }
0x17b7   :  { %v3820_v54 = vpop.f32.mrb[48].mxu1 }
0x17b8   :  { %v3821_v55 = vadd.f32 %v8470_v53, %v3820_v54  ;;  %v9325_v57 = vpop.f32.mrb[49].mxu1 }
0x17b9   :  { %v3823_v58 = vpop.f32.mrb[50].mxu1 }
0x17ba   :  { %v3824_v60 = vadd.f32 %v8470_v53, %v3823_v58  ;;  %v9326_v62 = vpop.f32.mrb[51].mxu1  ;;  %v3827_v63 = vadd.f32 %v3821_v55, %v10941_v18  ;;  %v8482_v55 = vld [vmem:[%s11714_s13 + $0x1] ss:$0 sm:$0xff] }
0x17bc   :  { %3833 = vadd.xlane.f32.xlu0 %v3827_v63  ;;  %v3828_v1 = vadd.f32 %v3824_v60, %v10943_v19 }
0x17be   :  { %3835 = vadd.xlane.f32.xlu1 %v3828_v1 }
0x1849   :  { %v3834_v32 = vpop.xlane.xlu0 %3833 }
0x184a   :  { %v3837_v10 = vmul.f32 0.0078125, %v3834_v32  ;;  %v3893_v32 = vrot.slane %v3888_v8, %v10732_v29 }
0x184b   :  { %v3836_v11 = vpop.xlane.xlu1 %3835 }
0x184c   :  { %v3838_v47 = vmul.f32 0.0078125, %v3836_v11  ;;  %v3839_v12 = vsub.f32 %v3827_v63, %v3837_v10  ;;  %v9998_v63 = vld [vmem:[#allocation15 + $0x28] sm:$0xff]   ;;  %v3897_v10 = vrot.slane %v3888_v8, %v10730_v27  ;;  %v10027_v8 = vld [vmem:[#allocation12 + $0x1b0] sm:$0xff]  }
0x184d   :  { %8846 = vmatpush3.bf16.msra.mxu1 %v9998_v63  ;;  %v10022_v63 = vld [vmem:[#allocation9 + $0xc4] ss:$8 sps:$4 sm:$0xff]  }
0x184e   :  { %v11174_v3 = vsub.f32 %v3828_v1, %v3838_v47  ;;  %v3841_v18 = vmul.f32 %v3839_v12, %v3839_v12  ;;  %v9999_v1 = vld [vmem:[#allocation15 + $0x70] sm:$0xff]  }
0x184f   :  { %8847 = vmatprep.subr.bf16.mxu1 %v9999_v1  ;;  %v10020_v1 = vld [vmem:[#allocation9 + $0xc0] ss:$8 sps:$4 sm:$0xff]  }
0x1850   :  { %3843 = vadd.xlane.f32.xlu0 %v3841_v18  ;;  %v3842_v19 = vmul.f32 %v11174_v3, %v11174_v3 }
0x1851   :  { %8848 = vmatpush3.bf16.msra.mxu1 %v10000_v61  ;;  %v10023_v61 = vld [vmem:[#allocation12 + $0x1a8] sm:$0xff]  }
0x1852   :  { %8849 = vmatprep.subr.bf16.mxu1 %v10001_v4  ;;  %v10026_v4 = vld [vmem:[#allocation9 + $0xd4] ss:$8 sps:$4 sm:$0xff]  }
0x1854   :  { %3845 = vadd.xlane.f32.xlu0 %v3842_v19 }
0x1855   :  { %8850 = vmatpush3.bf16.msra.mxu1 %v10002_v5  ;;  %v10024_v5 = vld [vmem:[#allocation9 + $0xd0] ss:$8 sps:$4 sm:$0xff]  }
0x1856   :  { %9327 = vmatprep.subr.bf16.mxu1 %v10498_v24 }
0x18dd   :  { %v3844_v41 = vpop.xlane.xlu0 %3843 }
0x18de   :  { %v3847_v44 = vmul.f32 0.0078125, %v3844_v41  ;;  %v10007_v41 = vld [vmem:[#allocation12 + $0x188] sm:$0xff]  }
0x18e0   :  { %v3849_v48 = vadd.f32 1e-05, %v3847_v44  ;;  %v10008_v44 = vld [vmem:[#allocation9 + $0x90] ss:$8 sps:$4 sm:$0xff]  }
0x18e1   :  { %v3846_v6 = vpop.xlane.xlu0 %3845 }
0x18e2   :  { %10183 = vrsqrt.f32 %v3849_v48  ;;  %v3848_v42 = vmul.f32 0.0078125, %v3846_v6 }
0x18e4   :  { %v3850_v45 = vadd.f32 1e-05, %v3848_v42 }
0x18e6   :  { %10185 = vrsqrt.f32 %v3850_v45 }
0x18ec   :  { %v10184_v50 = vpop.eup %10183 }
0x18ed   :  { %v3853_v51 = vmul.f32 %v10184_v50, %v3839_v12 }
0x18ef   :  { %v3861_v54 = vmul.f32 %v8481_v49, %v3853_v51 }
0x18f0   :  { %v10186_v52 = vpop.eup %10185 }
0x18f1   :  { %v3854_v53 = vmul.f32 %v10186_v52, %v11174_v3  ;;  %v3869_v58 = vadd.f32 %v8482_v55, %v3861_v54  ;;  %v10014_v54 = vld [vmem:[#allocation9 + $0xa4] ss:$8 sps:$4 sm:$0xff]  }
0x18f3   :  { %v3862_v57 = vmul.f32 %v8481_v49, %v3854_v53  ;;  %v10011_v53 = vld [vmem:[#allocation12 + $0x190] sm:$0xff]  }
0x18f5   :  { %v3870_v60 = vadd.f32 %v8482_v55, %v3862_v57  ;;  %v10012_v55 = vld [vmem:[#allocation9 + $0xa0] ss:$8 sps:$4 sm:$0xff]  }
0x18f6   :  { %v10015_v57 = vld [vmem:[#allocation12 + $0x198] sm:$0xff]  }
0x18f7   :  { %v3887_v62 = vpack.c.bf16 %v3870_v60, %v3869_v58 }
0x18f9   :  { %4013 = vmatmul.mubr.bf16.vlgmr.msra.gmra.mrb[40].mxu0 %v3887_v62  ;;  %v10019_v62 = vld [vmem:[#allocation12 + $0x1a0] sm:$0xff]  }
0x18fa   :  { %4394 = vmatprep.mubr.bf16.mxu0 %v10497_v0  ;;  %4363 = vmatpush1.bf16.msra.mxu0 %v10004_v7 }
0x18fb   :  { %4364 = vmatprep.subr.bf16.mxu0 %v10010_v40 }
0x18fe   :  { %4365 = vmatpush1.bf16.msra.mxu0 %v10008_v44 }
0x18ff   :  { %4366 = vmatprep.subr.bf16.mxu0 %v10014_v54 }
0x1902   :  { %4367 = vmatpush1.bf16.msra.mxu0 %v10012_v55 }
0x19cc   :  { %v4014_v11 = vpop.f32.mrb[40].mxu0 }
0x19cd   :  { %v4015_v47 = vadd.f32 %v4014_v11, %v3893_v32  ;;  %v4016_v12 = vpop.f32.mrb[41].mxu0  ;;  %v10031_v11 = vld [vmem:[#allocation12 + $0x1b8] sm:$0xff]  }
0x19ce   :  { %v4017_v3 = vadd.f32 %v4016_v12, %v3897_v10  ;;  %v4018_v18 = vpop.f32.mrb[42].mxu0  ;;  %v10032_v12 = vld [vmem:[#allocation9 + $0xf0] ss:$8 sps:$4 sm:$0xff]  }
0x19cf   :  { %v4019_v19 = vadd.f32 %v4018_v18, %v3893_v32  ;;  %v4020_v13 = vpop.f32.mrb[43].mxu0  ;;  %v4023_v16 = vmax.f32 %v4015_v47, 0.0  ;;  %v10028_v32 = vld [vmem:[#allocation9 + $0xe0] ss:$8 sps:$4 sm:$0xff]   ;;  %v10034_v47 = vld [vmem:[#allocation9 + $0xf4] ss:$8 sps:$4 sm:$0xff]  }
0x19d0   :  { %v4021_v15 = vadd.f32 %v4020_v13, %v3897_v10  ;;  %v4024_v20 = vmax.f32 %v4017_v3, 0.0  ;;  %v10030_v10 = vld [vmem:[#allocation9 + $0xe4] ss:$8 sps:$4 sm:$0xff]  }
0x19d1   :  { %v4025_v17 = vmax.f32 %v4019_v19, 0.0 }
0x19d2   :  { %v4026_v21 = vmax.f32 %v4021_v15, 0.0 }
0x19d3   :  { %v4059_v22 = vpack.c.bf16 %v4025_v17, %v4023_v16 }
0x19d4   :  { %v4060_v23 = vpack.c.bf16 %v4026_v21, %v4024_v20  ;;  %v8518_v20 = vld [vmem:[%s11713_s12 + $0x2] ss:$0 sm:$0xff] }
0x19d6   :  { %4196 = vmatprep.mubr.bf16.mxu1 %v4060_v23  ;;  %v8519_v23 = vld [vmem:[%s11714_s13 + $0x2] ss:$0 sm:$0xff] }
0x19d7   :  { %4197 = vmatmul.mubr.bf16.vlgmr.msra.gmra.mrb[52].mxu1 %v4059_v22 }
0x19d8   :  { %9343 = vmatprep.mubr.msk.bf16.mxu1 %vm10499_vm0, %v10498_v24  ;;  %9328 = vmatpush3.bf16.msra.mxu1 %v10003_v43  ;;  %v4270_v43 = vld [vmem:[#allocation11 + $0x2] sm:$0x3] }
0x19d9   :  { %9329 = vmatprep.subr.bf16.mxu1 %v10498_v24  ;;  %v4279_v39 = vrot.slane %v4270_v43, %v10730_v27 }
0x19dc   :  { %9330 = vmatpush3.bf16.msra.mxu1 %v10007_v41  ;;  %v8537_v41 = vld [vmem:[%s11708_s7 + $0x6] ss:$0 sm:$0xff] }
0x19dd   :  { %9331 = vmatprep.subr.bf16.mxu1 %v10498_v24 }
0x19e0   :  { %9332 = vmatpush3.bf16.msra.mxu1 %v10011_v53 }
0x19e1   :  { %9333 = vmatprep.subr.bf16.mxu1 %v10498_v24 }
0x19e4   :  { %9334 = vmatpush3.bf16.msra.mxu1 %v10015_v57 }
0x19e5   :  { %9335 = vmatprep.subr.bf16.mxu1 %v10498_v24 }
0x19e8   :  { %9336 = vmatpush3.bf16.msra.mxu1 %v10019_v62 }
0x19e9   :  { %9337 = vmatprep.subr.bf16.mxu1 %v10498_v24 }
0x19ec   :  { %9338 = vmatpush3.bf16.msra.mxu1 %v10023_v61 }
0x19ed   :  { %9339 = vmatprep.subr.bf16.mxu1 %v10498_v24 }
0x19f0   :  { %9340 = vmatpush3.bf16.msra.mxu1 %v10027_v8 }
0x19f1   :  { %9341 = vmatprep.subr.bf16.mxu1 %v10498_v24 }
0x19f4   :  { %9342 = vmatpush3.bf16.msra.mxu1 %v10031_v11 }
0x19f5   :  { %9387 = vmatprep.subr.mxu1 %v10498_v24 }
0x1aaa   :  { %v8851_v26 = vpop.f32.mrb[52].mxu1 }
0x1aab   :  { %v8852_v28 = vpop.f32.mrb[53].mxu1 }
0x1aac   :  { %v8853_v30 = vadd.f32 %v8852_v28, %v8851_v26  ;;  %v8854_v31 = vpop.f32.mrb[54].mxu1 }
0x1aad   :  { %v8855_v33 = vpop.f32.mrb[55].mxu1 }
0x1aae   :  { %v4199_v34 = vadd.f32 %v8853_v30, %v8499_v9  ;;  %v8856_v35 = vadd.f32 %v8855_v33, %v8854_v31 }
0x1ab0   :  { %v4202_v37 = vadd.f32 %v8856_v35, %v8499_v9  ;;  %v4205_v14 = vadd.f32 %v4199_v34, %v3869_v58  ;;  %v10018_v58 = vld [vmem:[#allocation9 + $0xb4] ss:$8 sps:$4 sm:$0xff]   ;;  %v11221_v34 = vld [vmem:[%s11704_s3] sm:$0xff] }
0x1ab1   :  { %4368 = vmatprep.subr.bf16.mxu0 %v10018_v58 }
0x1ab2   :  { %4211 = vadd.xlane.f32.xlu1 %v4205_v14  ;;  %v4206_v38 = vadd.f32 %v4202_v37, %v3870_v60  ;;  %v10016_v60 = vld [vmem:[#allocation9 + $0xb0] ss:$8 sps:$4 sm:$0xff]   ;;  %v11228_v37 = vld [vmem:[%s11704_s3 + $0x8] sm:$0xff] }
0x1ab3   :  { %4369 = vmatpush1.bf16.msra.mxu0 %v10016_v60 }
0x1ab4   :  { %4213 = vadd.xlane.f32.xlu0 %v4206_v38  ;;  %4370 = vmatprep.subr.bf16.mxu0 %v10022_v63 }
0x1ab7   :  { %4371 = vmatpush1.bf16.msra.mxu0 %v10020_v1 }
0x1ab8   :  { %4372 = vmatprep.subr.bf16.mxu0 %v10026_v4 }
0x1abb   :  { %4373 = vmatpush1.bf16.msra.mxu0 %v10024_v5 }
0x1abc   :  { %4374 = vmatprep.subr.bf16.mxu0 %v10030_v10 }
0x1abf   :  { %4375 = vmatpush1.bf16.msra.mxu0 %v10028_v32 }
0x1ac0   :  { %4376 = vmatprep.subr.bf16.mxu0 %v10034_v47 }
0x1ac3   :  { %4377 = vmatpush1.bf16.msra.mxu0 %v10032_v12 }
0x1ac4   :  { %9347 = vmatprep.subr.mxu0 %v10498_v24 }
0x1b3f   :  { %v4212_v48 = vpop.xlane.xlu1 %4211 }
0x1b40   :  { %v4215_v6 = vmul.f32 0.0078125, %v4212_v48 }
0x1b41   :  { %v4214_v42 = vpop.xlane.xlu0 %4213 }
0x1b42   :  { %v4217_v45 = vsub.f32 %v4205_v14, %v4215_v6  ;;  %v4216_v50 = vmul.f32 0.0078125, %v4214_v42  ;;  %v4275_v6 = vrot.slane %v4270_v43, %v10732_v29 }
0x1b44   :  { %v4218_v51 = vsub.f32 %v4206_v38, %v4216_v50  ;;  %v4219_v49 = vmul.f32 %v4217_v45, %v4217_v45 }
0x1b46   :  { %4221 = vadd.xlane.f32.xlu1 %v4219_v49  ;;  %v4220_v52 = vmul.f32 %v4218_v51, %v4218_v51 }
0x1b48   :  { %4223 = vadd.xlane.f32.xlu0 %v4220_v52 }
0x1bd3   :  { %v4222_v3 = vpop.xlane.xlu1 %4221 }
0x1bd4   :  { %v4225_v18 = vmul.f32 0.0078125, %v4222_v3 }
0x1bd5   :  { %v4224_v19 = vpop.xlane.xlu0 %4223 }
0x1bd6   :  { %v4227_v13 = vadd.f32 1e-05, %v4225_v18  ;;  %v4226_v15 = vmul.f32 0.0078125, %v4224_v19 }
0x1bd8   :  { %10187 = vrsqrt.f32 %v4227_v13  ;;  %v4228_v16 = vadd.f32 1e-05, %v4226_v15 }
0x1bda   :  { %10189 = vrsqrt.f32 %v4228_v16 }
0x1be2   :  { %v10188_v17 = vpop.eup %10187 }
0x1be3   :  { %v4231_v21 = vmul.f32 %v10188_v17, %v4217_v45 }
0x1be4   :  { %v10190_v22 = vpop.eup %10189 }
0x1be5   :  { %v4232_v26 = vmul.f32 %v10190_v22, %v4218_v51  ;;  %v4239_v9 = vmul.f32 %v8518_v20, %v4231_v21 }
0x1be7   :  { %v4240_v28 = vmul.f32 %v8518_v20, %v4232_v26  ;;  %v11212_v30 = vadd.f32 %v8519_v23, %v4239_v9 }
0x1be9   :  { %v11214_v31 = vadd.f32 %v8519_v23, %v4240_v28  ;;  %v4249_v35 = vadd.f32 %v11221_v34, %v11212_v30 }
0x1beb   :  { %v4422_v33 = vpack.c.bf16 %v11214_v31, %v11212_v30  ;;  %v4250_v14 = vadd.f32 %v11228_v37, %v11214_v31 }
0x1bed   :  { %9344 = vmatmul.mubr.bf16.vlgmr.msra.gmra.mrb[56].mxu1 %v4422_v33  ;;  %v4268_v38 = vpack.c.bf16 %v4250_v14, %v4249_v35 }
0x1bee   :  { %9389 = vmatprep.mubr.msk.f32.mxu1 %vm10499_vm0, %v10498_v24 }
0x1bef   :  { %4395 = vmatmul.mubr.bf16.vlgmr.msra.gmra.mrb[44].mxu0 %v4268_v38 }
0x1bf0   :  { %9349 = vmatprep.mubr.msk.f32.mxu0 %vm10499_vm0, %v10498_v24 }
0x1cc0   :  { %v4513_v7 = vpop.f32.mrb[56].mxu1 }
0x1cc1   :  { %v9345_v40 = vpop.f32.mrb[57].mxu1  ;;  %v11252_v55 = vadd.f32 %v8537_v41, %v4513_v7 }
0x1cc2   :  { %v4396_v44 = vpop.f32.mrb[44].mxu0  ;;  %v4516_v48 = vpop.f32.mrb[58].mxu1 }
0x1cc3   :  { %v11241_v42 = vadd.f32 %v8537_v41, %v4516_v48  ;;  %v4398_v45 = vpop.f32.mrb[45].mxu0  ;;  %v9346_v50 = vpop.f32.mrb[59].mxu1  ;;  %v11249_v54 = vadd.f32 %v4396_v44, %v4275_v6 }
0x1cc4   :  { %v11243_v51 = vadd.f32 %v4398_v45, %v4279_v39  ;;  %v4400_v49 = vpop.f32.mrb[46].mxu0 }
0x1cc5   :  { %v4402_v52 = vpop.f32.mrb[47].mxu0  ;;  %v11256_v57 = vadd.f32 %v4400_v49, %v4275_v6 }
0x1cc6   :  { %v11245_v53 = vadd.f32 %v4402_v52, %v4279_v39  ;;  %9348 = vmatpush3.xpose.msk.msra.mxu0 %vm441_vm1, %v11243_v51 }
0x1cc7   :  { %9352 = vmatprep.subr.mxu0 %v10498_v24 }
0x1cc8   :  { %9388 = vmatpush3.xpose.msk.msra.mxu1 %vm441_vm1, %v11245_v53 }
0x1cc9   :  { %9350 = vmatmul.mubr.msk.f32.vlgmr.msra.gmra.mrb[48].mxu0 %vm441_vm1, %v11249_v54  ;;  %9397 = vmatprep.subr.mxu1 %v10498_v24 }
0x1cca   :  { %9353 = vmatpush3.msra.mxu0 %v11252_v55  ;;  %9354 = vmatprep.mubr.msk.f32.mxu0 %vm10499_vm0, %v10498_v24 }
0x1ccb   :  { %9390 = vmatmul.mubr.msk.f32.vlgmr.msra.gmra.mrb[60].mxu1 %vm441_vm1, %v11256_v57  ;;  %9357 = vmatprep.subr.mxu0 %v10498_v24 }
0x1ccc   :  { %9399 = vmatprep.mubr.msk.f32.mxu1 %vm10499_vm0, %v10498_v24 }
0x1d9c   :  { %v4592_v58 = vpop.f32.mrb[48].mxu0 }
0x1d9d   :  { %v9351_v60 = vpop.f32.mrb[49].mxu0  ;;  %v4596_v62 = vsel %vm518_vm2, %v4592_v58, -inf }
0x1d9e   :  { %v11270_v63 = vpop.f32.mrb[60].mxu1  ;;  %4597 = vmax.xlane.f32.xlu1 %v4596_v62 }
0x1d9f   :  { %v9391_v1 = vpop.f32.mrb[61].mxu1  ;;  %v5268_v41 = vsel %vm518_vm2, %v11270_v63, -inf }
0x1daf   :  { %4683 = vrot.lane.b32.xlu1 %v11243_v51, %s10500_s1 }
0x1e2b   :  { %v4598_v61 = vpop.xlane.xlu1 %4597 }
0x1e2c   :  { %v4599_v4 = vsub.f32 %v4592_v58, %v4598_v61 }
0x1e2e   :  { %v4600_v5 = vmul.f32 1.442695, %v4599_v4 }
0x1e2f   :  { %v4684_v12 = vpop.permute.xlu1 %4683 }
0x1e30   :  { %10191 = vpow2.f32 %v4600_v5 }
0x1e3a   :  { %v10192_v8 = vpop.eup %10191 }
0x1e3b   :  { %v4602_v32 = vsel %vm518_vm2, %v10192_v8, 0.0 }
0x1e3c   :  { %4603 = vadd.xlane.f32.xlu0 %v4602_v32 }
0x1e52   :  { %4681 = vrot.lane.b32.xlu0 %v11249_v54, %s10500_s1 }
0x1ec9   :  { %v4604_v10 = vpop.xlane.xlu0 %4603 }
0x1eca   :  { %10193 = vrcp.f32 %v4604_v10 }
0x1ecd   :  { %v4682_v3 = vpop.permute.xlu0 %4681 }
0x1ed4   :  { %v10194_v11 = vpop.eup %10193 }
0x1ed5   :  { %v4606_v47 = vmul.f32 %v10194_v11, %v10192_v8 }
0x1ed7   :  { %9355 = vmatmul.mubr.msk.f32.vlgmr.msra.gmra.mrb[50].mxu0 %vm518_vm2, %v4606_v47 }
0x1ed8   :  { %9358 = vmatpush3.xpose.msk.msra.mxu0 %vm441_vm1, %v4684_v12  ;;  %9359 = vmatprep.mubr.msk.f32.mxu0 %vm10499_vm0, %v10498_v24 }
0x1ed9   :  { %9362 = vmatprep.subr.mxu0 %v10498_v24 }
0x1edb   :  { %9360 = vmatmul.mubr.msk.f32.vlgmr.msra.gmra.mrb[52].mxu0 %vm441_vm1, %v4682_v3 }
0x1edc   :  { %9364 = vmatprep.mubr.msk.f32.mxu0 %vm10499_vm0, %v10498_v24 }
0x1faa   :  { %v4676_v18 = vpop.f32.mrb[50].mxu0 }
0x1fab   :  { %4680 = vst.msk [vmem:[#allocation2] sm:$0xff] %vm441_vm1, %v4676_v18  ;;  %v9356_v19 = vpop.f32.mrb[51].mxu0 }
0x1fae   :  { %v4755_v13 = vpop.f32.mrb[52].mxu0 }
0x1faf   :  { %v9361_v15 = vpop.f32.mrb[53].mxu0  ;;  %v4759_v16 = vsel %vm518_vm2, %v4755_v13, -inf }
0x1fb0   :  { %4760 = vmax.xlane.f32.xlu1 %v4759_v16 }
0x1fc1   :  { %4771 = vrot.lane.b32.xlu1 %v11252_v55, %s10500_s1 }
0x1fc5   :  { %4852 = vrot.lane.b32.xlu1 %v11249_v54, %s10488_s4 }
0x203d   :  { %v4761_v17 = vpop.xlane.xlu1 %4760 }
0x203e   :  { %v4762_v20 = vsub.f32 %v4755_v13, %v4761_v17 }
0x2040   :  { %v4763_v21 = vmul.f32 1.442695, %v4762_v20 }
0x2041   :  { %v4772_v22 = vpop.permute.xlu1 %4771 }
0x2042   :  { %10195 = vpow2.f32 %v4763_v21  ;;  %9363 = vmatpush3.msra.mxu0 %v4772_v22 }
0x2043   :  { %9367 = vmatprep.subr.mxu0 %v10498_v24 }
0x2045   :  { %v4853_v14 = vpop.permute.xlu1 %4852 }
0x204c   :  { %v10196_v23 = vpop.eup %10195 }
0x204d   :  { %v4765_v26 = vsel %vm518_vm2, %v10196_v23, 0.0 }
0x204e   :  { %4766 = vadd.xlane.f32.xlu0 %v4765_v26 }
0x2064   :  { %4854 = vrot.lane.b32.xlu0 %v11243_v51, %s10488_s4 }
0x20db   :  { %v4767_v9 = vpop.xlane.xlu0 %4766 }
0x20dc   :  { %10197 = vrcp.f32 %v4767_v9 }
0x20df   :  { %v4855_v35 = vpop.permute.xlu0 %4854 }
0x20e6   :  { %v10198_v28 = vpop.eup %10197 }
0x20e7   :  { %v4769_v33 = vmul.f32 %v10198_v28, %v10196_v23 }
0x20e9   :  { %9365 = vmatmul.mubr.msk.f32.vlgmr.msra.gmra.mrb[54].mxu0 %vm518_vm2, %v4769_v33 }
0x20ea   :  { %9368 = vmatpush3.xpose.msk.msra.mxu0 %vm441_vm1, %v4855_v35  ;;  %9369 = vmatprep.mubr.msk.f32.mxu0 %vm10499_vm0, %v10498_v24 }
0x20eb   :  { %9372 = vmatprep.subr.mxu0 %v10498_v24 }
0x20ed   :  { %9370 = vmatmul.mubr.msk.f32.vlgmr.msra.gmra.mrb[56].mxu0 %vm441_vm1, %v4853_v14 }
0x20ee   :  { %9374 = vmatprep.mubr.msk.f32.mxu0 %vm10499_vm0, %v10498_v24 }
0x21bc   :  { %v11303_v38 = vpop.f32.mrb[54].mxu0 }
0x21bd   :  { %v9366_v43 = vpop.f32.mrb[55].mxu0 }
0x21c0   :  { %v4926_v7 = vpop.f32.mrb[56].mxu0 }
0x21c1   :  { %v9371_v39 = vpop.f32.mrb[57].mxu0  ;;  %v4930_v40 = vsel %vm518_vm2, %v4926_v7, -inf }
0x21c2   :  { %4931 = vmax.xlane.f32.xlu1 %v4930_v40 }
0x21d3   :  { %5024 = vrot.lane.b32.xlu1 %v11243_v51, %s10493_s2 }
0x21d7   :  { %5022 = vrot.lane.b32.xlu1 %v11249_v54, %s10493_s2 }
0x21db   :  { %5353 = vrot.lane.b32.xlu1 %v11256_v57, %s10500_s1 }
0x21df   :  { %5524 = vrot.lane.b32.xlu1 %v11256_v57, %s10488_s4 }
0x21e3   :  { %5694 = vrot.lane.b32.xlu1 %v11256_v57, %s10493_s2 }
0x2207   :  { %5269 = vmax.xlane.f32.xlu1 %v5268_v41 }
0x224f   :  { %v4932_v44 = vpop.xlane.xlu1 %4931 }
0x2250   :  { %v4933_v48 = vsub.f32 %v4926_v7, %v4932_v44 }
0x2252   :  { %v4934_v6 = vmul.f32 1.442695, %v4933_v48 }
0x2253   :  { %v5025_v51 = vpop.permute.xlu1 %5024 }
0x2254   :  { %10199 = vpow2.f32 %v4934_v6 }
0x2257   :  { %v5023_v52 = vpop.permute.xlu1 %5022 }
0x225b   :  { %v5354_v57 = vpop.permute.xlu1 %5353 }
0x225e   :  { %v10200_v45 = vpop.eup %10199 }
0x225f   :  { %v4936_v50 = vsel %vm518_vm2, %v10200_v45, 0.0 }
0x2260   :  { %4937 = vadd.xlane.f32.xlu0 %v4936_v50 }
0x2276   :  { %4941 = vrot.lane.b32.xlu0 %v11252_v55, %s10488_s4 }
0x227a   :  { %5355 = vrot.lane.b32.xlu0 %v11245_v53, %s10500_s1 }
0x227e   :  { %5526 = vrot.lane.b32.xlu0 %v11245_v53, %s10488_s4 }
0x2282   :  { %5696 = vrot.lane.b32.xlu0 %v11245_v53, %s10493_s2  ;;  %v5525_v53 = vpop.permute.xlu1 %5524 }
0x2286   :  { %v5695_v4 = vpop.permute.xlu1 %5694 }
0x2294   :  { %v5270_v5 = vpop.xlane.xlu1 %5269 }
0x2295   :  { %v5271_v8 = vsub.f32 %v11270_v63, %v5270_v5 }
0x2297   :  { %v5272_v32 = vmul.f32 1.442695, %v5271_v8 }
0x22ed   :  { %v4938_v49 = vpop.xlane.xlu0 %4937 }
0x22ee   :  { %10201 = vrcp.f32 %v4938_v49 }
0x22ef   :  { %10203 = vpow2.f32 %v5272_v32 }
0x22f1   :  { %v4942_v54 = vpop.permute.xlu0 %4941 }
0x22f2   :  { %9373 = vmatpush3.msra.mxu0 %v4942_v54 }
0x22f3   :  { %9377 = vmatprep.subr.mxu0 %v10498_v24 }
0x22f5   :  { %v5356_v58 = vpop.permute.xlu0 %5355 }
0x22f6   :  { %9398 = vmatpush3.xpose.msk.msra.mxu1 %vm441_vm1, %v5356_v58 }
0x22f7   :  { %9407 = vmatprep.subr.mxu1 %v10498_v24 }
0x22f8   :  { %v10202_v60 = vpop.eup %10201 }
0x22f9   :  { %v4940_v62 = vmul.f32 %v10202_v60, %v10200_v45  ;;  %v5527_v1 = vpop.permute.xlu0 %5526  ;;  %9400 = vmatmul.mubr.msk.f32.vlgmr.msra.gmra.mrb[62].mxu1 %vm441_vm1, %v5354_v57  ;;  %v11354_v21 = vpop.eup %10203 }
0x22fa   :  { %9408 = vmatpush3.xpose.msk.msra.mxu1 %vm441_vm1, %v5527_v1  ;;  %9409 = vmatprep.mubr.msk.f32.mxu1 %vm10499_vm0, %v10498_v24  ;;  %v5274_v22 = vsel %vm518_vm2, %v11354_v21, 0.0 }
0x22fb   :  { %9375 = vmatmul.mubr.msk.f32.vlgmr.msra.gmra.mrb[58].mxu0 %vm518_vm2, %v4940_v62  ;;  %9417 = vmatprep.subr.mxu1 %v10498_v24 }
0x22fc   :  { %9378 = vmatpush3.xpose.msk.msra.mxu0 %vm441_vm1, %v5025_v51  ;;  %9379 = vmatprep.mubr.msk.f32.mxu0 %vm10499_vm0, %v10498_v24 }
0x22fd   :  { %v5697_v61 = vpop.permute.xlu0 %5696  ;;  %9410 = vmatmul.mubr.msk.f32.vlgmr.msra.gmra.mrb[64].mxu1 %vm441_vm1, %v5525_v53  ;;  %9382 = vmatprep.subr.mxu0 %v10498_v24 }
0x22fe   :  { %9418 = vmatpush3.xpose.msk.msra.mxu1 %vm441_vm1, %v5697_v61  ;;  %9419 = vmatprep.mubr.msk.f32.mxu1 %vm10499_vm0, %v10498_v24 }
0x22ff   :  { %9380 = vmatmul.mubr.msk.f32.vlgmr.msra.gmra.mrb[60].mxu0 %vm441_vm1, %v5023_v52  ;;  %9427 = vmatprep.subr.bf16.mxu1 %v10498_v24 }
0x2300   :  { %9384 = vmatprep.mubr.msk.f32.mxu0 %vm10499_vm0, %v10498_v24 }
0x2301   :  { %9420 = vmatmul.mubr.msk.f32.vlgmr.msra.gmra.mrb[66].mxu1 %vm441_vm1, %v5695_v4 }
0x2302   :  { %9443 = vmatprep.mubr.msk.bf16.mxu1 %vm10499_vm0, %v10498_v24 }
0x23cc   :  { %v5427_v10 = vpop.f32.mrb[62].mxu1 }
0x23cd   :  { %v9401_v11 = vpop.f32.mrb[63].mxu1  ;;  %v5431_v63 = vsel %vm518_vm2, %v5427_v10, -inf }
0x23ce   :  { %v5013_v47 = vpop.f32.mrb[58].mxu0 }
0x23cf   :  { %v9376_v12 = vpop.f32.mrb[59].mxu0 }
0x23d0   :  { %v5598_v3 = vpop.f32.mrb[64].mxu1 }
0x23d1   :  { %v9411_v18 = vpop.f32.mrb[65].mxu1  ;;  %v5602_v23 = vsel %vm518_vm2, %v5598_v3, -inf }
0x23d2   :  { %v5096_v19 = vpop.f32.mrb[60].mxu0 }
0x23d3   :  { %v9381_v13 = vpop.f32.mrb[61].mxu0  ;;  %v5100_v15 = vsel %vm518_vm2, %v5096_v19, -inf }
0x23d4   :  { %v5768_v16 = vpop.f32.mrb[66].mxu1  ;;  %5101 = vmax.xlane.f32.xlu0 %v5100_v15  ;;  %v10035_v13 = vld [vmem:[#allocation12 + $0x1c0] sm:$0xff]   ;;  %v10036_v15 = vld [vmem:[#allocation12 + $0x1c8] sm:$0xff]  }
0x23d5   :  { %v9421_v17 = vpop.f32.mrb[67].mxu1  ;;  %v5772_v20 = vsel %vm518_vm2, %v5768_v16, -inf  ;;  %9428 = vmatpush3.bf16.msra.mxu1 %v10035_v13  ;;  %v10054_v13 = vld [vmem:[#allocation12 + $0x218] sm:$0xff]  }
0x23d6   :  { %5773 = vmax.xlane.f32.xlu1 %v5772_v20  ;;  %9429 = vmatprep.subr.bf16.mxu1 %v10498_v24  ;;  %v10038_v17 = vld [vmem:[#allocation12 + $0x1d8] sm:$0xff]   ;;  %v10039_v20 = vld [vmem:[#allocation12 + $0x1e0] sm:$0xff]  }
0x23d8   :  { %5432 = vmax.xlane.f32.xlu0 %v5431_v63  ;;  %v10040_v63 = vld [vmem:[#allocation12 + $0x1e8] sm:$0xff]  }
0x23d9   :  { %9430 = vmatpush3.bf16.msra.mxu1 %v10036_v15  ;;  %v10055_v15 = vld [vmem:[#allocation12 + $0x220] sm:$0xff]  }
0x23da   :  { %5275 = vadd.xlane.f32.xlu1 %v5274_v22  ;;  %9431 = vmatprep.subr.bf16.mxu1 %v10498_v24 }
0x23dc   :  { %5603 = vmax.xlane.f32.xlu0 %v5602_v23 }
0x2461   :  { %v5102_v26 = vpop.xlane.xlu0 %5101 }
0x2462   :  { %v5103_v9 = vsub.f32 %v5096_v19, %v5102_v26  ;;  %v10041_v26 = vld [vmem:[#allocation12 + $0x1f0] sm:$0xff]  }
0x2463   :  { %v5774_v28 = vpop.xlane.xlu1 %5773 }
0x2464   :  { %v5104_v14 = vmul.f32 1.442695, %v5103_v9  ;;  %v5775_v43 = vsub.f32 %v5768_v16, %v5774_v28  ;;  %v10037_v16 = vld [vmem:[#allocation12 + $0x1d0] sm:$0xff]   ;;  %v10042_v28 = vld [vmem:[#allocation12 + $0x1f8] sm:$0xff]  }
0x2465   :  { %v5433_v33 = vpop.xlane.xlu0 %5432  ;;  %9432 = vmatpush3.bf16.msra.mxu1 %v10037_v16  ;;  %v10056_v16 = vld [vmem:[#allocation12 + $0x228] sm:$0xff]  }
0x2466   :  { %v5434_v35 = vsub.f32 %v5427_v10, %v5433_v33  ;;  %v5776_v41 = vmul.f32 1.442695, %v5775_v43  ;;  %9433 = vmatprep.subr.bf16.mxu1 %v10498_v24 }
0x2467   :  { %v5276_v57 = vpop.xlane.xlu1 %5275 }
0x2468   :  { %v5435_v7 = vmul.f32 1.442695, %v5434_v35 }
0x2469   :  { %v5604_v39 = vpop.xlane.xlu0 %5603  ;;  %9434 = vmatpush3.bf16.msra.mxu1 %v10038_v17  ;;  %v10057_v17 = vld [vmem:[#allocation12 + $0x230] sm:$0xff]  }
0x246a   :  { %10205 = vpow2.f32 %v5435_v7  ;;  %v5605_v40 = vsub.f32 %v5598_v3, %v5604_v39  ;;  %9435 = vmatprep.subr.bf16.mxu1 %v10498_v24 }
0x246b   :  { %10207 = vpow2.f32 %v5104_v14 }
0x246c   :  { %v5606_v44 = vmul.f32 1.442695, %v5605_v40 }
0x246d   :  { %9436 = vmatpush3.bf16.msra.mxu1 %v10039_v20  ;;  %v10058_v20 = vld [vmem:[#allocation12 + $0x238] sm:$0xff]  }
0x246e   :  { %10209 = vpow2.f32 %v5606_v44  ;;  %9437 = vmatprep.subr.bf16.mxu1 %v10498_v24 }
0x246f   :  { %10211 = vpow2.f32 %v5776_v41 }
0x2471   :  { %9438 = vmatpush3.bf16.msra.mxu1 %v10040_v63 }
0x2472   :  { %9439 = vmatprep.subr.bf16.mxu1 %v10498_v24 }
0x2474   :  { %v10206_v48 = vpop.eup %10205 }
0x2475   :  { %v5437_v6 = vsel %vm518_vm2, %v10206_v48, 0.0  ;;  %v10208_v45 = vpop.eup %10207  ;;  %9440 = vmatpush3.bf16.msra.mxu1 %v10041_v26 }
0x2476   :  { %5438 = vadd.xlane.f32.xlu0 %v5437_v6  ;;  %v5106_v51 = vsel %vm518_vm2, %v10208_v45, 0.0  ;;  %9441 = vmatprep.subr.bf16.mxu1 %v10498_v24 }
0x2478   :  { %v10210_v50 = vpop.eup %10209 }
0x2479   :  { %v5608_v49 = vsel %vm518_vm2, %v10210_v50, 0.0  ;;  %v10212_v52 = vpop.eup %10211  ;;  %9442 = vmatpush3.bf16.msra.mxu1 %v10042_v28  ;;  %v8582_v28 = vld [vmem:[%s11713_s12 + $0x3] ss:$0 sm:$0xff] }
0x247a   :  { %5107 = vadd.xlane.f32.xlu0 %v5106_v51  ;;  %5609 = vadd.xlane.f32.xlu1 %v5608_v49  ;;  %v5778_v54 = vsel %vm518_vm2, %v10212_v52, 0.0  ;;  %v8571_v51 = vld [vmem:[%s11708_s7 + $0x7] ss:$0 sm:$0xff] }
0x247e   :  { %5779 = vadd.xlane.f32.xlu0 %v5778_v54 }
0x248b   :  { %5111 = vrot.lane.b32.xlu1 %v11252_v55, %s10493_s2 }
0x248f   :  { %5613 = vrot.lane.b32.xlu1 %v11241_v42, %s10488_s4 }
0x2493   :  { %5783 = vrot.lane.b32.xlu1 %v11241_v42, %s10493_s2 }
0x2494   :  { %5443 = vrot.lane.b32.xlu0 %v11241_v42, %s10500_s1 }
0x2498   :  { %4848 = vrot.lane.b32.xlu0 %v11303_v38, %s10493_s2 }
0x249c   :  { %5018 = vrot.lane.b32.xlu0 %v5013_v47, %s10488_s4 }
0x2503   :  { %v5439_v58 = vpop.xlane.xlu0 %5438 }
0x2507   :  { %v5610_v60 = vpop.xlane.xlu1 %5609  ;;  %v5108_v62 = vpop.xlane.xlu0 %5107 }
0x2508   :  { %10213 = vrcp.f32 %v5108_v62 }
0x2509   :  { %10215 = vrcp.f32 %v5276_v57 }
0x250a   :  { %10217 = vrcp.f32 %v5439_v58 }
0x250b   :  { %v5112_v55 = vpop.permute.xlu1 %5111  ;;  %v5780_v1 = vpop.xlane.xlu0 %5779  ;;  %10219 = vrcp.f32 %v5610_v60 }
0x250c   :  { %9383 = vmatpush3.msra.mxu0 %v5112_v55  ;;  %10221 = vrcp.f32 %v5780_v1  ;;  %v10043_v1 = vld [vmem:[#allocation12 + $0x240] sm:$0xff]  }
0x250d   :  { %9392 = vmatprep.subr.mxu0 %v10498_v24  ;;  %9467 = vmatprep.subr.bf16.mxu1 %v10043_v1 }
0x250f   :  { %v5444_v53 = vpop.permute.xlu0 %5443  ;;  %v5614_v47 = vpop.permute.xlu1 %5613 }
0x2512   :  { %v10214_v61 = vpop.eup %10213 }
0x2513   :  { %v4849_v4 = vpop.permute.xlu0 %4848  ;;  %v5110_v5 = vmul.f32 %v10214_v61, %v10208_v45  ;;  %v10216_v38 = vpop.eup %10215  ;;  %v10048_v61 = vld [vmem:[#allocation12 + $0x200] sm:$0xff]  }
0x2514   :  { %4851 = vst.msk [vmem:[#allocation2] sm:$0xff] %vm774_vm3, %v4849_v4  ;;  %v5278_v32 = vmul.f32 %v10216_v38, %v11354_v21  ;;  %v10218_v10 = vpop.eup %10217  ;;  %v5784_v18 = vpop.permute.xlu1 %5783  ;;  %v10046_v4 = vld [vmem:[#allocation12 + $0x258] sm:$0xff]  }
0x2515   :  { %9385 = vmatmul.mubr.msk.f32.vlgmr.msra.gmra.mrb[62].mxu0 %vm518_vm2, %v5110_v5  ;;  %v5441_v11 = vmul.f32 %v10218_v10, %v10206_v48 }
0x2516   :  { %9393 = vmatpush3.msra.mxu0 %v11241_v42  ;;  %9394 = vmatprep.mubr.msk.f32.mxu0 %vm10499_vm0, %v10498_v24  ;;  %v10220_v42 = vpop.eup %10219 }
0x2517   :  { %v5019_v8 = vpop.permute.xlu0 %5018  ;;  %9402 = vmatprep.subr.mxu0 %v10498_v24  ;;  %v5612_v12 = vmul.f32 %v10220_v42, %v10210_v50  ;;  %v10222_v3 = vpop.eup %10221  ;;  %v10049_v42 = vld [vmem:[#allocation12 + $0x268] sm:$0xff]  }
0x2518   :  { %5021 = vst.msk [vmem:[#allocation2] sm:$0xff] %vm945_vm4, %v5019_v8  ;;  %v5782_v19 = vmul.f32 %v10222_v3, %v10212_v52  ;;  %v10051_v3 = vld [vmem:[#allocation12 + $0x270] sm:$0xff]  }
0x2519   :  { %9395 = vmatmul.mubr.msk.f32.vlgmr.msra.gmra.mrb[64].mxu0 %vm518_vm2, %v5278_v32 }
0x251a   :  { %9403 = vmatpush3.msra.mxu0 %v5444_v53  ;;  %9404 = vmatprep.mubr.msk.f32.mxu0 %vm10499_vm0, %v10498_v24  ;;  %v10044_v53 = vld [vmem:[#allocation12 + $0x248] sm:$0xff]  }
0x251b   :  { %9412 = vmatprep.subr.mxu0 %v10498_v24 }
0x251d   :  { %9405 = vmatmul.mubr.msk.f32.vlgmr.msra.gmra.mrb[66].mxu0 %vm518_vm2, %v5441_v11 }
0x251e   :  { %9413 = vmatpush3.msra.mxu0 %v5614_v47  ;;  %9414 = vmatprep.mubr.msk.f32.mxu0 %vm10499_vm0, %v10498_v24 }
0x251f   :  { %9422 = vmatprep.subr.mxu0 %v10498_v24 }
0x2521   :  { %9415 = vmatmul.mubr.msk.f32.vlgmr.msra.gmra.mrb[68].mxu0 %vm518_vm2, %v5612_v12  ;;  %v10050_v12 = vld [vmem:[#allocation12 + $0x208] sm:$0xff]  }
0x2522   :  { %9423 = vmatpush3.msra.mxu0 %v5784_v18  ;;  %9424 = vmatprep.mubr.msk.f32.mxu0 %vm10499_vm0, %v10498_v24  ;;  %v10052_v18 = vld [vmem:[#allocation12 + $0x210] sm:$0xff]  }
0x2523   :  { %9447 = vmatprep.subr.bf16.mxu0 %v10498_v24 }
0x2525   :  { %9425 = vmatmul.mubr.msk.f32.vlgmr.msra.gmra.mrb[70].mxu0 %vm518_vm2, %v5782_v19  ;;  %v10053_v19 = vld [vmem:[#allocation12 + $0x278] sm:$0xff]  }
0x2526   :  { %9463 = vmatprep.mubr.msk.bf16.mxu0 %vm10499_vm0, %v10498_v24  ;;  %9448 = vmatpush3.bf16.msra.mxu0 %v10048_v61  ;;  %v10061_v61 = vld [vmem:[#allocation12 + $0x290] sm:$0xff]  }
0x2527   :  { %9449 = vmatprep.subr.bf16.mxu0 %v10498_v24 }
0x252a   :  { %9450 = vmatpush3.bf16.msra.mxu0 %v10050_v12  ;;  %v10064_v12 = vld [vmem:[#allocation12 + $0x2a8] sm:$0xff]  }
0x252b   :  { %9451 = vmatprep.subr.bf16.mxu0 %v10498_v24 }
0x252e   :  { %9452 = vmatpush3.bf16.msra.mxu0 %v10052_v18  ;;  %v10066_v18 = vld [vmem:[#allocation12 + $0x2b8] sm:$0xff]  }
0x252f   :  { %9453 = vmatprep.subr.bf16.mxu0 %v10498_v24 }
0x2532   :  { %9454 = vmatpush3.bf16.msra.mxu0 %v10054_v13 }
0x2533   :  { %9455 = vmatprep.subr.bf16.mxu0 %v10498_v24 }
0x2536   :  { %9456 = vmatpush3.bf16.msra.mxu0 %v10055_v15 }
0x2537   :  { %9457 = vmatprep.subr.bf16.mxu0 %v10498_v24 }
0x253a   :  { %9458 = vmatpush3.bf16.msra.mxu0 %v10056_v16 }
0x253b   :  { %9459 = vmatprep.subr.bf16.mxu0 %v10498_v24 }
0x253e   :  { %9460 = vmatpush3.bf16.msra.mxu0 %v10057_v17 }
0x253f   :  { %9461 = vmatprep.subr.bf16.mxu0 %v10498_v24 }
0x2542   :  { %9462 = vmatpush3.bf16.msra.mxu0 %v10058_v20  ;;  %v8605_v20 = vld [vmem:[%s11708_s7 + $0xa] ss:$0 sm:$0xff] }
0x25e8   :  { %v5183_v21 = vpop.f32.mrb[62].mxu0 }
0x25e9   :  { %5188 = vrot.lane.b32.xlu0 %v5183_v21, %s10500_s1  ;;  %v9386_v22 = vpop.f32.mrb[63].mxu0 }
0x25ec   :  { %v5348_v23 = vpop.f32.mrb[64].mxu0 }
0x25ed   :  { %5352 = vst.msk [vmem:[#allocation2 + $0x8] sm:$0xff] %vm441_vm1, %v5348_v23  ;;  %v9396_v9 = vpop.f32.mrb[65].mxu0 }
0x25f0   :  { %v5515_v33 = vpop.f32.mrb[66].mxu0 }
0x25f1   :  { %5520 = vrot.lane.b32.xlu1 %v5515_v33, %s10493_s2  ;;  %v9406_v35 = vpop.f32.mrb[67].mxu0 }
0x25f4   :  { %v5685_v14 = vpop.f32.mrb[68].mxu0 }
0x25f5   :  { %5690 = vrot.lane.b32.xlu1 %v5685_v14, %s10488_s4  ;;  %v9416_v43 = vpop.f32.mrb[69].mxu0 }
0x25f6   :  { %v8583_v43 = vld [vmem:[%s11714_s13 + $0x3] ss:$0 sm:$0xff] }
0x25f8   :  { %v5855_v7 = vpop.f32.mrb[70].mxu0 }
0x25f9   :  { %5860 = vrot.lane.b32.xlu1 %v5855_v7, %s10500_s1  ;;  %v9426_v39 = vpop.f32.mrb[71].mxu0 }
0x265b   :  { %v5189_v40 = vpop.permute.xlu0 %5188 }
0x265c   :  { %5191 = vst.msk [vmem:[#allocation2] sm:$0xff] %vm1116_vm5, %v5189_v40 }
0x2663   :  { %v5521_v41 = vpop.permute.xlu1 %5520  ;;  %v5864_v6 = vld [vmem:[#allocation2] sm:$0xff] }
0x2664   :  { %5523 = vst.msk [vmem:[#allocation2 + $0x8] sm:$0xff] %vm774_vm3, %v5521_v41 }
0x2667   :  { %v5691_v44 = vpop.permute.xlu1 %5690 }
0x2668   :  { %5693 = vst.msk [vmem:[#allocation2 + $0x8] sm:$0xff] %vm945_vm4, %v5691_v44 }
0x266b   :  { %v5861_v48 = vpop.permute.xlu1 %5860 }
0x266c   :  { %5863 = vst.msk [vmem:[#allocation2 + $0x8] sm:$0xff] %vm1116_vm5, %v5861_v48 }
0x2673   :  { %v5865_v45 = vld [vmem:[#allocation2 + $0x8] sm:$0xff] }
0x2674   :  { %v5883_v50 = vpack.c.bf16 %v5865_v45, %v5864_v6  ;;  %v8595_v45 = vld [vmem:[%s11708_s7 + $0x9] ss:$0 sm:$0xff] }
0x2676   :  { %9444 = vmatmul.mubr.bf16.vlgmr.msra.gmra.mrb[68].mxu1 %v5883_v50 }
0x2677   :  { %9483 = vmatprep.mubr.bf16.mxu1 %v10919_v56  ;;  %9468 = vmatpush3.bf16.msra.mxu1 %v10043_v1  ;;  %v10045_v56 = vld [vmem:[#allocation12 + $0x250] sm:$0xff]   ;;  %v10060_v1 = vld [vmem:[#allocation12 + $0x288] sm:$0xff]  }
0x2678   :  { %9469 = vmatprep.subr.bf16.mxu1 %v10044_v53 }
0x267b   :  { %9470 = vmatpush3.bf16.msra.mxu1 %v10044_v53 }
0x267c   :  { %9471 = vmatprep.subr.bf16.mxu1 %v10045_v56 }
0x267f   :  { %9472 = vmatpush3.bf16.msra.mxu1 %v10045_v56 }
0x2680   :  { %9473 = vmatprep.subr.bf16.mxu1 %v10046_v4 }
0x2683   :  { %9474 = vmatpush3.bf16.msra.mxu1 %v10046_v4 }
0x2749   :  { %v5974_v49 = vpop.f32.mrb[68].mxu1 }
0x274a   :  { %v5975_v52 = vadd.f32 %v8571_v51, %v5974_v49  ;;  %v9445_v54 = vpop.f32.mrb[69].mxu1 }
0x274b   :  { %v5977_v57 = vpop.f32.mrb[70].mxu1 }
0x274c   :  { %v5981_v58 = vadd.f32 %v5975_v52, %v11212_v30  ;;  %v5978_v60 = vadd.f32 %v8571_v51, %v5977_v57  ;;  %v9446_v62 = vpop.f32.mrb[71].mxu1  ;;  %v10047_v30 = vld [vmem:[#allocation12 + $0x260] sm:$0xff]  }
0x274d   :  { %9475 = vmatprep.subr.bf16.mxu1 %v10047_v30 }
0x274e   :  { %v5982_v55 = vadd.f32 %v5978_v60, %v11214_v31  ;;  %5987 = vadd.xlane.f32.xlu0 %v5981_v58  ;;  %9476 = vmatpush3.bf16.msra.mxu1 %v10047_v30  ;;  %v8585_v30 = vld [vmem:[%s11708_s7 + $0x8] ss:$0 sm:$0xff] }
0x274f   :  { %9477 = vmatprep.subr.bf16.mxu1 %v10049_v42 }
0x2750   :  { %5989 = vadd.xlane.f32.xlu1 %v5982_v55 }
0x2752   :  { %9478 = vmatpush3.bf16.msra.mxu1 %v10049_v42 }
0x2753   :  { %9479 = vmatprep.subr.bf16.mxu1 %v10051_v3 }
0x2756   :  { %9480 = vmatpush3.bf16.msra.mxu1 %v10051_v3  ;;  %v10065_v3 = vld [vmem:[#allocation12 + $0x2b0] sm:$0xff]  }
0x2757   :  { %9481 = vmatprep.subr.bf16.mxu1 %v10053_v19 }
0x275a   :  { %9482 = vmatpush3.bf16.msra.mxu1 %v10053_v19 }
0x275b   :  { %9695 = vmatprep.subr.bf16.mxu1 %v10501_v2 }
0x275d   :  { %9484 = vmatmul.mubr.bf16.vlgmr.msra.gmra.mrb[72].mxu1 %v10923_v59 }
0x275e   :  { %9511 = vmatprep.mubr.msk.f32.mxu1 %vm10499_vm0, %v10498_v24 }
0x27db   :  { %v5988_v31 = vpop.xlane.xlu0 %5987 }
0x27dc   :  { %v5991_v5 = vmul.f32 0.0078125, %v5988_v31  ;;  %v10062_v31 = vld [vmem:[#allocation12 + $0x298] sm:$0xff]  }
0x27dd   :  { %v5990_v38 = vpop.xlane.xlu1 %5989 }
0x27de   :  { %v5993_v8 = vsub.f32 %v5981_v58, %v5991_v5  ;;  %v5992_v32 = vmul.f32 0.0078125, %v5990_v38 }
0x27e0   :  { %v5994_v10 = vsub.f32 %v5982_v55, %v5992_v32  ;;  %v5995_v11 = vmul.f32 %v5993_v8, %v5993_v8  ;;  %v10059_v55 = vld [vmem:[#allocation12 + $0x280] sm:$0xff]  }
0x27e1   :  { %9487 = vmatprep.subr.bf16.mxu0 %v10059_v55 }
0x27e2   :  { %5997 = vadd.xlane.f32.xlu0 %v5995_v11  ;;  %v5996_v47 = vmul.f32 %v5994_v10, %v5994_v10  ;;  %v10063_v11 = vld [vmem:[#allocation12 + $0x2a0] sm:$0xff]  }
0x27e6   :  { %5999 = vadd.xlane.f32.xlu0 %v5996_v47 }
0x2830   :  { %v9485_v50 = vpop.f32.mrb[72].mxu1 }
0x2831   :  { %v11450_v51 = vadd.f32 %v9485_v50, %v8595_v45  ;;  %v6249_v49 = vpop.f32.mrb[73].mxu1 }
0x2832   :  { %v6250_v52 = vadd.f32 %v8595_v45, %v6249_v49  ;;  %v9486_v54 = vpop.f32.mrb[74].mxu1 }
0x2833   :  { %v11452_v57 = vadd.f32 %v9486_v54, %v8595_v45 }
0x286f   :  { %v5998_v59 = vpop.xlane.xlu0 %5997 }
0x2870   :  { %v6001_v21 = vmul.f32 0.0078125, %v5998_v59 }
0x2872   :  { %v6003_v63 = vadd.f32 1e-05, %v6001_v21 }
0x2873   :  { %v6000_v22 = vpop.xlane.xlu0 %5999 }
0x2874   :  { %10223 = vrsqrt.f32 %v6003_v63  ;;  %v6002_v23 = vmul.f32 0.0078125, %v6000_v22 }
0x2876   :  { %v6004_v26 = vadd.f32 1e-05, %v6002_v23 }
0x2878   :  { %10225 = vrsqrt.f32 %v6004_v26 }
0x287e   :  { %v10224_v9 = vpop.eup %10223 }
0x287f   :  { %v6007_v33 = vmul.f32 %v10224_v9, %v5993_v8 }
0x2881   :  { %v6015_v35 = vmul.f32 %v8582_v28, %v6007_v33 }
0x2882   :  { %v10226_v14 = vpop.eup %10225 }
0x2883   :  { %v6008_v7 = vmul.f32 %v10226_v14, %v5994_v10  ;;  %v11438_v40 = vadd.f32 %v8583_v43, %v6015_v35 }
0x2885   :  { %v6016_v39 = vmul.f32 %v8582_v28, %v6008_v7  ;;  %v6025_v44 = vadd.f32 %v11221_v34, %v11438_v40  ;;  %v6252_v34 = vpop.f32.mrb[75].mxu1 }
0x2886   :  { %v6253_v58 = vadd.f32 %v8595_v45, %v6252_v34 }
0x2887   :  { %v11440_v41 = vadd.f32 %v8583_v43, %v6016_v39 }
0x2888   :  { %v9696_v60 = vpack.c.bf16 %v6253_v58, %v6250_v52  ;;  %v11456_v62 = vpack.i.bf16 %v6253_v58, %v6250_v52 }
0x2889   :  { %v6026_v48 = vadd.f32 %v11228_v37, %v11440_v41  ;;  %v9724_v37 = vpack.c.bf16 %v11452_v57, %v11450_v51 }
0x288a   :  { %9832 = vrot.lane.b32.xlu1 %v11456_v62, %s10500_s1  ;;  %9698 = vmatpush3.bf16.xpose.msk.msra.mxu1 %vm10975_vm6, %v9696_v60 }
0x288b   :  { %v6044_v6 = vpack.c.bf16 %v6026_v48, %v6025_v44  ;;  %9702 = vmatprep.subr.bf16.mxu1 %v10501_v2 }
0x288d   :  { %9464 = vmatmul.mubr.bf16.vlgmr.msra.gmra.mrb[72].mxu0 %v6044_v6 }
0x288e   :  { %9503 = vmatprep.mubr.bf16.mxu0 %v10953_v25  ;;  %v11460_v25 = vpack.i.bf16 %v11452_v57, %v11450_v51  ;;  %9488 = vmatpush3.bf16.msra.mxu0 %v10059_v55 }
0x288f   :  { %9489 = vmatprep.subr.bf16.mxu0 %v10060_v1 }
0x2892   :  { %9490 = vmatpush3.bf16.msra.mxu0 %v10060_v1 }
0x2893   :  { %9491 = vmatprep.subr.bf16.mxu0 %v10061_v61 }
0x2896   :  { %9492 = vmatpush3.bf16.msra.mxu0 %v10061_v61 }
0x2897   :  { %9493 = vmatprep.subr.bf16.mxu0 %v10062_v31 }
0x289a   :  { %9494 = vmatpush3.bf16.msra.mxu0 %v10062_v31 }
0x289b   :  { %9495 = vmatprep.subr.bf16.mxu0 %v10063_v11 }
0x289e   :  { %9496 = vmatpush3.bf16.msra.mxu0 %v10063_v11 }
0x289f   :  { %9497 = vmatprep.subr.bf16.mxu0 %v10064_v12 }
0x28a2   :  { %9498 = vmatpush3.bf16.msra.mxu0 %v10064_v12 }
0x28a3   :  { %9499 = vmatprep.subr.bf16.mxu0 %v10065_v3 }
0x28a6   :  { %9500 = vmatpush3.bf16.msra.mxu0 %v10065_v3 }
0x28a7   :  { %9501 = vmatprep.subr.bf16.mxu0 %v10066_v18 }
0x28aa   :  { %9502 = vmatpush3.bf16.msra.mxu0 %v10066_v18 }
0x28ab   :  { %9699 = vmatprep.subr.bf16.mxu0 %v10501_v2 }
0x28ad   :  { %9504 = vmatmul.mubr.bf16.vlgmr.msra.gmra.mrb[76].mxu0 %v10958_v36 }
0x28ae   :  { %9518 = vmatprep.mubr.msk.f32.mxu0 %vm10499_vm0, %v10498_v24 }
0x28fc   :  { %v9833_v53 = vpop.permute.xlu1 %9832 }
0x28fd   :  { %v9835_v56 = vunpack.i.h.bf16 %v9833_v53  ;;  %v9834_v4 = vunpack.i.l.bf16 %v9833_v53 }
0x28ff   :  { %v9703_v38 = vpack.c.bf16 %v9835_v56, %v9834_v4 }
0x2960   :  { %v6135_v5 = vpop.f32.mrb[72].mxu0 }
0x2961   :  { %v11470_v8 = vadd.f32 %v8585_v30, %v6135_v5  ;;  %v9465_v32 = vpop.f32.mrb[73].mxu0 }
0x2962   :  { %v6138_v10 = vpop.f32.mrb[74].mxu0 }
0x2963   :  { %v11472_v47 = vadd.f32 %v8585_v30, %v6138_v10  ;;  %6550 = vrot.lane.b32.xlu0 %v11470_v8, %s10500_s1  ;;  %v9466_v42 = vpop.f32.mrb[75].mxu0  ;;  %9512 = vmatmul.mubr.msk.f32.vlgmr.msra.gmra.mrb[76].mxu1 %vm441_vm1, %v11470_v8 }
0x2964   :  { %9705 = vmatpush3.bf16.xpose.msk.msra.mxu1 %vm10975_vm6, %v9703_v38  ;;  %9525 = vmatprep.mubr.msk.f32.mxu1 %vm10499_vm0, %v10498_v24 }
0x2965   :  { %9713 = vmatprep.subr.bf16.mxu1 %v10501_v2 }
0x2980   :  { %v9505_v17 = vpop.f32.mrb[76].mxu0 }
0x2981   :  { %v11494_v36 = vadd.f32 %v9505_v17, %v8605_v20  ;;  %v6371_v59 = vpop.f32.mrb[77].mxu0 }
0x2982   :  { %v9506_v21 = vpop.f32.mrb[78].mxu0  ;;  %v6372_v7 = vadd.f32 %v8605_v20, %v6371_v59 }
0x2983   :  { %v11496_v63 = vadd.f32 %v9506_v21, %v8605_v20  ;;  %v6374_v22 = vpop.f32.mrb[79].mxu0 }
0x2984   :  { %v6375_v39 = vadd.f32 %v8605_v20, %v6374_v22 }
0x2985   :  { %v9728_v48 = vpack.c.bf16 %v11496_v63, %v11494_v36  ;;  %v11504_v6 = vpack.i.bf16 %v11496_v63, %v11494_v36 }
0x2986   :  { %v9700_v44 = vpack.c.bf16 %v6375_v39, %v6372_v7  ;;  %v11506_v45 = vpack.i.bf16 %v6375_v39, %v6372_v7 }
0x2988   :  { %9701 = vmatpush3.bf16.msra.mxu0 %v9700_v44 }
0x2989   :  { %9706 = vmatprep.subr.bf16.mxu0 %v10501_v2 }
0x29d5   :  { %v6551_v19 = vpop.permute.xlu0 %6550 }
0x29d6   :  { %9526 = vmatmul.mubr.msk.f32.vlgmr.msra.gmra.mrb[78].mxu1 %vm441_vm1, %v6551_v19 }
0x29d7   :  { %9546 = vmatprep.mubr.msk.f32.mxu1 %vm10499_vm0, %v10498_v24 }
0x2a36   :  { %v6461_v13 = vpop.f32.mrb[76].mxu1 }
0x2a37   :  { %v9513_v15 = vpop.f32.mrb[77].mxu1  ;;  %v6465_v16 = vsel %vm2394_vm7, %v6461_v13, -inf }
0x2a38   :  { %6466 = vmax.xlane.f32.xlu1 %v6465_v16 }
0x2aa9   :  { %v6628_v23 = vpop.f32.mrb[78].mxu1 }
0x2aaa   :  { %v9527_v26 = vpop.f32.mrb[79].mxu1  ;;  %v6632_v9 = vsel %vm2394_vm7, %v6628_v23, -inf }
0x2aab   :  { %6633 = vmax.xlane.f32.xlu0 %v6632_v9 }
0x2ac5   :  { %v6467_v28 = vpop.xlane.xlu1 %6466 }
0x2ac6   :  { %v6468_v33 = vsub.f32 %v6461_v13, %v6467_v28 }
0x2ac8   :  { %v6469_v35 = vmul.f32 1.442695, %v6468_v33 }
0x2aca   :  { %10227 = vpow2.f32 %v6469_v35 }
0x2ad4   :  { %v10228_v14 = vpop.eup %10227 }
0x2ad5   :  { %v6471_v43 = vsel %vm2394_vm7, %v10228_v14, 0.0 }
0x2ad6   :  { %6472 = vadd.xlane.f32.xlu1 %v6471_v43 }
0x2ae7   :  { %9837 = vrot.lane.b32.xlu1 %v11506_v45, %s10500_s1 }
0x2aeb   :  { %6729 = vrot.lane.b32.xlu1 %v11470_v8, %s10488_s4 }
0x2b38   :  { %v6634_v50 = vpop.xlane.xlu0 %6633 }
0x2b39   :  { %v6635_v49 = vsub.f32 %v6628_v23, %v6634_v50 }
0x2b3b   :  { %v6636_v52 = vmul.f32 1.442695, %v6635_v49 }
0x2b3d   :  { %10229 = vpow2.f32 %v6636_v52 }
0x2b47   :  { %v10230_v54 = vpop.eup %10229 }
0x2b48   :  { %v6638_v34 = vsel %vm2394_vm7, %v10230_v54, 0.0 }
0x2b49   :  { %6639 = vadd.xlane.f32.xlu0 %v6638_v34 }
0x2b5f   :  { %9842 = vrot.lane.b32.xlu0 %v11456_v62, %s10488_s4 }
0x2b63   :  { %v6473_v58 = vpop.xlane.xlu1 %6472 }
0x2b64   :  { %10231 = vrcp.f32 %v6473_v58 }
0x2b67   :  { %v9838_v60 = vpop.permute.xlu1 %9837 }
0x2b68   :  { %v9840_v55 = vunpack.i.h.bf16 %v9838_v60  ;;  %v9839_v1 = vunpack.i.l.bf16 %v9838_v60 }
0x2b6a   :  { %v9707_v61 = vpack.c.bf16 %v9840_v55, %v9839_v1 }
0x2b6b   :  { %v6730_v11 = vpop.permute.xlu1 %6729 }
0x2b6e   :  { %v10232_v53 = vpop.eup %10231 }
0x2b6f   :  { %v6475_v56 = vmul.f32 %v10232_v53, %v10228_v14 }
0x2b71   :  { %9519 = vmatmul.mubr.msk.f32.vlgmr.msra.gmra.mrb[80].mxu0 %vm2394_vm7, %v6475_v56 }
0x2b72   :  { %9708 = vmatpush3.bf16.msra.mxu0 %v9707_v61  ;;  %9532 = vmatprep.mubr.msk.f32.mxu0 %vm10499_vm0, %v10498_v24 }
0x2b73   :  { %9709 = vmatprep.subr.bf16.mxu0 %v10501_v2 }
0x2bd6   :  { %v6640_v4 = vpop.xlane.xlu0 %6639 }
0x2bd7   :  { %10233 = vrcp.f32 %v6640_v4 }
0x2bda   :  { %v9843_v30 = vpop.permute.xlu0 %9842 }
0x2bdb   :  { %v9845_v31 = vunpack.i.h.bf16 %v9843_v30  ;;  %v9844_v5 = vunpack.i.l.bf16 %v9843_v30 }
0x2bdd   :  { %v9710_v10 = vpack.c.bf16 %v9845_v31, %v9844_v5 }
0x2be1   :  { %v10234_v38 = vpop.eup %10233 }
0x2be2   :  { %v6642_v32 = vmul.f32 %v10234_v38, %v10230_v54 }
0x2be4   :  { %9533 = vmatmul.mubr.msk.f32.vlgmr.msra.gmra.mrb[82].mxu0 %vm2394_vm7, %v6642_v32 }
0x2be5   :  { %9712 = vmatpush3.bf16.xpose.msk.msra.mxu0 %vm10975_vm6, %v9710_v10  ;;  %9539 = vmatprep.mubr.msk.f32.mxu0 %vm10499_vm0, %v10498_v24 }
0x2be6   :  { %9720 = vmatprep.subr.bf16.mxu0 %v10501_v2 }
0x2bec   :  { %9540 = vmatmul.mubr.msk.f32.vlgmr.msra.gmra.mrb[84].mxu0 %vm441_vm1, %v6730_v11 }
0x2bed   :  { %9560 = vmatprep.mubr.msk.f32.mxu0 %vm10499_vm0, %v10498_v24 }
0x2c44   :  { %v6545_v42 = vpop.f32.mrb[80].mxu0 }
0x2c45   :  { %6549 = vst.msk [vmem:[#allocation2] sm:$0xff] %vm441_vm1, %v6545_v42  ;;  %v9520_v12 = vpop.f32.mrb[81].mxu0 }
0x2cb7   :  { %v11530_v3 = vpop.f32.mrb[82].mxu0 }
0x2cb8   :  { %v9534_v18 = vpop.f32.mrb[83].mxu0 }
0x2cbf   :  { %v6807_v19 = vpop.f32.mrb[84].mxu0 }
0x2cc0   :  { %v9541_v13 = vpop.f32.mrb[85].mxu0  ;;  %v6811_v15 = vsel %vm2394_vm7, %v6807_v19, -inf }
0x2cc1   :  { %6812 = vmax.xlane.f32.xlu1 %v6811_v15 }
0x2cd2   :  { %9852 = vrot.lane.b32.xlu1 %v11456_v62, %s10493_s2 }
0x2cd6   :  { %6906 = vrot.lane.b32.xlu1 %v11470_v8, %s10493_s2 }
0x2d4e   :  { %v6813_v16 = vpop.xlane.xlu1 %6812 }
0x2d4f   :  { %v6814_v17 = vsub.f32 %v6807_v19, %v6813_v16 }
0x2d51   :  { %v6815_v20 = vmul.f32 1.442695, %v6814_v17 }
0x2d52   :  { %v9853_v28 = vpop.permute.xlu1 %9852 }
0x2d53   :  { %10235 = vpow2.f32 %v6815_v20  ;;  %v9855_v33 = vunpack.i.h.bf16 %v9853_v28  ;;  %v9854_v35 = vunpack.i.l.bf16 %v9853_v28 }
0x2d55   :  { %v9717_v43 = vpack.c.bf16 %v9855_v33, %v9854_v35 }
0x2d56   :  { %v6907_v7 = vpop.permute.xlu1 %6906 }
0x2d5d   :  { %v10236_v59 = vpop.eup %10235 }
0x2d5e   :  { %v6817_v21 = vsel %vm2394_vm7, %v10236_v59, 0.0 }
0x2d5f   :  { %6818 = vadd.xlane.f32.xlu0 %v6817_v21 }
0x2d75   :  { %9847 = vrot.lane.b32.xlu0 %v11506_v45, %s10488_s4 }
0x2dec   :  { %v6819_v22 = vpop.xlane.xlu0 %6818 }
0x2ded   :  { %10237 = vrcp.f32 %v6819_v22 }
0x2df0   :  { %v9848_v23 = vpop.permute.xlu0 %9847 }
0x2df1   :  { %v9850_v26 = vunpack.i.h.bf16 %v9848_v23  ;;  %v9849_v9 = vunpack.i.l.bf16 %v9848_v23 }
0x2df3   :  { %v9714_v62 = vpack.c.bf16 %v9850_v26, %v9849_v9 }
0x2df5   :  { %9715 = vmatpush3.bf16.msra.mxu1 %v9714_v62 }
0x2df6   :  { %9716 = vmatprep.subr.bf16.mxu1 %v10501_v2 }
0x2df7   :  { %v10238_v8 = vpop.eup %10237 }
0x2df8   :  { %v6821_v14 = vmul.f32 %v10238_v8, %v10236_v59 }
0x2dfa   :  { %9547 = vmatmul.mubr.msk.f32.vlgmr.msra.gmra.mrb[80].mxu1 %vm2394_vm7, %v6821_v14 }
0x2dfb   :  { %9553 = vmatprep.mubr.msk.f32.mxu1 %vm10499_vm0, %v10498_v24 }
0x2dfe   :  { %9719 = vmatpush3.bf16.xpose.msk.msra.mxu1 %vm10975_vm6, %v9717_v43 }
0x2dff   :  { %9727 = vmatprep.subr.bf16.mxu1 %v10501_v2 }
0x2e05   :  { %9554 = vmatmul.mubr.msk.f32.vlgmr.msra.gmra.mrb[82].mxu1 %vm441_vm1, %v6907_v7 }
0x2e06   :  { %9729 = vmatpush3.bf16.msra.mxu1 %v9728_v48  ;;  %9574 = vmatprep.mubr.msk.f32.mxu1 %vm10499_vm0, %v10498_v24 }
0x2e07   :  { %9730 = vmatprep.subr.bf16.mxu1 %v10501_v2 }
0x2ecd   :  { %v11554_v39 = vpop.f32.mrb[80].mxu1 }
0x2ece   :  { %v9548_v44 = vpop.f32.mrb[81].mxu1 }
0x2ed8   :  { %v6984_v50 = vpop.f32.mrb[82].mxu1 }
0x2ed9   :  { %v9555_v49 = vpop.f32.mrb[83].mxu1  ;;  %v6988_v52 = vsel %vm2394_vm7, %v6984_v50, -inf }
0x2eda   :  { %6989 = vmax.xlane.f32.xlu0 %v6988_v52 }
0x2ef0   :  { %9857 = vrot.lane.b32.xlu0 %v11506_v45, %s10493_s2 }
0x2ef4   :  { %7247 = vrot.lane.b32.xlu0 %v11472_v47, %s10500_s1 }
0x2f67   :  { %v6990_v36 = vpop.xlane.xlu0 %6989 }
0x2f68   :  { %v6991_v63 = vsub.f32 %v6984_v50, %v6990_v36 }
0x2f6a   :  { %v6992_v48 = vmul.f32 1.442695, %v6991_v63 }
0x2f6b   :  { %v9858_v54 = vpop.permute.xlu0 %9857 }
0x2f6c   :  { %10239 = vpow2.f32 %v6992_v48  ;;  %v9860_v34 = vunpack.i.h.bf16 %v9858_v54  ;;  %v9859_v58 = vunpack.i.l.bf16 %v9858_v54 }
0x2f6e   :  { %v9721_v60 = vpack.c.bf16 %v9860_v34, %v9859_v58 }
0x2f6f   :  { %v7248_v15 = vpop.permute.xlu0 %7247 }
0x2f70   :  { %9722 = vmatpush3.bf16.msra.mxu0 %v9721_v60 }
0x2f71   :  { %9723 = vmatprep.subr.bf16.mxu0 %v10501_v2 }
0x2f76   :  { %v10240_v55 = vpop.eup %10239 }
0x2f77   :  { %v6994_v1 = vsel %vm2394_vm7, %v10240_v55, 0.0 }
0x2f78   :  { %6995 = vadd.xlane.f32.xlu1 %v6994_v1 }
0x3005   :  { %v6996_v53 = vpop.xlane.xlu1 %6995 }
0x3006   :  { %10241 = vrcp.f32 %v6996_v53 }
0x3010   :  { %v10242_v45 = vpop.eup %10241 }
0x3011   :  { %v6998_v61 = vmul.f32 %v10242_v45, %v10240_v55 }
0x3013   :  { %9561 = vmatmul.mubr.msk.f32.vlgmr.msra.gmra.mrb[86].mxu0 %vm2394_vm7, %v6998_v61 }
0x3014   :  { %9726 = vmatpush3.bf16.xpose.msk.msra.mxu0 %vm10975_vm6, %v9724_v37  ;;  %9567 = vmatprep.mubr.msk.f32.mxu0 %vm10499_vm0, %v10498_v24 }
0x3015   :  { %9734 = vmatprep.subr.bf16.mxu0 %v10501_v2 }
0x301b   :  { %9568 = vmatmul.mubr.msk.f32.vlgmr.msra.gmra.mrb[88].mxu0 %vm441_vm1, %v11472_v47 }
0x301c   :  { %9588 = vmatprep.mubr.msk.f32.mxu0 %vm10499_vm0, %v10498_v24 }
0x30e6   :  { %v11576_v56 = vpop.f32.mrb[86].mxu0 }
0x30e7   :  { %v9562_v4 = vpop.f32.mrb[87].mxu0 }
0x30ee   :  { %v7158_v30 = vpop.f32.mrb[88].mxu0 }
0x30ef   :  { %v9569_v31 = vpop.f32.mrb[89].mxu0  ;;  %v7162_v51 = vsel %vm2394_vm7, %v7158_v30, -inf }
0x30f0   :  { %7163 = vmax.xlane.f32.xlu1 %v7162_v51 }
0x317d   :  { %v7164_v57 = vpop.xlane.xlu1 %7163 }
0x317e   :  { %v7165_v37 = vsub.f32 %v7158_v30, %v7164_v57 }
0x3180   :  { %v7166_v5 = vmul.f32 1.442695, %v7165_v37 }
0x3182   :  { %10243 = vpow2.f32 %v7166_v5 }
0x318c   :  { %v10244_v38 = vpop.eup %10243 }
0x318d   :  { %v7168_v32 = vsel %vm2394_vm7, %v10244_v38, 0.0 }
0x318e   :  { %7169 = vadd.xlane.f32.xlu1 %v7168_v32 }
0x319f   :  { %9862 = vrot.lane.b32.xlu1 %v11460_v25, %s10500_s1 }
0x321b   :  { %v7170_v10 = vpop.xlane.xlu1 %7169 }
0x321c   :  { %10245 = vrcp.f32 %v7170_v10 }
0x321f   :  { %v9863_v11 = vpop.permute.xlu1 %9862 }
0x3220   :  { %v9865_v42 = vunpack.i.h.bf16 %v9863_v11  ;;  %v9864_v12 = vunpack.i.l.bf16 %v9863_v11 }
0x3222   :  { %v9731_v13 = vpack.c.bf16 %v9865_v42, %v9864_v12 }
0x3226   :  { %v10246_v18 = vpop.eup %10245 }
0x3227   :  { %v7172_v19 = vmul.f32 %v10246_v18, %v10244_v38 }
0x3229   :  { %9575 = vmatmul.mubr.msk.f32.vlgmr.msra.gmra.mrb[84].mxu1 %vm2394_vm7, %v7172_v19 }
0x322a   :  { %9733 = vmatpush3.bf16.xpose.msk.msra.mxu1 %vm10975_vm6, %v9731_v13  ;;  %9581 = vmatprep.mubr.msk.f32.mxu1 %vm10499_vm0, %v10498_v24 }
0x322b   :  { %9741 = vmatprep.subr.bf16.mxu1 %v10501_v2 }
0x3231   :  { %9582 = vmatmul.mubr.msk.f32.vlgmr.msra.gmra.mrb[86].mxu1 %vm441_vm1, %v7248_v15 }
0x3232   :  { %9602 = vmatprep.mubr.msk.f32.mxu1 %vm10499_vm0, %v10498_v24 }
0x32fc   :  { %v7242_v16 = vpop.f32.mrb[84].mxu1 }
0x32fd   :  { %7246 = vst.msk [vmem:[#allocation2 + $0x8] sm:$0xff] %vm441_vm1, %v7242_v16  ;;  %v9576_v17 = vpop.f32.mrb[85].mxu1 }
0x3304   :  { %v7325_v20 = vpop.f32.mrb[86].mxu1 }
0x3305   :  { %v9583_v59 = vpop.f32.mrb[87].mxu1  ;;  %v7329_v21 = vsel %vm2394_vm7, %v7325_v20, -inf }
0x3306   :  { %7330 = vmax.xlane.f32.xlu0 %v7329_v21 }
0x331c   :  { %9867 = vrot.lane.b32.xlu0 %v11504_v6, %s10500_s1 }
0x3320   :  { %7426 = vrot.lane.b32.xlu0 %v11472_v47, %s10488_s4 }
0x3393   :  { %v7331_v22 = vpop.xlane.xlu0 %7330 }
0x3394   :  { %v7332_v23 = vsub.f32 %v7325_v20, %v7331_v22 }
0x3396   :  { %v7333_v26 = vmul.f32 1.442695, %v7332_v23 }
0x3397   :  { %v9868_v9 = vpop.permute.xlu0 %9867 }
0x3398   :  { %10247 = vpow2.f32 %v7333_v26  ;;  %v9870_v62 = vunpack.i.h.bf16 %v9868_v9  ;;  %v9869_v28 = vunpack.i.l.bf16 %v9868_v9 }
0x339a   :  { %v9735_v8 = vpack.c.bf16 %v9870_v62, %v9869_v28  ;;  %v10069_v62 = vld [vmem:[#allocation12 + $0x2d0] sm:$0xff]   ;;  %v10070_v28 = vld [vmem:[#allocation12 + $0x2d8] sm:$0xff]  }
0x339b   :  { %v7427_v36 = vpop.permute.xlu0 %7426 }
0x339c   :  { %9736 = vmatpush3.bf16.msra.mxu0 %v9735_v8  ;;  %v10071_v8 = vld [vmem:[#allocation12 + $0x2e0] sm:$0xff]  }
0x339d   :  { %9737 = vmatprep.subr.bf16.mxu0 %v10501_v2 }
0x33a2   :  { %v10248_v33 = vpop.eup %10247 }
0x33a3   :  { %v7335_v35 = vsel %vm2394_vm7, %v10248_v33, 0.0 }
0x33a4   :  { %7336 = vadd.xlane.f32.xlu1 %v7335_v35  ;;  %v10073_v35 = vld [vmem:[#allocation12 + $0x2f0] sm:$0xff]  }
0x33b5   :  { %9872 = vrot.lane.b32.xlu1 %v11460_v25, %s10488_s4 }
0x3431   :  { %v7337_v14 = vpop.xlane.xlu1 %7336 }
0x3432   :  { %10249 = vrcp.f32 %v7337_v14  ;;  %v10074_v14 = vld [vmem:[#allocation12 + $0x2f8] sm:$0xff]  }
0x3435   :  { %v9873_v43 = vpop.permute.xlu1 %9872 }
0x3436   :  { %v9875_v7 = vunpack.i.h.bf16 %v9873_v43  ;;  %v9874_v44 = vunpack.i.l.bf16 %v9873_v43 }
0x3438   :  { %v9738_v52 = vpack.c.bf16 %v9875_v7, %v9874_v44 }
0x343c   :  { %v10250_v50 = vpop.eup %10249 }
0x343d   :  { %v7339_v49 = vmul.f32 %v10250_v50, %v10248_v33  ;;  %v10072_v33 = vld [vmem:[#allocation12 + $0x2e8] sm:$0xff]  }
0x343f   :  { %9589 = vmatmul.mubr.msk.f32.vlgmr.msra.gmra.mrb[90].mxu0 %vm2394_vm7, %v7339_v49 }
0x3440   :  { %9740 = vmatpush3.bf16.xpose.msk.msra.mxu0 %vm10975_vm6, %v9738_v52  ;;  %9595 = vmatprep.mubr.msk.f32.mxu0 %vm10499_vm0, %v10498_v24 }
0x3441   :  { %9748 = vmatprep.subr.bf16.mxu0 %v10501_v2 }
0x3447   :  { %9596 = vmatmul.mubr.msk.f32.vlgmr.msra.gmra.mrb[92].mxu0 %vm441_vm1, %v7427_v36  ;;  %v8647_v36 = vld [vmem:[%s11708_s7 + $0xb] ss:$0 sm:$0xff] }
0x3448   :  { %9616 = vmatprep.mubr.msk.f32.mxu0 %vm10499_vm0, %v10498_v24 }
0x3512   :  { %v7417_v63 = vpop.f32.mrb[90].mxu0 }
0x3513   :  { %v9590_v48 = vpop.f32.mrb[91].mxu0 }
0x351a   :  { %v7504_v54 = vpop.f32.mrb[92].mxu0 }
0x351b   :  { %v9597_v34 = vpop.f32.mrb[93].mxu0  ;;  %v7508_v58 = vsel %vm2394_vm7, %v7504_v54, -inf }
0x351c   :  { %7509 = vmax.xlane.f32.xlu0 %v7508_v58 }
0x3532   :  { %9877 = vrot.lane.b32.xlu0 %v11504_v6, %s10488_s4 }
0x3536   :  { %7603 = vrot.lane.b32.xlu0 %v11472_v47, %s10493_s2 }
0x35a9   :  { %v7510_v60 = vpop.xlane.xlu0 %7509 }
0x35aa   :  { %v7511_v55 = vsub.f32 %v7504_v54, %v7510_v60 }
0x35ac   :  { %v7512_v1 = vmul.f32 1.442695, %v7511_v55 }
0x35ad   :  { %v9878_v53 = vpop.permute.xlu0 %9877 }
0x35ae   :  { %10251 = vpow2.f32 %v7512_v1  ;;  %v9880_v45 = vunpack.i.h.bf16 %v9878_v53  ;;  %v9879_v61 = vunpack.i.l.bf16 %v9878_v53  ;;  %v10075_v1 = vld [vmem:[#allocation14 + $0x80] ss:$8 sps:$4 sm:$0xff]   ;;  %v10077_v53 = vld [vmem:[#allocation14 + $0x84] ss:$8 sps:$4 sm:$0xff]  }
0x35b0   :  { %v9742_v4 = vpack.c.bf16 %v9880_v45, %v9879_v61  ;;  %v10080_v45 = vld [vmem:[#allocation14 + $0x94] ss:$8 sps:$4 sm:$0xff]   ;;  %v10078_v61 = vld [vmem:[#allocation14 + $0x90] ss:$8 sps:$4 sm:$0xff]  }
0x35b2   :  { %9743 = vmatpush3.bf16.msra.mxu1 %v9742_v4 }
0x35b3   :  { %9744 = vmatprep.subr.bf16.mxu1 %v10501_v2  ;;  %v7604_v2 = vpop.permute.xlu0 %7603 }
0x35b8   :  { %v10252_v30 = vpop.eup %10251 }
0x35b9   :  { %v7514_v31 = vsel %vm2394_vm7, %v10252_v30, 0.0 }
0x35ba   :  { %7515 = vadd.xlane.f32.xlu1 %v7514_v31 }
0x35cb   :  { %9882 = vrot.lane.b32.xlu1 %v11460_v25, %s10493_s2 }
0x3647   :  { %v7516_v51 = vpop.xlane.xlu1 %7515 }
0x3648   :  { %10253 = vrcp.f32 %v7516_v51 }
0x364b   :  { %v9883_v47 = vpop.permute.xlu1 %9882 }
0x364c   :  { %v9885_v57 = vunpack.i.h.bf16 %v9883_v47  ;;  %v9884_v37 = vunpack.i.l.bf16 %v9883_v47 }
0x364e   :  { %v9745_v32 = vpack.c.bf16 %v9885_v57, %v9884_v37  ;;  %v10083_v37 = vld [vmem:[#allocation14 + $0xa4] ss:$8 sps:$4 sm:$0xff]  }
0x3652   :  { %v10254_v5 = vpop.eup %10253 }
0x3653   :  { %v7518_v38 = vmul.f32 %v10254_v5, %v10252_v30  ;;  %v10081_v5 = vld [vmem:[#allocation14 + $0xa0] ss:$8 sps:$4 sm:$0xff]  }
0x3655   :  { %9603 = vmatmul.mubr.msk.f32.vlgmr.msra.gmra.mrb[88].mxu1 %vm2394_vm7, %v7518_v38  ;;  %v10086_v38 = vld [vmem:[#allocation14 + $0xb4] ss:$8 sps:$4 sm:$0xff]  }
0x3656   :  { %9747 = vmatpush3.bf16.xpose.msk.msra.mxu1 %vm10975_vm6, %v9745_v32  ;;  %9609 = vmatprep.mubr.msk.f32.mxu1 %vm10499_vm0, %v10498_v24  ;;  %v10084_v32 = vld [vmem:[#allocation14 + $0xb0] ss:$8 sps:$4 sm:$0xff]  }
0x3657   :  { %8052 = vmatprep.subr.bf16.mxu1 %v10077_v53 }
0x365d   :  { %9610 = vmatmul.mubr.msk.f32.vlgmr.msra.gmra.mrb[90].mxu1 %vm441_vm1, %v7604_v2  ;;  %v10089_v2 = vld [vmem:[#allocation14 + $0xc4] ss:$8 sps:$4 sm:$0xff]  }
0x365e   :  { %8084 = vmatprep.mubr.bf16.mxu1 %v10497_v0  ;;  %8053 = vmatpush1.bf16.msra.mxu1 %v10075_v1 }
0x365f   :  { %8054 = vmatprep.subr.bf16.mxu1 %v10080_v45 }
0x3662   :  { %8055 = vmatpush1.bf16.msra.mxu1 %v10078_v61 }
0x3663   :  { %8056 = vmatprep.subr.bf16.mxu1 %v10083_v37 }
0x3666   :  { %8057 = vmatpush1.bf16.msra.mxu1 %v10081_v5 }
0x3667   :  { %8058 = vmatprep.subr.bf16.mxu1 %v10086_v38 }
0x366a   :  { %8059 = vmatpush1.bf16.msra.mxu1 %v10084_v32 }
0x366b   :  { %8060 = vmatprep.subr.bf16.mxu1 %v10089_v2 }
0x3728   :  { %v7594_v25 = vpop.f32.mrb[88].mxu1 }
0x3729   :  { %v9604_v10 = vpop.f32.mrb[89].mxu1 }
0x372a   :  { %v10092_v10 = vld [vmem:[#allocation14 + $0xd4] ss:$8 sps:$4 sm:$0xff]  }
0x3730   :  { %v7681_v11 = vpop.f32.mrb[90].mxu1 }
0x3731   :  { %v9611_v42 = vpop.f32.mrb[91].mxu1  ;;  %v7685_v12 = vsel %vm2394_vm7, %v7681_v11, -inf }
0x3732   :  { %7686 = vmax.xlane.f32.xlu1 %v7685_v12  ;;  %v10095_v42 = vld [vmem:[#allocation14 + $0xe4] ss:$8 sps:$4 sm:$0xff]   ;;  %v10093_v12 = vld [vmem:[#allocation14 + $0xe0] ss:$8 sps:$4 sm:$0xff]  }
0x3743   :  { %6725 = vrot.lane.b32.xlu1 %v11530_v3, %s10493_s2 }
0x3747   :  { %7422 = vrot.lane.b32.xlu1 %v7417_v63, %s10493_s2 }
0x374b   :  { %7599 = vrot.lane.b32.xlu1 %v7594_v25, %s10488_s4  ;;  %v10087_v25 = vld [vmem:[#allocation14 + $0xc0] ss:$8 sps:$4 sm:$0xff]  }
0x374c   :  { %8061 = vmatpush1.bf16.msra.mxu1 %v10087_v25 }
0x374d   :  { %8062 = vmatprep.subr.bf16.mxu1 %v10092_v10 }
0x37bf   :  { %v7687_v46 = vpop.xlane.xlu1 %7686 }
0x37c0   :  { %v7688_v18 = vsub.f32 %v7681_v11, %v7687_v46  ;;  %v10090_v11 = vld [vmem:[#allocation14 + $0xd0] ss:$8 sps:$4 sm:$0xff]   ;;  %v10098_v46 = vld [vmem:[#allocation14 + $0xf4] ss:$8 sps:$4 sm:$0xff]  }
0x37c1   :  { %8063 = vmatpush1.bf16.msra.mxu1 %v10090_v11 }
0x37c2   :  { %v7689_v19 = vmul.f32 1.442695, %v7688_v18  ;;  %8064 = vmatprep.subr.bf16.mxu1 %v10095_v42  ;;  %v10096_v18 = vld [vmem:[#allocation14 + $0xf0] ss:$8 sps:$4 sm:$0xff]  }
0x37c3   :  { %v6726_v13 = vpop.permute.xlu1 %6725 }
0x37c4   :  { %10255 = vpow2.f32 %v7689_v19  ;;  %6728 = vst.msk [vmem:[#allocation2] sm:$0xff] %vm774_vm3, %v6726_v13  ;;  %v10099_v19 = vld [vmem:[#allocation15 + $0xc0] sm:$0xff]  }
0x37c5   :  { %8065 = vmatpush1.bf16.msra.mxu1 %v10093_v12  ;;  %v10100_v13 = vld [vmem:[#allocation15 + $0x80] sm:$0xff]  }
0x37c6   :  { %8066 = vmatprep.subr.bf16.mxu1 %v10098_v46 }
0x37c7   :  { %v7423_v0 = vpop.permute.xlu1 %7422 }
0x37c8   :  { %7425 = vst.msk [vmem:[#allocation2 + $0x8] sm:$0xff] %vm774_vm3, %v7423_v0  ;;  %v10101_v0 = vld [vmem:[#allocation15 + $0xc8] sm:$0xff]  }
0x37c9   :  { %8067 = vmatpush1.bf16.msra.mxu1 %v10096_v18 }
0x37cb   :  { %v7600_v15 = vpop.permute.xlu1 %7599 }
0x37cc   :  { %7602 = vst.msk [vmem:[#allocation2 + $0x8] sm:$0xff] %vm945_vm4, %v7600_v15  ;;  %v10102_v15 = vld [vmem:[#allocation15 + $0x88] sm:$0xff]  }
0x37ce   :  { %v10256_v16 = vpop.eup %10255 }
0x37cf   :  { %v7691_v3 = vsel %vm2394_vm7, %v10256_v16, 0.0 }
0x37d0   :  { %7692 = vadd.xlane.f32.xlu0 %v7691_v3  ;;  %v10104_v3 = vld [vmem:[#allocation15 + $0x90] sm:$0xff]  }
0x37e6   :  { %9887 = vrot.lane.b32.xlu0 %v11504_v6, %s10493_s2 }
0x37ea   :  { %6902 = vrot.lane.b32.xlu0 %v11554_v39, %s10488_s4  ;;  %v10067_v39 = vld [vmem:[#allocation12 + $0x2c0] sm:$0xff]  }
0x37ee   :  { %7079 = vrot.lane.b32.xlu0 %v11576_v56, %s10500_s1  ;;  %v10068_v56 = vld [vmem:[#allocation12 + $0x2c8] sm:$0xff]  }
0x385d   :  { %v7693_v17 = vpop.xlane.xlu0 %7692 }
0x385e   :  { %10257 = vrcp.f32 %v7693_v17  ;;  %v10105_v17 = vld [vmem:[#allocation15 + $0xd8] sm:$0xff]  }
0x3861   :  { %v9888_v20 = vpop.permute.xlu0 %9887 }
0x3862   :  { %v9890_v59 = vunpack.i.h.bf16 %v9888_v20  ;;  %v9889_v21 = vunpack.i.l.bf16 %v9888_v20  ;;  %v10106_v20 = vld [vmem:[#allocation15 + $0x98] sm:$0xff]  }
0x3864   :  { %v9749_v22 = vpack.c.bf16 %v9890_v59, %v9889_v21  ;;  %v10107_v59 = vld [vmem:[#allocation15 + $0xe0] sm:$0xff]  }
0x3865   :  { %v6903_v23 = vpop.permute.xlu0 %6902  ;;  %v10108_v21 = vld [vmem:[#allocation15 + $0xa0] sm:$0xff]  }
0x3866   :  { %6905 = vst.msk [vmem:[#allocation2] sm:$0xff] %vm945_vm4, %v6903_v23  ;;  %9750 = vmatpush3.bf16.msra.mxu0 %v9749_v22  ;;  %v10109_v22 = vld [vmem:[#allocation15 + $0xe8] sm:$0xff]  }
0x3867   :  { %9619 = vmatprep.subr.bf16.mxu0 %v10498_v24 }
0x3868   :  { %v10258_v26 = vpop.eup %10257 }
0x3869   :  { %v7695_v6 = vmul.f32 %v10258_v26, %v10256_v16  ;;  %v7080_v9 = vpop.permute.xlu0 %7079  ;;  %v10103_v16 = vld [vmem:[#allocation15 + $0xd0] sm:$0xff]  }
0x386a   :  { %7082 = vst.msk [vmem:[#allocation2] sm:$0xff] %vm1116_vm5, %v7080_v9 }
0x386b   :  { %9617 = vmatmul.mubr.msk.f32.vlgmr.msra.gmra.mrb[94].mxu0 %vm2394_vm7, %v7695_v6 }
0x386c   :  { %9635 = vmatprep.mubr.msk.bf16.mxu0 %vm10499_vm0, %v10498_v24  ;;  %9620 = vmatpush3.bf16.msra.mxu0 %v10067_v39 }
0x386d   :  { %9621 = vmatprep.subr.bf16.mxu0 %v10498_v24 }
0x3870   :  { %9622 = vmatpush3.bf16.msra.mxu0 %v10068_v56 }
0x3871   :  { %9623 = vmatprep.subr.bf16.mxu0 %v10498_v24  ;;  %v7780_v50 = vld [vmem:[#allocation2] sm:$0xff] }
0x3874   :  { %9624 = vmatpush3.bf16.msra.mxu0 %v10069_v62 }
0x3875   :  { %9625 = vmatprep.subr.bf16.mxu0 %v10498_v24 }
0x3878   :  { %9626 = vmatpush3.bf16.msra.mxu0 %v10070_v28 }
0x3879   :  { %9627 = vmatprep.subr.bf16.mxu0 %v10498_v24 }
0x387c   :  { %9628 = vmatpush3.bf16.msra.mxu0 %v10071_v8  ;;  %v8658_v8 = vld [vmem:[%s11713_s12 + $0x4] ss:$0 sm:$0xff] }
0x387d   :  { %9629 = vmatprep.subr.bf16.mxu0 %v10498_v24 }
0x3880   :  { %9630 = vmatpush3.bf16.msra.mxu0 %v10072_v33 }
0x3881   :  { %9631 = vmatprep.subr.bf16.mxu0 %v10498_v24 }
0x3884   :  { %9632 = vmatpush3.bf16.msra.mxu0 %v10073_v35 }
0x3885   :  { %9633 = vmatprep.subr.bf16.mxu0 %v10498_v24 }
0x3888   :  { %9634 = vmatpush3.bf16.msra.mxu0 %v10074_v14 }
0x3889   :  { %8993 = vmatprep.subr.bf16.mxu0 %v10099_v19 }
0x393e   :  { %v7771_v43 = vpop.f32.mrb[94].mxu0 }
0x393f   :  { %7776 = vrot.lane.b32.xlu1 %v7771_v43, %s10500_s1  ;;  %v9618_v7 = vpop.f32.mrb[95].mxu0  ;;  %v8659_v43 = vld [vmem:[%s11714_s13 + $0x4] ss:$0 sm:$0xff] }
0x39b1   :  { %v7777_v44 = vpop.permute.xlu1 %7776 }
0x39b2   :  { %7779 = vst.msk [vmem:[#allocation2 + $0x8] sm:$0xff] %vm1116_vm5, %v7777_v44 }
0x39b9   :  { %v7781_v49 = vld [vmem:[#allocation2 + $0x8] sm:$0xff] }
0x39ba   :  { %v7799_v52 = vpack.c.bf16 %v7781_v49, %v7780_v50 }
0x39bc   :  { %9636 = vmatmul.mubr.bf16.vlgmr.msra.gmra.mrb[96].mxu0 %v7799_v52  ;;  %v10110_v52 = vld [vmem:[#allocation15 + $0xa8] sm:$0xff]  }
0x39bd   :  { %8994 = vmatpush3.bf16.msra.mxu0 %v10100_v13 }
0x39be   :  { %8995 = vmatprep.subr.bf16.mxu0 %v10101_v0 }
0x39c1   :  { %8996 = vmatpush3.bf16.msra.mxu0 %v10102_v15 }
0x39c2   :  { %8997 = vmatprep.subr.bf16.mxu0 %v10103_v16 }
0x39c5   :  { %8998 = vmatpush3.bf16.msra.mxu0 %v10104_v3 }
0x39c6   :  { %8999 = vmatprep.subr.bf16.mxu0 %v10105_v17 }
0x39c9   :  { %9000 = vmatpush3.bf16.msra.mxu0 %v10106_v20 }
0x39ca   :  { %9001 = vmatprep.subr.bf16.mxu0 %v10107_v59 }
0x39cd   :  { %9002 = vmatpush3.bf16.msra.mxu0 %v10108_v21 }
0x39ce   :  { %9003 = vmatprep.subr.bf16.mxu0 %v10109_v22 }
0x39d1   :  { %9004 = vmatpush3.bf16.msra.mxu0 %v10110_v52 }
0x3a8f   :  { %v7890_v63 = vpop.f32.mrb[96].mxu0 }
0x3a90   :  { %v7891_v48 = vadd.f32 %v8647_v36, %v7890_v63  ;;  %v9637_v54 = vpop.f32.mrb[97].mxu0  ;;  %v10112_v63 = vld [vmem:[#allocation15 + $0xb0] sm:$0xff]  }
0x3a91   :  { %v7893_v24 = vpop.f32.mrb[98].mxu0  ;;  %v10114_v54 = vld [vmem:[#allocation15 + $0xb8] sm:$0xff]  }
0x3a92   :  { %v7897_v34 = vadd.f32 %v7891_v48, %v11438_v40  ;;  %v7894_v58 = vadd.f32 %v8647_v36, %v7893_v24  ;;  %v9638_v60 = vpop.f32.mrb[99].mxu0  ;;  %v10111_v36 = vld [vmem:[#allocation15 + $0xf0] sm:$0xff]   ;;  %v10113_v48 = vld [vmem:[#allocation15 + $0xf8] sm:$0xff]  }
0x3a93   :  { %9005 = vmatprep.subr.bf16.mxu0 %v10111_v36  ;;  %v8660_v24 = vld [vmem:[%s11710_s9 + $0x2] sm:$0x3] }
0x3a94   :  { %v7898_v55 = vadd.f32 %v7894_v58, %v11440_v41  ;;  %7903 = vadd.xlane.f32.xlu0 %v7897_v34  ;;  %9006 = vmatpush3.bf16.msra.mxu0 %v10112_v63  ;;  %v7969_v58 = vrot.slane %v8660_v24, %v10730_v27  ;;  %v8678_v27 = vld [vmem:[%s11712_s11 + $0x1] ss:$0 sm:$0xff] }
0x3a95   :  { %9007 = vmatprep.subr.bf16.mxu0 %v10113_v48 }
0x3a96   :  { %7905 = vadd.xlane.f32.xlu1 %v7898_v55 }
0x3a98   :  { %9008 = vmatpush3.bf16.msra.mxu0 %v10114_v54 }
0x3b21   :  { %v7904_v4 = vpop.xlane.xlu0 %7903 }
0x3b22   :  { %v7907_v30 = vmul.f32 0.0078125, %v7904_v4 }
0x3b23   :  { %v7906_v31 = vpop.xlane.xlu1 %7905 }
0x3b24   :  { %v7909_v51 = vsub.f32 %v7897_v34, %v7907_v30  ;;  %v7908_v47 = vmul.f32 0.0078125, %v7906_v31  ;;  %v7965_v34 = vrot.slane %v8660_v24, %v10732_v29 }
0x3b26   :  { %v11661_v40 = vsub.f32 %v7898_v55, %v7908_v47  ;;  %v7911_v57 = vmul.f32 %v7909_v51, %v7909_v51 }
0x3b28   :  { %7913 = vadd.xlane.f32.xlu0 %v7911_v57  ;;  %v7912_v41 = vmul.f32 %v11661_v40, %v11661_v40 }
0x3b2c   :  { %7915 = vadd.xlane.f32.xlu0 %v7912_v41 }
0x3bb5   :  { %v7914_v23 = vpop.xlane.xlu0 %7913 }
0x3bb6   :  { %v7917_v26 = vmul.f32 0.0078125, %v7914_v23 }
0x3bb8   :  { %v7919_v6 = vadd.f32 1e-05, %v7917_v26  ;;  %v8697_v26 = vld [vmem:[%s11713_s12 + $0x5] ss:$0 sm:$0xff] }
0x3bb9   :  { %v7916_v9 = vpop.xlane.xlu0 %7915 }
0x3bba   :  { %10259 = vrsqrt.f32 %v7919_v6  ;;  %v7918_v39 = vmul.f32 0.0078125, %v7916_v9 }
0x3bbc   :  { %v7920_v56 = vadd.f32 1e-05, %v7918_v39  ;;  %v8698_v39 = vld [vmem:[%s11714_s13 + $0x5] ss:$0 sm:$0xff] }
0x3bbe   :  { %10261 = vrsqrt.f32 %v7920_v56 }
0x3bc4   :  { %v10260_v62 = vpop.eup %10259 }
0x3bc5   :  { %v7923_v28 = vmul.f32 %v10260_v62, %v7909_v51 }
0x3bc7   :  { %v7931_v14 = vmul.f32 %v8658_v8, %v7923_v28 }
0x3bc8   :  { %v10262_v33 = vpop.eup %10261 }
0x3bc9   :  { %v7924_v35 = vmul.f32 %v10262_v33, %v11661_v40  ;;  %v7939_v44 = vadd.f32 %v8659_v43, %v7931_v14 }
0x3bcb   :  { %v7932_v7 = vmul.f32 %v8658_v8, %v7924_v35 }
0x3bcd   :  { %v7940_v50 = vadd.f32 %v8659_v43, %v7932_v7 }
0x3bcf   :  { %v7958_v49 = vpack.c.bf16 %v7940_v50, %v7939_v44 }
0x3bd1   :  { %8085 = vmatmul.mubr.bf16.vlgmr.msra.gmra.mrb[92].mxu1 %v7958_v49 }
0x3ca4   :  { %v8086_v60 = vpop.f32.mrb[92].mxu1 }
0x3ca5   :  { %v8087_v55 = vadd.f32 %v8086_v60, %v7965_v34  ;;  %v8088_v1 = vpop.f32.mrb[93].mxu1 }
0x3ca6   :  { %v8089_v53 = vadd.f32 %v8088_v1, %v7969_v58  ;;  %v8090_v45 = vpop.f32.mrb[94].mxu1 }
0x3ca7   :  { %v8091_v61 = vadd.f32 %v8090_v45, %v7965_v34  ;;  %v8092_v4 = vpop.f32.mrb[95].mxu1  ;;  %v8095_v31 = vmax.f32 %v8087_v55, 0.0 }
0x3ca8   :  { %v8093_v30 = vadd.f32 %v8092_v4, %v7969_v58  ;;  %v8096_v47 = vmax.f32 %v8089_v53, 0.0 }
0x3ca9   :  { %v8097_v51 = vmax.f32 %v8091_v61, 0.0 }
0x3caa   :  { %v8098_v40 = vmax.f32 %v8093_v30, 0.0 }
0x3cab   :  { %v8132_v57 = vpack.c.bf16 %v8097_v51, %v8095_v31 }
0x3cac   :  { %v8133_v41 = vpack.c.bf16 %v8098_v40, %v8096_v47 }
0x3cae   :  { %8270 = vmatprep.mubr.bf16.mxu0 %v8133_v41 }
0x3caf   :  { %8271 = vmatmul.mubr.bf16.vlgmr.msra.gmra.mrb[100].mxu0 %v8132_v57 }
0x3d82   :  { %v9009_v37 = vpop.f32.mrb[100].mxu0 }
0x3d83   :  { %v9010_v29 = vpop.f32.mrb[101].mxu0 }
0x3d84   :  { %v9011_v5 = vadd.f32 %v9010_v29, %v9009_v37  ;;  %v9012_v38 = vpop.f32.mrb[102].mxu0 }
0x3d85   :  { %v9013_v32 = vpop.f32.mrb[103].mxu0 }
0x3d86   :  { %v8273_v2 = vadd.f32 %v9011_v5, %v8678_v27  ;;  %v9014_v25 = vadd.f32 %v9013_v32, %v9012_v38 }
0x3d88   :  { %v8276_v10 = vadd.f32 %v9014_v25, %v8678_v27  ;;  %v8279_v11 = vadd.f32 %v8273_v2, %v7939_v44 }
0x3d8a   :  { %8285 = vadd.xlane.f32.xlu1 %v8279_v11  ;;  %v8280_v42 = vadd.f32 %v8276_v10, %v7940_v50 }
0x3d8c   :  { %8287 = vadd.xlane.f32.xlu0 %v8280_v42 }
0x3e17   :  { %v8286_v12 = vpop.xlane.xlu1 %8285 }
0x3e18   :  { %v8289_v46 = vmul.f32 0.0078125, %v8286_v12 }
0x3e19   :  { %v8288_v18 = vpop.xlane.xlu0 %8287 }
0x3e1a   :  { %v8291_v19 = vsub.f32 %v8279_v11, %v8289_v46  ;;  %v8290_v13 = vmul.f32 0.0078125, %v8288_v18 }
0x3e1c   :  { %v8292_v0 = vsub.f32 %v8280_v42, %v8290_v13  ;;  %v8293_v15 = vmul.f32 %v8291_v19, %v8291_v19 }
0x3e1e   :  { %8295 = vadd.xlane.f32.xlu1 %v8293_v15  ;;  %v8294_v16 = vmul.f32 %v8292_v0, %v8292_v0 }
0x3e20   :  { %8297 = vadd.xlane.f32.xlu0 %v8294_v16 }
0x3eab   :  { %v8296_v3 = vpop.xlane.xlu1 %8295 }
0x3eac   :  { %v8299_v17 = vmul.f32 0.0078125, %v8296_v3 }
0x3ead   :  { %v8298_v20 = vpop.xlane.xlu0 %8297 }
0x3eae   :  { %v8301_v59 = vadd.f32 1e-05, %v8299_v17  ;;  %v8300_v21 = vmul.f32 0.0078125, %v8298_v20 }
0x3eb0   :  { %10263 = vrsqrt.f32 %v8301_v59  ;;  %v8302_v22 = vadd.f32 1e-05, %v8300_v21 }
0x3eb2   :  { %10265 = vrsqrt.f32 %v8302_v22 }
0x3eba   :  { %v10264_v23 = vpop.eup %10263 }
0x3ebb   :  { %v8305_v6 = vmul.f32 %v10264_v23, %v8291_v19 }
0x3ebc   :  { %v10266_v9 = vpop.eup %10265 }
0x3ebd   :  { %v8306_v56 = vmul.f32 %v10266_v9, %v8292_v0  ;;  %v8313_v62 = vmul.f32 %v8697_v26, %v8305_v6 }
0x3ebf   :  { %v8314_v28 = vmul.f32 %v8697_v26, %v8306_v56  ;;  %v8321_v8 = vadd.f32 %v8698_v39, %v8313_v62 }
0x3ec1   :  { %v8322_v33 = vadd.f32 %v8698_v39, %v8314_v28  ;;  %8323 = vst [vmem:[#allocation17] sm:$0xff] %v8321_v8 }
0x3ec3   :  { %8324 = vst [vmem:[#allocation17 + $0x8] sm:$0xff] %v8322_v33 }
0x3ec4   :  { %10460 = shalt.err (!%p10457_p12)
}
0x3ec5   :  { %s10461_s13 = scalar_lea.hbm %s11715_s14, 256 }
0x3ec6   :  { %p10462_p13 = scmp.ne.s32.totalorder %s11715_s14, %s10461_s13  ;;  %p10465_p0 = scmp.lt.u32.totalorder %s10461_s13, %s11715_s14 }
0x3ec8   :  { %p10467_p1 = pnand %p10465_p0, %p10462_p13 }
0x3eca   :  { %10470 = shalt.err (!%p10467_p1)
}
0x3ecb   :  { %8336 = dma.vmem_to_hbm [thread:$0]  %s8331_s23, 256, %s11715_s14, [#allocation5], %s10485_s25, %s10485_s25, %s10486_s26  }
0x3ecc   :  { %10481 = dma.done.wait [#allocation5], 256  }
0x3ecd   :  { %10482 = vsyncadd [#allocation5], 4294967040 }
0x3ece   :  { %8340 = vsyncpa [#allocation4], 1 }
0x3ecf   :  { %8341 = vsyncpa [#allocation7], 1 }
0x3ed0   :  { %8342 = vsyncpa [#allocation10], 1 }
0x3ed1   :  { %8343 = vsyncpa [#allocation13], 1 }
0x3ed2   :  { %8344 = vsyncpa [#allocation16], 1 }
0x3ed3   :  { %8345 = vsyncpa [#allocation5], 1 }

</bundles_post_ra>
